<compile_context>
chip_gen: v5e
topology: v5e:2x2
jax: 0.10.0
libtpu: 0.0.40
codegen_flags: <defaults>
</compile_context>

<pallas_src>
import functools

import jax
import jax.numpy as jnp
from jax import lax
from jax.experimental import pallas as pl
from jax.experimental.pallas import tpu as pltpu

EPS = 1e-5  # PyTorch BatchNorm2d default eps


def _round_up(v, m):
    return (v + m - 1) // m * m


def _cdiv(a, b):
    return (a + b - 1) // b


def _fold_bn(bn):
    gamma, beta, mean, var = bn
    s = gamma / jnp.sqrt(var + EPS)
    return s, beta - mean * s


def _vmem_limit_bytes():
    # Generation-aware budget: v5e/v6e have 128 MiB physical VMEM, v7x 64 MiB.
    try:
        cap = int(pltpu.get_tpu_info().vmem_capacity_bytes)
        return min(int(cap * 3 // 4), 96 * 1024 * 1024)
    except Exception:
        return 64 * 1024 * 1024


# ----------------------------------------------------------------------------
# Pass 1: BN1 -> conv1 -> BN2/PReLU -> conv2 -> BN3 (+ shortcut, partial pool)
# ----------------------------------------------------------------------------
def _make_main_kernel(*, Wp, Wo, Ho, TO, TXW, TH1W, MT2, RX, RH,
                      stride, Cin, Cout, dim_match, packed1, packed2):
    offs = [dy * Wp + dx for dy in range(3) for dx in range(3)]
    bf16 = jnp.bfloat16
    f32 = jnp.float32

    def conv3x3(src_ref, w_ref, count, cstride, cin, packed):
        # 3x3 conv as nine constant-offset (optionally strided) slab reads from
        # a flat padded scratch.  Per-tap MXU accumulation unless C is small.
        def tap(o):
            if cstride == 1:
                v = src_ref[pl.ds(o, count), :]
            else:
                v = src_ref[pl.ds(o, count, stride=cstride), :]
            return v.astype(bf16)

        if packed:  # small-C path: one big-K matmul
            patch = jnp.concatenate([tap(o) for o in offs], axis=1)
            return jnp.dot(patch, w_ref[...], preferred_element_type=f32)
        acc = jnp.dot(tap(offs[0]), w_ref[0:cin, :], preferred_element_type=f32)
        for i in range(1, 9):
            acc = acc + jnp.dot(tap(offs[i]), w_ref[i * cin:(i + 1) * cin, :],
                                preferred_element_type=f32)
        return acc

    def kernel(x_ref, m_ref, w1_ref, w2_ref, vec_ref, wsc_ref,
               y_ref, sc_ref, pool_ref, xpad, h1pad):
        t = pl.program_id(1)

        xv = x_ref.at[0, 0]                         # (TXW, Cin) raw-x window
        x = xv[...]
        m = m_ref[0]                                # (TXW, 1) pixel validity

        # ---- BN1 (inference); mask keeps the zero padding exactly zero.
        bn1s = vec_ref[0:1, 0:Cin]
        bn1b = vec_ref[1:2, 0:Cin]
        xbn = (x * bn1s + bn1b) * m

        # ---- conv1 source scratch (bf16), data at offset 1, tiny halo zeroed.
        xpad[0:1, :] = jnp.zeros((1, Cin), bf16)
        xpad[1 + TXW:RX, :] = jnp.zeros((RX - TXW - 1, Cin), bf16)
        xpad[1:1 + TXW, :] = xbn.astype(bf16)

        # ---- conv1 3x3 / stride 1.
        acc1 = conv3x3(xpad, w1_ref, TH1W, 1, Cin, packed1)    # (TH1W, Cout)

        # ---- BN2 + PReLU (f32); re-mask so padding acts as conv2's zero pad.
        bn2s = vec_ref[2:3, 0:Cout]
        bn2b = vec_ref[3:4, 0:Cout]
        pr = vec_ref[4:5, 0:Cout]
        h1 = acc1 * bn2s + bn2b
        h1 = jnp.where(h1 >= 0.0, h1, pr * h1)
        h1 = h1 * m[Wp:Wp + TH1W, :]

        h1pad[0:1, :] = jnp.zeros((1, Cout), f32)
        h1pad[1 + TH1W:RH, :] = jnp.zeros((RH - TH1W - 1, Cout), f32)
        h1pad[1:1 + TH1W, :] = h1

        # ---- conv2 3x3 / stride s, evaluated only at strided output positions.
        acc2 = conv3x3(h1pad, w2_ref, MT2, stride, Cout, packed2)  # (MT2, Cout)

        bn3s = vec_ref[5:6, 0:Cout]
        bn3b = vec_ref[6:7, 0:Cout]
        y = acc2 * bn3s + bn3b                       # pre-SE-gate conv branch

        # ---- shortcut straight from the raw x slab (no extra HBM input).
        if stride == 1:
            xs = x[2 * Wp:2 * Wp + MT2, :]
        else:
            xs = xv[pl.ds(2 * Wp, MT2, stride=stride), :]
        if dim_match:
            short = xs                               # identity
        else:
            scs = vec_ref[7:8, 0:Cout]
            scb = vec_ref[8:9, 0:Cout]
            short = jnp.dot(xs.astype(bf16), wsc_ref[...],
                            preferred_element_type=f32) * scs + scb

        # ---- compact (pad-column-free) writeback + partial SE pool sum.
        pooled = jnp.zeros((1, Cout), f32)
        for oo in range(TO):
            yr = y[oo * Wp:oo * Wp + Wo, :]
            y_ref[0, oo] = yr
            sc_ref[0, oo] = short[oo * Wp:oo * Wp + Wo, :]
            pooled = pooled + jnp.where(t * TO + oo < Ho,
                                        jnp.sum(yr, axis=0, keepdims=True),
                                        0.0)
        pool_ref[0, 0] = pooled

    return kernel


# ----------------------------------------------------------------------------
# Pass 2 (epilogue): finish SE pool -> fc1 -> ReLU -> fc2 -> sigmoid ->
#                    gate * res + shortcut
# ----------------------------------------------------------------------------
def _make_epilogue_kernel(*, Cout, inv_cnt):
    def kernel(pool_ref, y_ref, sc_ref, wfc1_ref, wfc2_ref, o_ref):
        pooled = jnp.sum(pool_ref[0, :, 0, :], axis=0, keepdims=True) * inv_cnt
        z = jnp.maximum(jnp.dot(pooled, wfc1_ref[...],
                                preferred_element_type=jnp.float32), 0.0)
        z = jnp.dot(z, wfc2_ref[...], preferred_element_type=jnp.float32)
        gate = jax.nn.sigmoid(z)                               # (1, Cout)
        o_ref[0] = sc_ref[0] + y_ref[0] * gate.reshape(1, 1, Cout)
    return kernel


# ----------------------------------------------------------------------------
# Wrapper
# ----------------------------------------------------------------------------
def bottleneck_ir_se_forward(x_nchw, params, *, stride, dim_match,
                             tile_rows=8, tap_packed=None):
    N, Cin, H, W = x_nchw.shape
    Cout = params['w1'].shape[0]
    Cmid = params['wfc1'].shape[0]
    if dim_match:
        # TODO(synk): dim_match with stride > 1 (MaxPool2d(1, stride) shortcut)
        # is not supported.
        assert stride == 1 and Cin == Cout

    s = stride
    Wp = W + 2
    Ho = (H - 1) // s + 1
    Wo = (W - 1) // s + 1
    TO = max(1, min(tile_rows, Ho))          # conv2-output rows per tile
    nT = _cdiv(Ho, TO)
    Ho_pad = nT * TO
    TH1 = (TO - 1) * s + 3                   # conv1-output rows needed per tile
    TX = TH1 + 2                             # raw-x rows per tile (incl. halo)
    TXW = TX * Wp
    TH1W = TH1 * Wp
    MT2 = TO * Wp                            # flat conv2 entries per tile
    RX = _round_up(TXW + 2, 8)
    RH = _round_up(s * (MT2 - 1) + 2 * Wp + 3, 8)
    Hp = max(H + 2, (Ho_pad - 1) * s + 5)    # padded image rows (2 top pads)

    packed1 = (Cin < 128) if tap_packed is None else bool(tap_packed)
    packed2 = (Cout < 128) if tap_packed is None else bool(tap_packed)

    # ---- host-side layout prep -------------------------------------------
    x_nhwc = jnp.transpose(x_nchw, (0, 2, 3, 1)).astype(jnp.float32)
    x_p = jnp.pad(x_nhwc, ((0, 0), (2, Hp - 2 - H), (0, 2), (0, 0)))
    x_flat = x_p.reshape(N, Hp * Wp, Cin)
    # Per-tile halo'd input windows (rows overlap by the 3x3 receptive field).
    # TODO(synk): avoid the small input duplication by slicing a resident
    # whole-image block in-kernel with a dynamic offset.
    x_tiles = jnp.stack(
        [x_flat[:, t * TO * s * Wp: t * TO * s * Wp + TXW, :]
         for t in range(nT)], axis=1)                       # (N, nT, TXW, Cin)

    # Pixel-validity mask per tile, precomputed once (no per-step iota/rem).
    g_row = (jnp.arange(nT)[:, None] * TO * s - 2) + jnp.arange(TX)[None, :]
    rvalid = (g_row >= 0) & (g_row < H)                     # (nT, TX)
    cvalid = jnp.arange(Wp) < W                             # (Wp,)
    mask = (rvalid[:, :, None] & cvalid[None, None, :]).astype(jnp.float32)
    mask = mask.reshape(nT, TXW, 1)

    # Folded BN + per-channel vectors packed into ONE (9, Cmax) input.
    bn1s, bn1b = _fold_bn(params['bn1'])
    bn2s, bn2b = _fold_bn(params['bn2'])
    bn3s, bn3b = _fold_bn(params['bn3'])
    Cmax = max(Cin, Cout)
    if dim_match:
        scs = jnp.zeros((Cout,), jnp.float32)
        scb = jnp.zeros((Cout,), jnp.float32)
        wscb = jnp.zeros((Cin, Cout), jnp.bfloat16)         # unused dummy
    else:
        scs, scb = _fold_bn(params['bnsc'])
        wscb = params['wsc'].T.astype(jnp.bfloat16)         # (Cin, Cout)

    def _padv(v):
        v = v.astype(jnp.float32).reshape(-1)
        return jnp.pad(v, (0, Cmax - v.shape[0]))

    vecs = jnp.stack([_padv(v) for v in
                      (bn1s, bn1b, bn2s, bn2b, params['prelu'],
                       bn3s, bn3b, scs, scb)], axis=0)      # (9, Cmax)

    # Tap-major, bf16 conv weights for the MXU.
    w1p = jnp.transpose(params['w1'], (2, 3, 1, 0)).reshape(9 * Cin, Cout)
    w1p = w1p.astype(jnp.bfloat16)
    w2p = jnp.transpose(params['w2'], (2, 3, 1, 0)).reshape(9 * Cout, Cout)
    w2p = w2p.astype(jnp.bfloat16)
    wfc1 = params['wfc1'].T.astype(jnp.float32)             # (Cout, Cmid)
    wfc2 = params['wfc2'].T.astype(jnp.float32)             # (Cmid, Cout)

    vmem_limit = _vmem_limit_bytes()

    main_kernel = _make_main_kernel(
        Wp=Wp, Wo=Wo, Ho=Ho, TO=TO, TXW=TXW, TH1W=TH1W, MT2=MT2,
        RX=RX, RH=RH, stride=s, Cin=Cin, Cout=Cout, dim_match=dim_match,
        packed1=packed1, packed2=packed2)

    const2 = lambda shape: pl.BlockSpec(shape, lambda n, t: (0, 0))
    y_pre, sc_out, pool_part = pl.pallas_call(
        main_kernel,
        out_shape=(jax.ShapeDtypeStruct((N, Ho_pad, Wo, Cout), jnp.float32),
                   jax.ShapeDtypeStruct((N, Ho_pad, Wo, Cout), jnp.float32),
                   jax.ShapeDtypeStruct((N, nT, 1, Cout), jnp.float32)),
        grid_spec=pltpu.PrefetchScalarGridSpec(
            num_scalar_prefetch=0,
            grid=(N, nT),
            in_specs=[
                pl.BlockSpec((1, 1, TXW, Cin), lambda n, t: (n, t, 0, 0)),
                pl.BlockSpec((1, TXW, 1), lambda n, t: (t, 0, 0)),
                const2((9 * Cin, Cout)),
                const2((9 * Cout, Cout)),
                const2((9, Cmax)),
                const2((Cin, Cout)),
            ],
            out_specs=[
                pl.BlockSpec((1, TO, Wo, Cout), lambda n, t: (n, t, 0, 0)),
                pl.BlockSpec((1, TO, Wo, Cout), lambda n, t: (n, t, 0, 0)),
                pl.BlockSpec((1, 1, 1, Cout), lambda n, t: (n, t, 0, 0)),
            ],
            scratch_shapes=[pltpu.VMEM((RX, Cin), jnp.bfloat16),
                            pltpu.VMEM((RH, Cout), jnp.float32)]),
        compiler_params=pltpu.CompilerParams(
            dimension_semantics=("parallel", "parallel"),
            vmem_limit_bytes=vmem_limit),
    )(x_tiles, mask, w1p, w2p, vecs, wscb)

    epi_kernel = _make_epilogue_kernel(Cout=Cout, inv_cnt=1.0 / float(Ho * Wo))
    out4 = pl.pallas_call(
        epi_kernel,
        out_shape=jax.ShapeDtypeStruct((N, Ho_pad, Wo, Cout), jnp.float32),
        grid_spec=pltpu.PrefetchScalarGridSpec(
            num_scalar_prefetch=0,
            grid=(N,),
            in_specs=[
                pl.BlockSpec((1, nT, 1, Cout), lambda n: (n, 0, 0, 0)),
                pl.BlockSpec((1, Ho_pad, Wo, Cout), lambda n: (n, 0, 0, 0)),
                pl.BlockSpec((1, Ho_pad, Wo, Cout), lambda n: (n, 0, 0, 0)),
                pl.BlockSpec((Cout, Cmid), lambda n: (0, 0)),
                pl.BlockSpec((Cmid, Cout), lambda n: (0, 0)),
            ],
            out_specs=pl.BlockSpec((1, Ho_pad, Wo, Cout),
                                   lambda n: (n, 0, 0, 0))),
        compiler_params=pltpu.CompilerParams(
            dimension_semantics=("parallel",),
            vmem_limit_bytes=vmem_limit),
    )(pool_part, y_pre, sc_out, wfc1, wfc2)

    out = out4[:, :Ho, :, :]                                 # drop padded rows
    return jnp.transpose(out, (0, 3, 1, 2))                  # NCHW


# ----------------------------------------------------------------------------
# Pure-JAX reference (NCHW, mirrors the PyTorch forward in eval mode)
# ----------------------------------------------------------------------------
def _bn_ref(x, bn):
    gamma, beta, mean, var = bn
    s = gamma / jnp.sqrt(var + EPS)
    return x * s[None, :, None, None] + (beta - mean * s)[None, :, None, None]


def bottleneck_ir_se_reference(x, params, *, stride, dim_match):
    dn = ('NCHW', 'OIHW', 'NCHW')
    h = _bn_ref(x, params['bn1'])
    h = lax.conv_general_dilated(h, params['w1'], (1, 1), ((1, 1), (1, 1)),
                                 dimension_numbers=dn,
                                 precision=lax.Precision.HIGHEST)
    h = _bn_ref(h, params['bn2'])
    a = params['prelu'][None, :, None, None]
    h = jnp.where(h >= 0, h, a * h)
    h = lax.conv_general_dilated(h, params['w2'], (stride, stride),
                                 ((1, 1), (1, 1)), dimension_numbers=dn,
                                 precision=lax.Precision.HIGHEST)
    h = _bn_ref(h, params['bn3'])
    pooled = jnp.mean(h, axis=(2, 3))
    z = jnp.maximum(jnp.dot(pooled, params['wfc1'].T,
                            precision=lax.Precision.HIGHEST), 0.0)
    z = jnp.dot(z, params['wfc2'].T, precision=lax.Precision.HIGHEST)
    gate = jax.nn.sigmoid(z)
    h = h * gate[:, :, None, None]
    if dim_match:
        shortcut = x
    else:
        shortcut = lax.conv_general_dilated(
            x, params['wsc'][:, :, None, None], (stride, stride),
            ((0, 0), (0, 0)), dimension_numbers=dn,
            precision=lax.Precision.HIGHEST)
        shortcut = _bn_ref(shortcut, params['bnsc'])
    return shortcut + h


def _make_params(key, Cin, Cout, reduction, dim_match):
    Cmid = max(1, Cout // reduction)
    ks = jax.random.split(key, 12)

    def bn_params(k, c):
        k1, k2, k3, k4 = jax.random.split(k, 4)
        return (1.0 + 0.1 * jax.random.normal(k1, (c,), jnp.float32),   # gamma
                0.1 * jax.random.normal(k2, (c,), jnp.float32),          # beta
                0.1 * jax.random.normal(k3, (c,), jnp.float32),          # mean
                0.5 + jax.random.uniform(k4, (c,), jnp.float32))         # var

    params = {
        'bn1': bn_params(ks[0], Cin),
        'w1': 0.1 * jax.random.normal(ks[1], (Cout, Cin, 3, 3), jnp.float32),
        'bn2': bn_params(ks[2], Cout),
        'prelu': 0.25 + 0.05 * jax.random.normal(ks[3], (Cout,), jnp.float32),
        'w2': 0.1 * jax.random.normal(ks[4], (Cout, Cout, 3, 3), jnp.float32),
        'bn3': bn_params(ks[5], Cout),
        'wfc1': 0.2 * jax.random.normal(ks[6], (Cmid, Cout), jnp.float32),
        'wfc2': 0.2 * jax.random.normal(ks[7], (Cout, Cmid), jnp.float32),
    }
    if not dim_match:
        params['wsc'] = 0.2 * jax.random.normal(ks[8], (Cout, Cin), jnp.float32)
        params['bnsc'] = bn_params(ks[9], Cout)
    return params


if __name__ == "__main__":
    key = jax.random.PRNGKey(0)
    tests = [
        dict(name="stride2_proj_packed", Cin=16, Cout=32, H=16, W=16,
             stride=2, dim_match=False, tile_rows=4, tap_packed=None),
        dict(name="stride2_proj_pertap", Cin=16, Cout=32, H=16, W=16,
             stride=2, dim_match=False, tile_rows=4, tap_packed=False),
        dict(name="stride2_partial_tile", Cin=16, Cout=32, H=16, W=16,
             stride=2, dim_match=False, tile_rows=3, tap_packed=None),
        dict(name="stride1_identity", Cin=32, Cout=32, H=16, W=16,
             stride=1, dim_match=True, tile_rows=8, tap_packed=None),
    ]
    for cfg in tests:
        key, kp, kx = jax.random.split(key, 3)
        params = _make_params(kp, cfg['Cin'], cfg['Cout'], 16, cfg['dim_match'])
        x = jax.random.normal(kx, (2, cfg['Cin'], cfg['H'], cfg['W']),
                              jnp.float32)
        fwd = jax.jit(functools.partial(
            bottleneck_ir_se_forward, stride=cfg['stride'],
            dim_match=cfg['dim_match'], tile_rows=cfg['tile_rows'],
            tap_packed=cfg['tap_packed']))
        out = jax.block_until_ready(fwd(x, params))
        ref = jax.block_until_ready(bottleneck_ir_se_reference(
            x, params, stride=cfg['stride'], dim_match=cfg['dim_match']))
        assert out.shape == ref.shape, (cfg['name'], out.shape, ref.shape)
        max_err = float(jnp.max(jnp.abs(out - ref)))
        # bf16 MXU operands vs. f32 HIGHEST reference -> a few e-2 worst case.
        assert max_err < 8e-2, f"{cfg['name']}: max abs err {max_err}"
    print("KERNEL_OK")
</pallas_src>

<mosaic_0001>
module attributes {stable_mosaic.version = 11 : i64} {
  func.func @kernel(%arg0: i32, %arg1: memref<1x2x1x32xf32, #tpu.memory_space<vmem>>, %arg2: memref<1x8x8x32xf32, #tpu.memory_space<vmem>>, %arg3: memref<1x8x8x32xf32, #tpu.memory_space<vmem>>, %arg4: memref<32x2xf32, #tpu.memory_space<vmem>>, %arg5: memref<2x32xf32, #tpu.memory_space<vmem>>, %arg6: memref<1x8x8x32xf32, #tpu.memory_space<vmem>>) attributes {dimension_semantics = [#tpu.dimension_semantics<parallel>], iteration_bounds = array<i64: 2>, scalar_prefetch = 0 : i64, scratch_operands = 0 : i64, tpu.core_type = #tpu.core_type<tc>, window_params = [{transform_indices = @transform_0, window_bounds = array<i64: 1, 2, 1, 32>}, {transform_indices = @transform_1, window_bounds = array<i64: 1, 8, 8, 32>}, {transform_indices = @transform_2, window_bounds = array<i64: 1, 8, 8, 32>}, {pipeline_mode = #tpu.pipeline_mode<synchronous>, transform_indices = @transform_3, window_bounds = array<i64: 32, 2>}, {pipeline_mode = #tpu.pipeline_mode<synchronous>, transform_indices = @transform_4, window_bounds = array<i64: 2, 32>}, {transform_indices = @transform_5, window_bounds = array<i64: 1, 8, 8, 32>}]} {
    %c0 = arith.constant 0 : index
    %c0_0 = arith.constant 0 : index
    %c0_1 = arith.constant 0 : index
    %c0_2 = arith.constant 0 : index
    %0 = vector.load %arg1[%c0, %c0_0, %c0_1, %c0_2] : memref<1x2x1x32xf32, #tpu.memory_space<vmem>>, vector<1x2x1x32xf32>
    %1 = vector.shape_cast %0 : vector<1x2x1x32xf32> to vector<2x32xf32>
    %cst = arith.constant dense<0.000000e+00> : vector<32xf32>
    %2 = vector.multi_reduction <add>, %1, %cst [0] : vector<2x32xf32> to vector<32xf32>
    %3 = vector.shape_cast %2 : vector<32xf32> to vector<1x32xf32>
    %cst_3 = arith.constant 1.562500e-02 : f32
    %4 = vector.broadcast %cst_3 : f32 to vector<1x32xf32>
    %5 = arith.mulf %3, %4 : vector<1x32xf32>
    %c0_4 = arith.constant 0 : index
    %c0_5 = arith.constant 0 : index
    %6 = vector.load %arg4[%c0_4, %c0_5] : memref<32x2xf32, #tpu.memory_space<vmem>>, vector<32x2xf32>
    %cst_6 = arith.constant dense<0.000000e+00> : vector<1x2xf32>
    %7 = tpu.matmul %5, %6, %cst_6 {dimension_numbers = #tpu.dot_dimension_numbers<[1], [0], [0], [1], [0, 0, 1, 1], [], []>} : vector<1x32xf32>, vector<32x2xf32>, vector<1x2xf32> -> vector<1x2xf32>
    %cst_7 = arith.constant 0.000000e+00 : f32
    %8 = vector.broadcast %cst_7 : f32 to vector<1x2xf32>
    %9 = arith.maximumf %7, %8 : vector<1x2xf32>
    %c0_8 = arith.constant 0 : index
    %c0_9 = arith.constant 0 : index
    %10 = vector.load %arg5[%c0_8, %c0_9] : memref<2x32xf32, #tpu.memory_space<vmem>>, vector<2x32xf32>
    %cst_10 = arith.constant dense<0.000000e+00> : vector<1x32xf32>
    %11 = tpu.matmul %9, %10, %cst_10 {dimension_numbers = #tpu.dot_dimension_numbers<[1], [0], [0], [1], [0, 0, 1, 1], [], []>} : vector<1x2xf32>, vector<2x32xf32>, vector<1x32xf32> -> vector<1x32xf32>
    %12 = arith.negf %11 : vector<1x32xf32>
    %13 = math.exp %12 : vector<1x32xf32>
    %cst_11 = arith.constant 1.000000e+00 : f32
    %14 = vector.broadcast %cst_11 : f32 to vector<1x32xf32>
    %15 = arith.addf %14, %13 : vector<1x32xf32>
    %16 = arith.divf %14, %15 : vector<1x32xf32>
    %c0_12 = arith.constant 0 : index
    %c0_13 = arith.constant 0 : index
    %c0_14 = arith.constant 0 : index
    %c0_15 = arith.constant 0 : index
    %17 = vector.load %arg3[%c0_12, %c0_13, %c0_14, %c0_15] : memref<1x8x8x32xf32, #tpu.memory_space<vmem>>, vector<1x8x8x32xf32>
    %18 = vector.shape_cast %17 : vector<1x8x8x32xf32> to vector<8x8x32xf32>
    %c0_16 = arith.constant 0 : index
    %c0_17 = arith.constant 0 : index
    %c0_18 = arith.constant 0 : index
    %c0_19 = arith.constant 0 : index
    %19 = vector.load %arg2[%c0_16, %c0_17, %c0_18, %c0_19] : memref<1x8x8x32xf32, #tpu.memory_space<vmem>>, vector<1x8x8x32xf32>
    %20 = vector.shape_cast %19 : vector<1x8x8x32xf32> to vector<8x8x32xf32>
    %21 = vector.shape_cast %16 : vector<1x32xf32> to vector<1x1x32xf32>
    %22 = vector.broadcast %21 : vector<1x1x32xf32> to vector<8x8x32xf32>
    %23 = arith.mulf %20, %22 : vector<8x8x32xf32>
    %24 = arith.addf %18, %23 : vector<8x8x32xf32>
    %c0_20 = arith.constant 0 : index
    %c0_21 = arith.constant 0 : index
    %c0_22 = arith.constant 0 : index
    %c0_23 = arith.constant 0 : index
    %25 = vector.load %arg6[%c0_20, %c0_21, %c0_22, %c0_23] : memref<1x8x8x32xf32, #tpu.memory_space<vmem>>, vector<1x8x8x32xf32>
    %26 = vector.shape_cast %25 : vector<1x8x8x32xf32> to vector<8x8x32xf32>
    %27 = vector.shape_cast %24 : vector<8x8x32xf32> to vector<1x8x8x32xf32>
    tpu.vector_store %arg6[%c0_20, %c0_21, %c0_22, %c0_23], %27 {strides = array<i32>} : memref<1x8x8x32xf32, #tpu.memory_space<vmem>>, vector<1x8x8x32xf32>,
    return
  }
  func.func @transform_0(%arg0: i32) -> (i32, i32, i32, i32) {
    %c0_i32 = arith.constant 0 : i32
    %c0_i32_0 = arith.constant 0 : i32
    %c0_i32_1 = arith.constant 0 : i32
    %c0_i32_2 = arith.constant 0 : i32
    return %arg0, %c0_i32, %c0_i32_0, %c0_i32_1 : i32, i32, i32, i32
  }
  func.func @transform_1(%arg0: i32) -> (i32, i32, i32, i32) {
    %c0_i32 = arith.constant 0 : i32
    %c0_i32_0 = arith.constant 0 : i32
    %c0_i32_1 = arith.constant 0 : i32
    %c0_i32_2 = arith.constant 0 : i32
    return %arg0, %c0_i32, %c0_i32_0, %c0_i32_1 : i32, i32, i32, i32
  }
  func.func @transform_2(%arg0: i32) -> (i32, i32, i32, i32) {
    %c0_i32 = arith.constant 0 : i32
    %c0_i32_0 = arith.constant 0 : i32
    %c0_i32_1 = arith.constant 0 : i32
    %c0_i32_2 = arith.constant 0 : i32
    return %arg0, %c0_i32, %c0_i32_0, %c0_i32_1 : i32, i32, i32, i32
  }
  func.func @transform_3(%arg0: i32) -> (i32, i32) {
    %c0_i32 = arith.constant 0 : i32
    %c0_i32_0 = arith.constant 0 : i32
    %c0_i32_1 = arith.constant 0 : i32
    return %c0_i32, %c0_i32_0 : i32, i32
  }
  func.func @transform_4(%arg0: i32) -> (i32, i32) {
    %c0_i32 = arith.constant 0 : i32
    %c0_i32_0 = arith.constant 0 : i32
    %c0_i32_1 = arith.constant 0 : i32
    return %c0_i32, %c0_i32_0 : i32, i32
  }
  func.func @transform_5(%arg0: i32) -> (i32, i32, i32, i32) {
    %c0_i32 = arith.constant 0 : i32
    %c0_i32_0 = arith.constant 0 : i32
    %c0_i32_1 = arith.constant 0 : i32
    %c0_i32_2 = arith.constant 0 : i32
    return %arg0, %c0_i32, %c0_i32_0, %c0_i32_1 : i32, i32, i32, i32
  }
}

module attributes {stable_mosaic.version = 11 : i64} {
  func.func @kernel(%arg0: i32, %arg1: i32, %arg2: memref<1x1x198x16xf32, #tpu.memory_space<vmem>>, %arg3: memref<1x198x1xf32, #tpu.memory_space<vmem>>, %arg4: memref<144x32xbf16, #tpu.memory_space<vmem>>, %arg5: memref<288x32xbf16, #tpu.memory_space<vmem>>, %arg6: memref<9x32xf32, #tpu.memory_space<vmem>>, %arg7: memref<16x32xbf16, #tpu.memory_space<vmem>>, %arg8: memref<1x4x8x32xf32, #tpu.memory_space<vmem>>, %arg9: memref<1x4x8x32xf32, #tpu.memory_space<vmem>>, %arg10: memref<1x1x1x32xf32, #tpu.memory_space<vmem>>, %arg11: memref<200x16xbf16, #tpu.memory_space<vmem>>, %arg12: memref<184x32xf32, #tpu.memory_space<vmem>>) attributes {dimension_semantics = [#tpu.dimension_semantics<parallel>, #tpu.dimension_semantics<parallel>], iteration_bounds = array<i64: 2, 2>, scalar_prefetch = 0 : i64, scratch_operands = 2 : i64, tpu.core_type = #tpu.core_type<tc>, window_params = [{transform_indices = @transform_0, window_bounds = array<i64: 1, 1, 198, 16>}, {transform_indices = @transform_1, window_bounds = array<i64: 1, 198, 1>}, {pipeline_mode = #tpu.pipeline_mode<synchronous>, transform_indices = @transform_2, window_bounds = array<i64: 144, 32>}, {pipeline_mode = #tpu.pipeline_mode<synchronous>, transform_indices = @transform_3, window_bounds = array<i64: 288, 32>}, {pipeline_mode = #tpu.pipeline_mode<synchronous>, transform_indices = @transform_4, window_bounds = array<i64: 9, 32>}, {pipeline_mode = #tpu.pipeline_mode<synchronous>, transform_indices = @transform_5, window_bounds = array<i64: 16, 32>}, {transform_indices = @transform_6, window_bounds = array<i64: 1, 4, 8, 32>}, {transform_indices = @transform_7, window_bounds = array<i64: 1, 4, 8, 32>}, {transform_indices = @transform_8, window_bounds = array<i64: 1, 1, 1, 32>}]} {
    %c0 = arith.constant 0 : index
    %c0_0 = arith.constant 0 : index
    %c0_1 = arith.constant 0 : index
    %c0_2 = arith.constant 0 : index
    %0 = vector.load %arg2[%c0, %c0_0, %c0_1, %c0_2] : memref<1x1x198x16xf32, #tpu.memory_space<vmem>>, vector<1x1x198x16xf32>
    %1 = vector.shape_cast %0 : vector<1x1x198x16xf32> to vector<198x16xf32>
    %c0_3 = arith.constant 0 : index
    %c0_4 = arith.constant 0 : index
    %c0_5 = arith.constant 0 : index
    %2 = vector.load %arg3[%c0_3, %c0_4, %c0_5] : memref<1x198x1xf32, #tpu.memory_space<vmem>>, vector<1x198x1xf32>
    %3 = vector.shape_cast %2 : vector<1x198x1xf32> to vector<198x1xf32>
    %c0_6 = arith.constant 0 : index
    %c0_7 = arith.constant 0 : index
    %4 = vector.load %arg6[%c0_6, %c0_7] : memref<9x32xf32, #tpu.memory_space<vmem>>, vector<1x16xf32>
    %c1 = arith.constant 1 : index
    %c0_8 = arith.constant 0 : index
    %5 = vector.load %arg6[%c1, %c0_8] : memref<9x32xf32, #tpu.memory_space<vmem>>, vector<1x16xf32>
    %6 = vector.broadcast %4 : vector<1x16xf32> to vector<198x16xf32>
    %7 = arith.mulf %1, %6 : vector<198x16xf32>
    %8 = vector.broadcast %5 : vector<1x16xf32> to vector<198x16xf32>
    %9 = arith.addf %7, %8 : vector<198x16xf32>
    %10 = vector.broadcast %3 : vector<198x1xf32> to vector<198x16xf32>
    %11 = arith.mulf %9, %10 : vector<198x16xf32>
    %cst = arith.constant 0.000000e+00 : bf16
    %12 = vector.broadcast %cst : bf16 to vector<1x16xbf16>
    %c0_9 = arith.constant 0 : index
    %c0_10 = arith.constant 0 : index
    %13 = vector.load %arg11[%c0_9, %c0_10] : memref<200x16xbf16, #tpu.memory_space<vmem>>, vector<1x16xbf16>
    tpu.vector_store %arg11[%c0_9, %c0_10], %12 {strides = array<i32>} : memref<200x16xbf16, #tpu.memory_space<vmem>>, vector<1x16xbf16>,
    %cst_11 = arith.constant 0.000000e+00 : bf16
    %14 = vector.broadcast %cst_11 : bf16 to vector<1x16xbf16>
    %c199 = arith.constant 199 : index
    %c0_12 = arith.constant 0 : index
    %15 = vector.load %arg11[%c199, %c0_12] : memref<200x16xbf16, #tpu.memory_space<vmem>>, vector<1x16xbf16>
    tpu.vector_store %arg11[%c199, %c0_12], %14 {strides = array<i32>} : memref<200x16xbf16, #tpu.memory_space<vmem>>, vector<1x16xbf16>,
    %16 = arith.truncf %11 : vector<198x16xf32> to vector<198x16xbf16>
    %c1_13 = arith.constant 1 : index
    %c0_14 = arith.constant 0 : index
    %17 = vector.load %arg11[%c1_13, %c0_14] : memref<200x16xbf16, #tpu.memory_space<vmem>>, vector<198x16xbf16>
    tpu.vector_store %arg11[%c1_13, %c0_14], %16 {strides = array<i32>} : memref<200x16xbf16, #tpu.memory_space<vmem>>, vector<198x16xbf16>,
    %c0_15 = arith.constant 0 : index
    %c0_16 = arith.constant 0 : index
    %18 = vector.load %arg11[%c0_15, %c0_16] : memref<200x16xbf16, #tpu.memory_space<vmem>>, vector<162x16xbf16>
    %c1_17 = arith.constant 1 : index
    %c0_18 = arith.constant 0 : index
    %19 = vector.load %arg11[%c1_17, %c0_18] : memref<200x16xbf16, #tpu.memory_space<vmem>>, vector<162x16xbf16>
    %c2 = arith.constant 2 : index
    %c0_19 = arith.constant 0 : index
    %20 = vector.load %arg11[%c2, %c0_19] : memref<200x16xbf16, #tpu.memory_space<vmem>>, vector<162x16xbf16>
    %c18 = arith.constant 18 : index
    %c0_20 = arith.constant 0 : index
    %21 = vector.load %arg11[%c18, %c0_20] : memref<200x16xbf16, #tpu.memory_space<vmem>>, vector<162x16xbf16>
    %c19 = arith.constant 19 : index
    %c0_21 = arith.constant 0 : index
    %22 = vector.load %arg11[%c19, %c0_21] : memref<200x16xbf16, #tpu.memory_space<vmem>>, vector<162x16xbf16>
    %c20 = arith.constant 20 : index
    %c0_22 = arith.constant 0 : index
    %23 = vector.load %arg11[%c20, %c0_22] : memref<200x16xbf16, #tpu.memory_space<vmem>>, vector<162x16xbf16>
    %c36 = arith.constant 36 : index
    %c0_23 = arith.constant 0 : index
    %24 = vector.load %arg11[%c36, %c0_23] : memref<200x16xbf16, #tpu.memory_space<vmem>>, vector<162x16xbf16>
    %c37 = arith.constant 37 : index
    %c0_24 = arith.constant 0 : index
    %25 = vector.load %arg11[%c37, %c0_24] : memref<200x16xbf16, #tpu.memory_space<vmem>>, vector<162x16xbf16>
    %c38 = arith.constant 38 : index
    %c0_25 = arith.constant 0 : index
    %26 = vector.load %arg11[%c38, %c0_25] : memref<200x16xbf16, #tpu.memory_space<vmem>>, vector<162x16xbf16>
    %27 = tpu.concatenate %18, %19, %20, %21, %22, %23, %24, %25, %26 in 1 : vector<162x16xbf16>, vector<162x16xbf16>, vector<162x16xbf16>, vector<162x16xbf16>, vector<162x16xbf16>, vector<162x16xbf16>, vector<162x16xbf16>, vector<162x16xbf16>, vector<162x16xbf16> -> vector<162x144xbf16>
    %c0_26 = arith.constant 0 : index
    %c0_27 = arith.constant 0 : index
    %28 = vector.load %arg4[%c0_26, %c0_27] : memref<144x32xbf16, #tpu.memory_space<vmem>>, vector<144x32xbf16>
    %cst_28 = arith.constant dense<0.000000e+00> : vector<162x32xf32>
    %29 = tpu.matmul %27, %28, %cst_28 {dimension_numbers = #tpu.dot_dimension_numbers<[1], [0], [0], [1], [0, 0, 1, 1], [], []>} : vector<162x144xbf16>, vector<144x32xbf16>, vector<162x32xf32> -> vector<162x32xf32>
    %c2_29 = arith.constant 2 : index
    %c0_30 = arith.constant 0 : index
    %30 = vector.load %arg6[%c2_29, %c0_30] : memref<9x32xf32, #tpu.memory_space<vmem>>, vector<1x32xf32>
    %c3 = arith.constant 3 : index
    %c0_31 = arith.constant 0 : index
    %31 = vector.load %arg6[%c3, %c0_31] : memref<9x32xf32, #tpu.memory_space<vmem>>, vector<1x32xf32>
    %c4 = arith.constant 4 : index
    %c0_32 = arith.constant 0 : index
    %32 = vector.load %arg6[%c4, %c0_32] : memref<9x32xf32, #tpu.memory_space<vmem>>, vector<1x32xf32>
    %33 = vector.broadcast %30 : vector<1x32xf32> to vector<162x32xf32>
    %34 = arith.mulf %29, %33 : vector<162x32xf32>
    %35 = vector.broadcast %31 : vector<1x32xf32> to vector<162x32xf32>
    %36 = arith.addf %34, %35 : vector<162x32xf32>
    %cst_33 = arith.constant 0.000000e+00 : f32
    %37 = vector.broadcast %cst_33 : f32 to vector<162x32xf32>
    %38 = arith.cmpf oge, %36, %37 : vector<162x32xf32>
    %39 = vector.broadcast %32 : vector<1x32xf32> to vector<162x32xf32>
    %40 = arith.mulf %39, %36 : vector<162x32xf32>
    %41 = arith.select %38, %36, %40 : vector<162x32xi1>, vector<162x32xf32>
    %42 = vector.extract_strided_slice %3 {offsets = [18, 0], sizes = [162, 1], strides = [1, 1]} : vector<198x1xf32> to vector<162x1xf32>
    %43 = vector.broadcast %42 : vector<162x1xf32> to vector<162x32xf32>
    %44 = arith.mulf %41, %43 : vector<162x32xf32>
    %cst_34 = arith.constant 0.000000e+00 : f32
    %45 = vector.broadcast %cst_34 : f32 to vector<1x32xf32>
    %c0_35 = arith.constant 0 : index
    %c0_36 = arith.constant 0 : index
    %46 = vector.load %arg12[%c0_35, %c0_36] : memref<184x32xf32, #tpu.memory_space<vmem>>, vector<1x32xf32>
    tpu.vector_store %arg12[%c0_35, %c0_36], %45 {strides = array<i32>} : memref<184x32xf32, #tpu.memory_space<vmem>>, vector<1x32xf32>,
    %cst_37 = arith.constant 0.000000e+00 : f32
    %47 = vector.broadcast %cst_37 : f32 to vector<21x32xf32>
    %c163 = arith.constant 163 : index
    %c0_38 = arith.constant 0 : index
    %48 = vector.load %arg12[%c163, %c0_38] : memref<184x32xf32, #tpu.memory_space<vmem>>, vector<21x32xf32>
    tpu.vector_store %arg12[%c163, %c0_38], %47 {strides = array<i32>} : memref<184x32xf32, #tpu.memory_space<vmem>>, vector<21x32xf32>,
    %c1_39 = arith.constant 1 : index
    %c0_40 = arith.constant 0 : index
    %49 = vector.load %arg12[%c1_39, %c0_40] : memref<184x32xf32, #tpu.memory_space<vmem>>, vector<162x32xf32>
    tpu.vector_store %arg12[%c1_39, %c0_40], %44 {strides = array<i32>} : memref<184x32xf32, #tpu.memory_space<vmem>>, vector<162x32xf32>,
    %c0_41 = arith.constant 0 : index
    %c0_42 = arith.constant 0 : index
    %50 = tpu.strided_load %arg12[%c0_41, %c0_42] {strides = array<i32: 2, 1>} : memref<184x32xf32, #tpu.memory_space<vmem>>, vector<72x32xf32>
    %51 = arith.truncf %50 : vector<72x32xf32> to vector<72x32xbf16>
    %c1_43 = arith.constant 1 : index
    %c0_44 = arith.constant 0 : index
    %52 = tpu.strided_load %arg12[%c1_43, %c0_44] {strides = array<i32: 2, 1>} : memref<184x32xf32, #tpu.memory_space<vmem>>, vector<72x32xf32>
    %53 = arith.truncf %52 : vector<72x32xf32> to vector<72x32xbf16>
    %c2_45 = arith.constant 2 : index
    %c0_46 = arith.constant 0 : index
    %54 = tpu.strided_load %arg12[%c2_45, %c0_46] {strides = array<i32: 2, 1>} : memref<184x32xf32, #tpu.memory_space<vmem>>, vector<72x32xf32>
    %55 = arith.truncf %54 : vector<72x32xf32> to vector<72x32xbf16>
    %c18_47 = arith.constant 18 : index
    %c0_48 = arith.constant 0 : index
    %56 = tpu.strided_load %arg12[%c18_47, %c0_48] {strides = array<i32: 2, 1>} : memref<184x32xf32, #tpu.memory_space<vmem>>, vector<72x32xf32>
    %57 = arith.truncf %56 : vector<72x32xf32> to vector<72x32xbf16>
    %c19_49 = arith.constant 19 : index
    %c0_50 = arith.constant 0 : index
    %58 = tpu.strided_load %arg12[%c19_49, %c0_50] {strides = array<i32: 2, 1>} : memref<184x32xf32, #tpu.memory_space<vmem>>, vector<72x32xf32>
    %59 = arith.truncf %58 : vector<72x32xf32> to vector<72x32xbf16>
    %c20_51 = arith.constant 20 : index
    %c0_52 = arith.constant 0 : index
    %60 = tpu.strided_load %arg12[%c20_51, %c0_52] {strides = array<i32: 2, 1>} : memref<184x32xf32, #tpu.memory_space<vmem>>, vector<72x32xf32>
    %61 = arith.truncf %60 : vector<72x32xf32> to vector<72x32xbf16>
    %c36_53 = arith.constant 36 : index
    %c0_54 = arith.constant 0 : index
    %62 = tpu.strided_load %arg12[%c36_53, %c0_54] {strides = array<i32: 2, 1>} : memref<184x32xf32, #tpu.memory_space<vmem>>, vector<72x32xf32>
    %63 = arith.truncf %62 : vector<72x32xf32> to vector<72x32xbf16>
    %c37_55 = arith.constant 37 : index
    %c0_56 = arith.constant 0 : index
    %64 = tpu.strided_load %arg12[%c37_55, %c0_56] {strides = array<i32: 2, 1>} : memref<184x32xf32, #tpu.memory_space<vmem>>, vector<72x32xf32>
    %65 = arith.truncf %64 : vector<72x32xf32> to vector<72x32xbf16>
    %c38_57 = arith.constant 38 : index
    %c0_58 = arith.constant 0 : index
    %66 = tpu.strided_load %arg12[%c38_57, %c0_58] {strides = array<i32: 2, 1>} : memref<184x32xf32, #tpu.memory_space<vmem>>, vector<72x32xf32>
    %67 = arith.truncf %66 : vector<72x32xf32> to vector<72x32xbf16>
    %68 = tpu.concatenate %51, %53, %55, %57, %59, %61, %63, %65, %67 in 1 : vector<72x32xbf16>, vector<72x32xbf16>, vector<72x32xbf16>, vector<72x32xbf16>, vector<72x32xbf16>, vector<72x32xbf16>, vector<72x32xbf16>, vector<72x32xbf16>, vector<72x32xbf16> -> vector<72x288xbf16>
    %c0_59 = arith.constant 0 : index
    %c0_60 = arith.constant 0 : index
    %69 = vector.load %arg5[%c0_59, %c0_60] : memref<288x32xbf16, #tpu.memory_space<vmem>>, vector<288x32xbf16>
    %cst_61 = arith.constant dense<0.000000e+00> : vector<72x32xf32>
    %70 = tpu.matmul %68, %69, %cst_61 {dimension_numbers = #tpu.dot_dimension_numbers<[1], [0], [0], [1], [0, 0, 1, 1], [], []>} : vector<72x288xbf16>, vector<288x32xbf16>, vector<72x32xf32> -> vector<72x32xf32>
    %c5 = arith.constant 5 : index
    %c0_62 = arith.constant 0 : index
    %71 = vector.load %arg6[%c5, %c0_62] : memref<9x32xf32, #tpu.memory_space<vmem>>, vector<1x32xf32>
    %c6 = arith.constant 6 : index
    %c0_63 = arith.constant 0 : index
    %72 = vector.load %arg6[%c6, %c0_63] : memref<9x32xf32, #tpu.memory_space<vmem>>, vector<1x32xf32>
    %73 = vector.broadcast %71 : vector<1x32xf32> to vector<72x32xf32>
    %74 = arith.mulf %70, %73 : vector<72x32xf32>
    %75 = vector.broadcast %72 : vector<1x32xf32> to vector<72x32xf32>
    %76 = arith.addf %74, %75 : vector<72x32xf32>
    %c0_i32 = arith.constant 0 : i32
    %c0_i32_64 = arith.constant 0 : i32
    %c0_i32_65 = arith.constant 0 : i32
    %c0_i32_66 = arith.constant 0 : i32
    %77 = tpu.memref_slice %arg2[%c0_i32, %c0_i32_64, %c0_i32_65, %c0_i32_66] : memref<1x1x198x16xf32, #tpu.memory_space<vmem>> -> memref<1x1x198x16xf32, #tpu.memory_space<vmem>>
    %78 = tpu.memref_squeeze %77 : memref<1x1x198x16xf32, #tpu.memory_space<vmem>> -> memref<198x16xf32, #tpu.memory_space<vmem>>
    %c36_67 = arith.constant 36 : index
    %c0_68 = arith.constant 0 : index
    %79 = tpu.strided_load %78[%c36_67, %c0_68] {strides = array<i32: 2, 1>} : memref<198x16xf32, #tpu.memory_space<vmem>>, vector<72x16xf32>
    %c7 = arith.constant 7 : index
    %c0_69 = arith.constant 0 : index
    %80 = vector.load %arg6[%c7, %c0_69] : memref<9x32xf32, #tpu.memory_space<vmem>>, vector<1x32xf32>
    %c8 = arith.constant 8 : index
    %c0_70 = arith.constant 0 : index
    %81 = vector.load %arg6[%c8, %c0_70] : memref<9x32xf32, #tpu.memory_space<vmem>>, vector<1x32xf32>
    %82 = arith.truncf %79 : vector<72x16xf32> to vector<72x16xbf16>
    %c0_71 = arith.constant 0 : index
    %c0_72 = arith.constant 0 : index
    %83 = vector.load %arg7[%c0_71, %c0_72] : memref<16x32xbf16, #tpu.memory_space<vmem>>, vector<16x32xbf16>
    %cst_73 = arith.constant dense<0.000000e+00> : vector<72x32xf32>
    %84 = tpu.matmul %82, %83, %cst_73 {dimension_numbers = #tpu.dot_dimension_numbers<[1], [0], [0], [1], [0, 0, 1, 1], [], []>} : vector<72x16xbf16>, vector<16x32xbf16>, vector<72x32xf32> -> vector<72x32xf32>
    %85 = vector.broadcast %80 : vector<1x32xf32> to vector<72x32xf32>
    %86 = arith.mulf %84, %85 : vector<72x32xf32>
    %87 = vector.broadcast %81 : vector<1x32xf32> to vector<72x32xf32>
    %88 = arith.addf %86, %87 : vector<72x32xf32>
    %cst_74 = arith.constant 0.000000e+00 : f32
    %89 = vector.broadcast %cst_74 : f32 to vector<1x32xf32>
    %90 = vector.extract_strided_slice %76 {offsets = [0, 0], sizes = [8, 32], strides = [1, 1]} : vector<72x32xf32> to vector<8x32xf32>
    %c0_75 = arith.constant 0 : index
    %c0_76 = arith.constant 0 : index
    %c0_77 = arith.constant 0 : index
    %c0_78 = arith.constant 0 : index
    %91 = vector.load %arg8[%c0_75, %c0_76, %c0_77, %c0_78] : memref<1x4x8x32xf32, #tpu.memory_space<vmem>>, vector<1x1x8x32xf32>
    %92 = vector.shape_cast %91 : vector<1x1x8x32xf32> to vector<8x32xf32>
    %93 = vector.shape_cast %90 : vector<8x32xf32> to vector<1x1x8x32xf32>
    tpu.vector_store %arg8[%c0_75, %c0_76, %c0_77, %c0_78], %93 {strides = array<i32>} : memref<1x4x8x32xf32, #tpu.memory_space<vmem>>, vector<1x1x8x32xf32>,
    %94 = vector.extract_strided_slice %88 {offsets = [0, 0], sizes = [8, 32], strides = [1, 1]} : vector<72x32xf32> to vector<8x32xf32>
    %c0_79 = arith.constant 0 : index
    %c0_80 = arith.constant 0 : index
    %c0_81 = arith.constant 0 : index
    %c0_82 = arith.constant 0 : index
    %95 = vector.load %arg9[%c0_79, %c0_80, %c0_81, %c0_82] : memref<1x4x8x32xf32, #tpu.memory_space<vmem>>, vector<1x1x8x32xf32>
    %96 = vector.shape_cast %95 : vector<1x1x8x32xf32> to vector<8x32xf32>
    %97 = vector.shape_cast %94 : vector<8x32xf32> to vector<1x1x8x32xf32>
    tpu.vector_store %arg9[%c0_79, %c0_80, %c0_81, %c0_82], %97 {strides = array<i32>} : memref<1x4x8x32xf32, #tpu.memory_space<vmem>>, vector<1x1x8x32xf32>,
    %c4_i32 = arith.constant 4 : i32
    %98 = arith.muli %arg1, %c4_i32 : i32
    %c0_i32_83 = arith.constant 0 : i32
    %99 = arith.addi %98, %c0_i32_83 : i32
    %c8_i32 = arith.constant 8 : i32
    %100 = arith.cmpi slt, %99, %c8_i32 : i32
    %cst_84 = arith.constant dense<0.000000e+00> : vector<32xf32>
    %101 = vector.multi_reduction <add>, %90, %cst_84 [0] : vector<8x32xf32> to vector<32xf32>
    %102 = vector.shape_cast %101 : vector<32xf32> to vector<1x32xf32>
    %cst_85 = arith.constant 0.000000e+00 : f32
    %103 = vector.broadcast %cst_85 : f32 to vector<1x32xf32>
    %104 = arith.select %100, %102, %103 : vector<1x32xf32>
    %105 = arith.addf %89, %104 : vector<1x32xf32>
    %106 = vector.extract_strided_slice %76 {offsets = [18, 0], sizes = [8, 32], strides = [1, 1]} : vector<72x32xf32> to vector<8x32xf32>
    %c0_86 = arith.constant 0 : index
    %c1_87 = arith.constant 1 : index
    %c0_88 = arith.constant 0 : index
    %c0_89 = arith.constant 0 : index
    %107 = vector.load %arg8[%c0_86, %c1_87, %c0_88, %c0_89] : memref<1x4x8x32xf32, #tpu.memory_space<vmem>>, vector<1x1x8x32xf32>
    %108 = vector.shape_cast %107 : vector<1x1x8x32xf32> to vector<8x32xf32>
    %109 = vector.shape_cast %106 : vector<8x32xf32> to vector<1x1x8x32xf32>
    tpu.vector_store %arg8[%c0_86, %c1_87, %c0_88, %c0_89], %109 {strides = array<i32>} : memref<1x4x8x32xf32, #tpu.memory_space<vmem>>, vector<1x1x8x32xf32>,
    %110 = vector.extract_strided_slice %88 {offsets = [18, 0], sizes = [8, 32], strides = [1, 1]} : vector<72x32xf32> to vector<8x32xf32>
    %c0_90 = arith.constant 0 : index
    %c1_91 = arith.constant 1 : index
    %c0_92 = arith.constant 0 : index
    %c0_93 = arith.constant 0 : index
    %111 = vector.load %arg9[%c0_90, %c1_91, %c0_92, %c0_93] : memref<1x4x8x32xf32, #tpu.memory_space<vmem>>, vector<1x1x8x32xf32>
    %112 = vector.shape_cast %111 : vector<1x1x8x32xf32> to vector<8x32xf32>
    %113 = vector.shape_cast %110 : vector<8x32xf32> to vector<1x1x8x32xf32>
    tpu.vector_store %arg9[%c0_90, %c1_91, %c0_92, %c0_93], %113 {strides = array<i32>} : memref<1x4x8x32xf32, #tpu.memory_space<vmem>>, vector<1x1x8x32xf32>,
    %c4_i32_94 = arith.constant 4 : i32
    %114 = arith.muli %arg1, %c4_i32_94 : i32
    %c1_i32 = arith.constant 1 : i32
    %115 = arith.addi %114, %c1_i32 : i32
    %c8_i32_95 = arith.constant 8 : i32
    %116 = arith.cmpi slt, %115, %c8_i32_95 : i32
    %cst_96 = arith.constant dense<0.000000e+00> : vector<32xf32>
    %117 = vector.multi_reduction <add>, %106, %cst_96 [0] : vector<8x32xf32> to vector<32xf32>
    %118 = vector.shape_cast %117 : vector<32xf32> to vector<1x32xf32>
    %cst_97 = arith.constant 0.000000e+00 : f32
    %119 = vector.broadcast %cst_97 : f32 to vector<1x32xf32>
    %120 = arith.select %116, %118, %119 : vector<1x32xf32>
    %121 = arith.addf %105, %120 : vector<1x32xf32>
    %122 = vector.extract_strided_slice %76 {offsets = [36, 0], sizes = [8, 32], strides = [1, 1]} : vector<72x32xf32> to vector<8x32xf32>
    %c0_98 = arith.constant 0 : index
    %c2_99 = arith.constant 2 : index
    %c0_100 = arith.constant 0 : index
    %c0_101 = arith.constant 0 : index
    %123 = vector.load %arg8[%c0_98, %c2_99, %c0_100, %c0_101] : memref<1x4x8x32xf32, #tpu.memory_space<vmem>>, vector<1x1x8x32xf32>
    %124 = vector.shape_cast %123 : vector<1x1x8x32xf32> to vector<8x32xf32>
    %125 = vector.shape_cast %122 : vector<8x32xf32> to vector<1x1x8x32xf32>
    tpu.vector_store %arg8[%c0_98, %c2_99, %c0_100, %c0_101], %125 {strides = array<i32>} : memref<1x4x8x32xf32, #tpu.memory_space<vmem>>, vector<1x1x8x32xf32>,
    %126 = vector.extract_strided_slice %88 {offsets = [36, 0], sizes = [8, 32], strides = [1, 1]} : vector<72x32xf32> to vector<8x32xf32>
    %c0_102 = arith.constant 0 : index
    %c2_103 = arith.constant 2 : index
    %c0_104 = arith.constant 0 : index
    %c0_105 = arith.constant 0 : index
    %127 = vector.load %arg9[%c0_102, %c2_103, %c0_104, %c0_105] : memref<1x4x8x32xf32, #tpu.memory_space<vmem>>, vector<1x1x8x32xf32>
    %128 = vector.shape_cast %127 : vector<1x1x8x32xf32> to vector<8x32xf32>
    %129 = vector.shape_cast %126 : vector<8x32xf32> to vector<1x1x8x32xf32>
    tpu.vector_store %arg9[%c0_102, %c2_103, %c0_104, %c0_105], %129 {strides = array<i32>} : memref<1x4x8x32xf32, #tpu.memory_space<vmem>>, vector<1x1x8x32xf32>,
    %c4_i32_106 = arith.constant 4 : i32
    %130 = arith.muli %arg1, %c4_i32_106 : i32
    %c2_i32 = arith.constant 2 : i32
    %131 = arith.addi %130, %c2_i32 : i32
    %c8_i32_107 = arith.constant 8 : i32
    %132 = arith.cmpi slt, %131, %c8_i32_107 : i32
    %cst_108 = arith.constant dense<0.000000e+00> : vector<32xf32>
    %133 = vector.multi_reduction <add>, %122, %cst_108 [0] : vector<8x32xf32> to vector<32xf32>
    %134 = vector.shape_cast %133 : vector<32xf32> to vector<1x32xf32>
    %cst_109 = arith.constant 0.000000e+00 : f32
    %135 = vector.broadcast %cst_109 : f32 to vector<1x32xf32>
    %136 = arith.select %132, %134, %135 : vector<1x32xf32>
    %137 = arith.addf %121, %136 : vector<1x32xf32>
    %138 = vector.extract_strided_slice %76 {offsets = [54, 0], sizes = [8, 32], strides = [1, 1]} : vector<72x32xf32> to vector<8x32xf32>
    %c0_110 = arith.constant 0 : index
    %c3_111 = arith.constant 3 : index
    %c0_112 = arith.constant 0 : index
    %c0_113 = arith.constant 0 : index
    %139 = vector.load %arg8[%c0_110, %c3_111, %c0_112, %c0_113] : memref<1x4x8x32xf32, #tpu.memory_space<vmem>>, vector<1x1x8x32xf32>
    %140 = vector.shape_cast %139 : vector<1x1x8x32xf32> to vector<8x32xf32>
    %141 = vector.shape_cast %138 : vector<8x32xf32> to vector<1x1x8x32xf32>
    tpu.vector_store %arg8[%c0_110, %c3_111, %c0_112, %c0_113], %141 {strides = array<i32>} : memref<1x4x8x32xf32, #tpu.memory_space<vmem>>, vector<1x1x8x32xf32>,
    %142 = vector.extract_strided_slice %88 {offsets = [54, 0], sizes = [8, 32], strides = [1, 1]} : vector<72x32xf32> to vector<8x32xf32>
    %c0_114 = arith.constant 0 : index
    %c3_115 = arith.constant 3 : index
    %c0_116 = arith.constant 0 : index
    %c0_117 = arith.constant 0 : index
    %143 = vector.load %arg9[%c0_114, %c3_115, %c0_116, %c0_117] : memref<1x4x8x32xf32, #tpu.memory_space<vmem>>, vector<1x1x8x32xf32>
    %144 = vector.shape_cast %143 : vector<1x1x8x32xf32> to vector<8x32xf32>
    %145 = vector.shape_cast %142 : vector<8x32xf32> to vector<1x1x8x32xf32>
    tpu.vector_store %arg9[%c0_114, %c3_115, %c0_116, %c0_117], %145 {strides = array<i32>} : memref<1x4x8x32xf32, #tpu.memory_space<vmem>>, vector<1x1x8x32xf32>,
    %c4_i32_118 = arith.constant 4 : i32
    %146 = arith.muli %arg1, %c4_i32_118 : i32
    %c3_i32 = arith.constant 3 : i32
    %147 = arith.addi %146, %c3_i32 : i32
    %c8_i32_119 = arith.constant 8 : i32
    %148 = arith.cmpi slt, %147, %c8_i32_119 : i32
    %cst_120 = arith.constant dense<0.000000e+00> : vector<32xf32>
    %149 = vector.multi_reduction <add>, %138, %cst_120 [0] : vector<8x32xf32> to vector<32xf32>
    %150 = vector.shape_cast %149 : vector<32xf32> to vector<1x32xf32>
    %cst_121 = arith.constant 0.000000e+00 : f32
    %151 = vector.broadcast %cst_121 : f32 to vector<1x32xf32>
    %152 = arith.select %148, %150, %151 : vector<1x32xf32>
    %153 = arith.addf %137, %152 : vector<1x32xf32>
    %c0_122 = arith.constant 0 : index
    %c0_123 = arith.constant 0 : index
    %c0_124 = arith.constant 0 : index
    %c0_125 = arith.constant 0 : index
    %154 = vector.load %arg10[%c0_122, %c0_123, %c0_124, %c0_125] : memref<1x1x1x32xf32, #tpu.memory_space<vmem>>, vector<1x1x1x32xf32>
    %155 = vector.shape_cast %154 : vector<1x1x1x32xf32> to vector<1x32xf32>
    %156 = vector.shape_cast %153 : vector<1x32xf32> to vector<1x1x1x32xf32>
    tpu.vector_store %arg10[%c0_122, %c0_123, %c0_124, %c0_125], %156 {strides = array<i32>} : memref<1x1x1x32xf32, #tpu.memory_space<vmem>>, vector<1x1x1x32xf32>,
    return
  }
  func.func @transform_0(%arg0: i32, %arg1: i32) -> (i32, i32, i32, i32) {
    %c0_i32 = arith.constant 0 : i32
    %c0_i32_0 = arith.constant 0 : i32
    %c0_i32_1 = arith.constant 0 : i32
    return %arg0, %arg1, %c0_i32, %c0_i32_0 : i32, i32, i32, i32
  }
  func.func @transform_1(%arg0: i32, %arg1: i32) -> (i32, i32, i32) {
    %c0_i32 = arith.constant 0 : i32
    %c0_i32_0 = arith.constant 0 : i32
    %c0_i32_1 = arith.constant 0 : i32
    return %arg1, %c0_i32, %c0_i32_0 : i32, i32, i32
  }
  func.func @transform_2(%arg0: i32, %arg1: i32) -> (i32, i32) {
    %c0_i32 = arith.constant 0 : i32
    %c0_i32_0 = arith.constant 0 : i32
    %c0_i32_1 = arith.constant 0 : i32
    return %c0_i32, %c0_i32_0 : i32, i32
  }
  func.func @transform_3(%arg0: i32, %arg1: i32) -> (i32, i32) {
    %c0_i32 = arith.constant 0 : i32
    %c0_i32_0 = arith.constant 0 : i32
    %c0_i32_1 = arith.constant 0 : i32
    return %c0_i32, %c0_i32_0 : i32, i32
  }
  func.func @transform_4(%arg0: i32, %arg1: i32) -> (i32, i32) {
    %c0_i32 = arith.constant 0 : i32
    %c0_i32_0 = arith.constant 0 : i32
    %c0_i32_1 = arith.constant 0 : i32
    return %c0_i32, %c0_i32_0 : i32, i32
  }
  func.func @transform_5(%arg0: i32, %arg1: i32) -> (i32, i32) {
    %c0_i32 = arith.constant 0 : i32
    %c0_i32_0 = arith.constant 0 : i32
    %c0_i32_1 = arith.constant 0 : i32
    return %c0_i32, %c0_i32_0 : i32, i32
  }
  func.func @transform_6(%arg0: i32, %arg1: i32) -> (i32, i32, i32, i32) {
    %c0_i32 = arith.constant 0 : i32
    %c0_i32_0 = arith.constant 0 : i32
    %c0_i32_1 = arith.constant 0 : i32
    return %arg0, %arg1, %c0_i32, %c0_i32_0 : i32, i32, i32, i32
  }
  func.func @transform_7(%arg0: i32, %arg1: i32) -> (i32, i32, i32, i32) {
    %c0_i32 = arith.constant 0 : i32
    %c0_i32_0 = arith.constant 0 : i32
    %c0_i32_1 = arith.constant 0 : i32
    return %arg0, %arg1, %c0_i32, %c0_i32_0 : i32, i32, i32, i32
  }
  func.func @transform_8(%arg0: i32, %arg1: i32) -> (i32, i32, i32, i32) {
    %c0_i32 = arith.constant 0 : i32
    %c0_i32_0 = arith.constant 0 : i32
    %c0_i32_1 = arith.constant 0 : i32
    return %arg0, %arg1, %c0_i32, %c0_i32_0 : i32, i32, i32, i32
  }
}

</mosaic_0001>

<bundles_post_ra>
// kernel: bottleneck_ir_se_forward.3
= control target key start
LH: loop header
LB: loop body
LE: loop exit
PB: predicated region body
PF: predicated region fallthrough
CT: control target
= control target key end

     0   :  { %10 = vsyncpa [#allocation3], 0  ;;  %s794_s0 = inlined_call_operand.vmem [shape: f32[2,2,1,32], index: 0, kind: input, shape index: {}]   ;;  %s795_s1 = inlined_call_operand.vmem [shape: f32[2,8,8,32], index: 1, kind: input, shape index: {}]   ;;  %s796_s2 = inlined_call_operand.vmem [shape: f32[2,8,8,32], index: 2, kind: input, shape index: {}]   ;;  %s797_s3 = inlined_call_operand.vmem [shape: f32[32,2], index: 3, kind: input, shape index: {}]   ;;  %s798_s4 = inlined_call_operand.vmem [shape: f32[2,32], index: 4, kind: input, shape index: {}]   ;;  %s799_s5 = inlined_call_operand.hbm [shape: f32[2,8,8,32], index: 5, kind: output, shape index: {}]  }
   0x1   :  { %12 = vsyncpa [#allocation3 + $0x1], 0  ;;  %s661_s18 = smov 0   ;;  %s663_s19 = smov 0  }
   0x2   :  { %s665_s20 = smov 0   ;;  %s667_s21 = smov 0  }
   0x3 LB: > { %s682_s22 = sadd.s32 4294967295, %s627_s21   ;;  %s498_s23 = sadd.s32 4294967294, %s627_s21   ;;  %s627_s21 = sphi %s667_s21, %s805_s21   ;;  %s623_s20 = sphi %s665_s20, %s804_s20   ;;  %s619_s19 = sphi %s663_s19, %s803_s19   ;;  %s615_s18 = sphi %s661_s18, %s802_s18  }
   0x4   : > { %s686_s24 = sadd.s32 1, %s627_s21   ;;  %s145_s25 = sadd.s32 1, %s623_s20 }
   0x5   : > { %s142_s26 = ssub.s32 %s627_s21, %s686_s24  ;;  %p155_p0 = scmp.ne.s32.totalorder %s623_s20, %s619_s19 }
   0x6   : > { %p143_p1 = scmp.eq.s32.totalorder %s142_s26, 0  ;;  %p156_p2 = scmp.eq.s32.totalorder %s682_s22, 1 }
   0x7   : > { %p161_p3 = scmp.ne.s32.totalorder %s619_s19, %s615_s18  ;;  %p162_p4 = scmp.eq.s32.totalorder %s498_s23, 1 }
   0x8   : > { %s697_s27 = scalar_select %p143_p1, %s623_s20, %s145_s25  }
   0x9   : > { %p699_p5 = por %p156_p2, %p155_p0  ;;  %p703_p6 = por %p162_p4, %p161_p3 }
   0xa   : > { %p501_p7 = scmp.ge.s32.totalorder %s627_s21, 1  ;;  %p209_p8 = scmp.lt.s32.totalorder %s627_s21, 3 }
   0xc   : > { %p210_p9 = pnand %p501_p7, %p209_p8 }
   0xd   : > { %p246_p10 = scmp.lt.s32.totalorder (!%p210_p9), %s682_s22, 1  ;;  %s519_s13 = sshll.u32 (!%p210_p9), %s682_s22, 6 }
   0xe   : > { %213 = sbr.rel (%p210_p9) target bundleno = 347 (0x15b), region = 40  ;;  %s585_s8 = scalar_lea.hbm (!%p210_p9), %s799_s5, 128 }
  0x13   : > { %v281_v0 = vld [vmem:[%s797_s3 + $0x18] sm:$0xff]  ;;  %v280_v1 = vld [vmem:[%s797_s3 + $0x10] sm:$0xff]  ;;  %v279_v2 = vld [vmem:[%s797_s3 + $0x8] sm:$0xff]  ;;  %s720_s11 = scalar_select %p246_p10, %s682_s22, 1  ;;  %vm269_vm0 = vcmask 254976   ;;  %vm282_vm1 = vcmask 261120  }
  0x14   : > { %298 = vmatpush.msra.mxu0 %v281_v0  ;;  %v278_v3 = vld [vmem:[%s797_s3] sm:$0xff]  ;;  %vm312_vm2 = vcmask 1041408   ;;  %vm308_vm3 = vcmask 15360   ;;  %s408_s22 = scalar_lea.hbm %s799_s5, %s519_s13 }
  0x15   : > { %s503_s14 = sshll.u32 %s720_s11, 1  ;;  %v307_v15 = vld [vmem:[%s798_s4] sm:$0x3]  ;;  %s517_s26 = sshll.u32 %s720_s11, 6 }
  0x16   : > { %299 = vmatpush.msra.mxu0 %v280_v1  ;;  %s249_s17 = scalar_lea.vmem %s794_s0, %s503_s14  ;;  %509 = vmatpush.msk.msra.mxu1 %vm312_vm2, %v307_v15  ;;  %s254_s7 = scalar_lea.vmem %s795_s1, %s517_s26 }
  0x17   : > { %v260_v4 = vld [vmem:[%s249_s17] sm:$0x1]  ;;  %v261_v5 = vld [vmem:[%s249_s17 + $0x1] sm:$0x1]  ;;  %s740_s10 = scalar_lea.vmem %s796_s2, %s517_s26  ;;  %s243_s11 = sand.u32 1, %s619_s19   ;;  %v364_v33 = vld [vmem:[%s254_s7 + $0x8] sm:$0xff] }
  0x18   : > { %300 = vmatpush.msra.mxu0 %v279_v2  ;;  %264 = vst [vmem:[#allocation1] ss:$9 sm:$0xff] %v260_v4  ;;  %v363_v31 = vld [vmem:[%s254_s7] sm:$0xff]  ;;  %v365_v34 = vld [vmem:[%s254_s7 + $0x10] sm:$0xff]  ;;  %v366_v35 = vld [vmem:[%s254_s7 + $0x18] sm:$0xff]  ;;  %s502_s12 = sshll.u32 %s243_s11, 6 }
  0x19   : > { %266 = vst [vmem:[#allocation1 + $0x1] ss:$9 sm:$0xff] %v261_v5  ;;  %v355_v37 = vld [vmem:[%s740_s10] sm:$0xff]  ;;  %v368_v39 = vld [vmem:[%s254_s7 + $0x28] sm:$0xff]  ;;  %v357_v41 = vld [vmem:[%s740_s10 + $0x10] sm:$0xff]  ;;  %s245_s16 = scalar_lea.vmem [#allocation2], %s502_s12 }
  0x1a   : > { %301 = vmatpush.msra.mxu0 %v278_v3  ;;  %v367_v38 = vld [vmem:[%s254_s7 + $0x20] sm:$0xff]  ;;  %v356_v40 = vld [vmem:[%s740_s10 + $0x8] sm:$0xff]  ;;  %v369_v42 = vld [vmem:[%s254_s7 + $0x30] sm:$0xff]  ;;  %s409_s17 = sshll.u32 %s245_s16, 4  ;;  %s411_s23 = sshll.u32 %s408_s22, 4  ;;  %s410_s17 = int_to_ptr.vmem [resolvable:$true] %s409_s17  ;;  %s412_s23 = int_to_ptr.hbm [resolvable:$true] %s411_s23 }
  0x1b   : > { %v358_v43 = vld [vmem:[%s740_s10 + $0x18] sm:$0xff]  ;;  %v359_v49 = vld [vmem:[%s740_s10 + $0x20] sm:$0xff]  ;;  %v360_v52 = vld [vmem:[%s740_s10 + $0x28] sm:$0xff]  ;;  %s397_s25 = scalar_lea.sflag [#allocation3], %s243_s11  ;;  %s579_s26 = sshra.s32 %s412_s23, 4  ;;  %s580_s26 = int_to_ptr.hbm [resolvable:$true] %s579_s26 }
  0x1c   : > { %v370_v44 = vld [vmem:[%s254_s7 + $0x38] sm:$0xff]  ;;  %v361_v57 = vld [vmem:[%s740_s10 + $0x30] sm:$0xff]  ;;  %s581_s30 = scalar_lea.hbm %s580_s26, 64  ;;  %p586_p0 = scmp.lt.s32.totalorder %s580_s26, %s799_s5 }
  0x1d   : > { %v362_v60 = vld [vmem:[%s740_s10 + $0x38] sm:$0xff]  ;;  %p582_p11 = scmp.ne.s32.totalorder %s580_s26, %s581_s30  ;;  %p587_p1 = scmp.lt.s32.totalorder %s585_s8, %s581_s30 }
  0x1f   : > { %p583_p12 = pnand %p582_p11, %p699_p5  ;;  %p588_p2 = por %p587_p1, %p586_p0 }
  0x20   : > { %v267_v6 = vld [vmem:[#allocation1] sm:$0xff] }
  0x21   : > { %v270_v7 = vsel %vm269_vm0, %v267_v6, 0.0  ;;  %p584_p13 = pneg %p583_p12 }
  0x22   : > { %v271_v8 = vrot.slane %v270_v7, 4 }
  0x23   : > { %p589_p3 = pnand %p588_p2, %p584_p13 }
  0x24   : > { %v272_v9 = vadd.f32 %v271_v8, %v270_v7 }
  0x26   : > { %v273_v10 = vrot.slane %v272_v9, 2 }
  0x28   : > { %v274_v11 = vadd.f32 %v273_v10, %v272_v9 }
  0x2a   : > { %v275_v12 = vrot.slane %v274_v11, 1 }
  0x2c   : > { %v276_v13 = vadd.f32 %v275_v12, %v274_v11 }
  0x2e   : > { %v277_v14 = vmul.f32 0.015625, %v276_v13 }
  0x30   : > { %508 = vmatmul.msk.f32.vlgmr.msra.gmra.mxu0 %vm282_vm1, %v277_v14 }
  0xad   : > { %v303_v16 = vpop.f32.mrf.mxu0 }
  0xae   : > { %v306_v17 = vmax.f32 %v303_v16, 0.0 }
  0xb0   : > { %510 = vmatmul.msk.f32.vlgmr.msra.gmra.mxu1 %vm308_vm3, %v306_v17 }
 0x12d   : > { %v333_v18 = vpop.f32.mrf.mxu1 }
 0x12e   : > { %v511_v19 = vmul.f32 -1.442695, %v333_v18 }
 0x130   : > { %561 = vpow2.f32 %v511_v19 }
 0x136   : > { %v562_v20 = vpop.eup %561 }
 0x137   : > { %v339_v21 = vadd.f32 1.0, %v562_v20 }
 0x139   : > { %563 = vrcp.f32 %v339_v21  ;;  %v351_v25 = vand.u32 2147483648, %v339_v21  ;;  %v349_v27 = vand.u32 2147483647, %v339_v21  ;;  %vm345_vm5 = vweird.f32 %v339_v21 }
 0x13b   : > { %v352_v29 = vor.u32 1.1754944e-38, %v351_v25  ;;  %vm350_vm7 = vcmp.eq.f32.partialorder %v349_v27, 8.507059e+37 }
 0x13f   : > { %v564_v22 = vpop.eup %563 }
 0x140   : > { %v341_v23 = vmul.f32 %v564_v22, %v339_v21  ;;  %vm346_vm4 = vweird.f32 %v564_v22 }
 0x141   : > { %vm347_vm6 = vmor %vm345_vm5, %vm346_vm4 }
 0x142   : > { %v342_v24 = vsub.f32 1.0, %v341_v23 }
 0x144   : > { %v343_v26 = vmul.f32 %v564_v22, %v342_v24 }
 0x146   : > { %v344_v28 = vadd.f32 %v564_v22, %v343_v26 }
 0x148   : > { %v348_v30 = vsel %vm347_vm6, %v564_v22, %v344_v28 }
 0x149   : > { %v353_v32 = vsel %vm350_vm7, %v352_v29, %v348_v30 }
 0x14a   : > { %v371_v36 = vperm.slane %v353_v32, 0 }
 0x14c   : > { %v372_v45 = vmul.f32 %v371_v36, %v363_v31  ;;  %v373_v46 = vmul.f32 %v371_v36, %v364_v33  ;;  %v374_v47 = vmul.f32 %v371_v36, %v365_v34  ;;  %v375_v48 = vmul.f32 %v371_v36, %v366_v35 }
 0x14d   : > { %v376_v50 = vmul.f32 %v371_v36, %v367_v38  ;;  %v377_v51 = vmul.f32 %v371_v36, %v368_v39  ;;  %v378_v53 = vmul.f32 %v371_v36, %v369_v42  ;;  %v379_v58 = vmul.f32 %v371_v36, %v370_v44 }
 0x14e   : > { %v380_v54 = vadd.f32 %v372_v45, %v355_v37  ;;  %v381_v55 = vadd.f32 %v373_v46, %v356_v40  ;;  %v382_v56 = vadd.f32 %v374_v47, %v357_v41  ;;  %v383_v59 = vadd.f32 %v375_v48, %v358_v43 }
 0x14f   : > { %v384_v61 = vadd.f32 %v376_v50, %v359_v49  ;;  %v385_v62 = vadd.f32 %v377_v51, %v360_v52  ;;  %v386_v63 = vadd.f32 %v378_v53, %v361_v57  ;;  %v387_v0 = vadd.f32 %v379_v58, %v362_v60 }
 0x150   : > { %388 = vst.msk [vmem:[%s245_s16] sm:$0xff] %vm282_vm1, %v380_v54 }
 0x151   : > { %389 = vst.msk [vmem:[%s245_s16 + $0x8] sm:$0xff] %vm282_vm1, %v381_v55 }
 0x152   : > { %390 = vst.msk [vmem:[%s245_s16 + $0x10] sm:$0xff] %vm282_vm1, %v382_v56 }
 0x153   : > { %391 = vst.msk [vmem:[%s245_s16 + $0x18] sm:$0xff] %vm282_vm1, %v383_v59 }
 0x154   : > { %392 = vst.msk [vmem:[%s245_s16 + $0x20] sm:$0xff] %vm282_vm1, %v384_v61 }
 0x155   : > { %393 = vst.msk [vmem:[%s245_s16 + $0x28] sm:$0xff] %vm282_vm1, %v385_v62 }
 0x156   : > { %394 = vst.msk [vmem:[%s245_s16 + $0x30] sm:$0xff] %vm282_vm1, %v386_v63 }
 0x157   : > { %395 = vst.msk [vmem:[%s245_s16 + $0x38] sm:$0xff] %vm282_vm1, %v387_v0 }
 0x158   : > { %592 = shalt.err (!%p589_p3)
}
 0x159   : > { %s629_s11 = smov 128   ;;  %s630_s12 = smov 8  }
 0x15a   : > { %520 = dma.vmem_to_hbm [thread:$0]  (%p699_p5), %s410_s17, 1024, %s412_s23, %s397_s25, %s629_s11, %s629_s11, %s630_s12  }
 0x15b PF: > { %p526_p4 = scmp.ge.s32.totalorder %s627_s21, 2  ;;  %s426_s13 = sand.u32 1, %s615_s18  }
 0x15c   : > { %s427_s14 = scalar_lea.sflag [#allocation3], %s426_s13 }
 0x15d   : > { %p523_p7 = pnand %p526_p4, %p703_p6 }
 0x15f   : > { %p524_p8 = pneg %p523_p7 }
 0x161   : > { %610 = dma.done.wait (%p524_p8), %s427_s14, 1024  }
 0x162   : > { %612 = vsyncadd (%p524_p8), %s427_s14, 4294966272  ;;  %p15_p9 = scmp.ge.s32.totalorder %s686_s24, 4   ;;  %s802_s18 = smov %s619_s19 }
 0x163   : > { %s803_s19 = smov %s623_s20  ;;  %s804_s20 = smov %s697_s27 }
 0x164   : > { %s805_s21 = smov %s686_s24  ;;  %17 = sbr.rel (!%p15_p9) target bundleno = 3 (0x3), region = 82 }
 0x169   :  { %433 = vsyncpa [#allocation3], 1 }
 0x16a   :  { %435 = vsyncpa [#allocation3 + $0x1], 1 }

// kernel: bottleneck_ir_se_forward.2
= control target key start
LH: loop header
LB: loop body
LE: loop exit
PB: predicated region body
PF: predicated region fallthrough
CT: control target
= control target key end

     0   :  { %s3771_s27 = smov 0   ;;  %s3773_s28 = smov 0   ;;  %s5410_s0 = inlined_call_operand.vmem [shape: f32[2,2,198,16], index: 0, kind: input, shape index: {}]   ;;  %s5411_s1 = inlined_call_operand.vmem [shape: f32[2,198,1], index: 1, kind: input, shape index: {}]   ;;  %s5412_s2 = inlined_call_operand.vmem [shape: bf16[144,32], index: 2, kind: input, shape index: {}]   ;;  %s5413_s3 = inlined_call_operand.vmem [shape: bf16[288,32], index: 3, kind: input, shape index: {}]   ;;  %s5414_s4 = inlined_call_operand.vmem [shape: f32[9,32], index: 4, kind: input, shape index: {}]   ;;  %s5415_s5 = inlined_call_operand.vmem [shape: bf16[16,32], index: 5, kind: input, shape index: {}]   ;;  %s5416_s6 = inlined_call_operand.vmem [shape: f32[2,8,8,32], index: 6, kind: output, shape index: {0}]   ;;  %s5417_s7 = inlined_call_operand.vmem [shape: f32[2,8,8,32], index: 7, kind: output, shape index: {1}]   ;;  %s5418_s8 = inlined_call_operand.vmem [shape: f32[2,2,1,32], index: 8, kind: output, shape index: {2}]  }
   0x1   :  { %s3775_s29 = smov 0   ;;  %s3777_s30 = smov 0  }
   0x2   :  { %s3779_s9 = smov 0  }
   0x3 LB: > { %s28_s10 = sadd.s32 1, %s3707_s29  ;;  %s31_s11 = sadd.s32 1, %s3711_s30  ;;  %s3715_s9 = sphi %s3779_s9, %s19_s9   ;;  %s3711_s30 = sphi %s3777_s30, %s5458_s30   ;;  %s3707_s29 = sphi %s3775_s29, %s5457_s29   ;;  %s3703_s28 = sphi %s3773_s28, %s5456_s28   ;;  %s3699_s27 = sphi %s3771_s27, %s5455_s27  }
   0x4   : > { %p29_p0 = scmp.ge.s32.totalorder %s28_s10, 2  ;;  %p3351_p1 = scmp.ge.s32.totalorder %s3715_s9, 1 }
   0x5   : > { %p301_p2 = scmp.lt.s32.totalorder %s3715_s9, 5 }
   0x6   : > { %s5460_s10 = smov (%p29_p0, %s28_s10), 0  ;;  %s5462_s11 = smov (!%p29_p0, %s31_s11), %s3711_s30 }
   0x7   : > { %p302_p3 = pnand %p3351_p1, %p301_p2  ;;  %p33_p4 = scmp.ge.s32.totalorder %s5462_s11, 2 }
   0x9   : > { %s5464_s11 = smov (%p33_p4, %s5462_s11), 0  ;;  %305 = sbr.rel (%p302_p3) target bundleno = 1049 (0x419), region = 44 }
   0xe   : > { %p366_p5 = scmp.lt.s32.totalorder %s3699_s27, 1  ;;  %v3717_v0 = vmov 0   ;;  %p364_p6 = scmp.lt.s32.totalorder %s3703_s28, 1  ;;  %v3849_v21 = vld [vmem:[%s5414_s4] ss:$0 sm:$0xff]  ;;  %vm660_vm1 = vcmask 122880  }
   0xf   : > { %3662 = vset.pattern.permute.xlu2 %v3717_v0  ;;  %3661 = vset.pattern.permute.xlu1 %v3717_v0  ;;  %v3855_v23 = vld [vmem:[%s5414_s4 + $0x1] ss:$0 sm:$0xff]  ;;  %vm661_vm0 = vsmask.f32 256  ;;  %v663_v31 = vld [vmem:[#allocation2] sm:$0x1] }
  0x10   : > { %3660 = vset.pattern.permute.xlu0 %v3717_v0  ;;  %s3807_s12 = scalar_select %p366_p5, %s3699_s27, 1  ;;  %vm662_vm2 = vmand %vm660_vm1, %vm661_vm0  ;;  %vm1356_vm3 = vcmask 1045504   ;;  %vm697_vm4 = vsmask.f32 4368  ;;  %vm947_vm6 = vcmask 125952   ;;  %vm1186_vm9 = vcmask 1046528  }
  0x11   : > { %s5466_s28 = smov (!%p364_p6, %s3703_s28), 1  ;;  %v664_v33 = vsel %vm662_vm2, 0, %v663_v31  ;;  %vm3886_vm5 = vmor %vm661_vm0, %vm697_vm4  ;;  %vm948_vm7 = vsmask.f32 7938  ;;  %vm1526_vm10 = vcmask 1044480   ;;  %vm1548_vm11 = vcmask 130048  }
  0x12   : > { %s3610_s13 = smul.u32 200, %s3807_s12  ;;  %665 = vst [vmem:[#allocation2] sm:$0x1] %v664_v33  ;;  %vm3985_vm8 = vmand %vm947_vm6, %vm948_vm7  ;;  %vm5423_vm12 = vsmask.f32 7424  ;;  %s3722_s21 = smov 16  }
  0x13   : > { %s3608_s17 = smul.u32 25, %s3807_s12  ;;  %vm1272_vm13 = vsmask.f32 6400  ;;  %s3723_s22 = smov 64   ;;  %vm1442_vm14 = vsmask.f32 5376 }
  0x14   : > { %s3813_s16 = scalar_lea.vmem %s5411_s1, %s3610_s13  ;;  %s3609_s18 = smul.u32 50, %s5466_s28  ;;  %vm1595_vm15 = vcmask 392192   ;;  %vm1572_vm0 = vcmask 261120   ;;  %vm1618_vm1 = vcmask 523264   ;;  %vm1641_vm2 = vcmask 654336  }
  0x15   : > { %v435_v1 = vld [vmem:[%s3813_s16 + $0x20] sm:$0xff]  ;;  %v434_v2 = vld [vmem:[%s3813_s16 + $0x18] sm:$0xff]  ;;  %v432_v3 = vld [vmem:[%s3813_s16 + $0x8] sm:$0xff]  ;;  %s3724_s24 = smov 112   ;;  %vm1664_vm4 = vcmask 785408   ;;  %vm666_vm7 = vcmask 125955  }
  0x16   : > { %532 = vperm.xlu2 %3662, %v435_v1   ;;  %527 = vperm.xlu1 %3661, %v434_v2   ;;  %v436_v4 = vld [vmem:[%s3813_s16 + $0x28] sm:$0xff]  ;;  %v431_v5 = vld [vmem:[%s3813_s16] sm:$0xff]  ;;  %v433_v6 = vld [vmem:[%s3813_s16 + $0x10] sm:$0xff]  ;;  %s370_s19 = sadd.s32 %s3609_s18, %s3608_s17  ;;  %s3718_s17 = smov 32  }
  0x17   : > { %517 = vperm.xlu0 %3660, %v432_v3   ;;  %v439_v7 = vld [vmem:[%s3813_s16 + $0x40] sm:$0xff]  ;;  %v438_v8 = vld [vmem:[%s3813_s16 + $0x38] sm:$0xff]  ;;  %v437_v9 = vld [vmem:[%s3813_s16 + $0x30] sm:$0xff]  ;;  %s3352_s20 = sshll.u32 %s370_s19, 3  ;;  %s3719_s18 = smov 80  }
  0x18   : > { %v442_v10 = vld [vmem:[%s3813_s16 + $0x58] sm:$0xff]  ;;  %v441_v11 = vld [vmem:[%s3813_s16 + $0x50] sm:$0xff]  ;;  %v440_v12 = vld [vmem:[%s3813_s16 + $0x48] sm:$0xff]  ;;  %s3844_s23 = scalar_lea.vmem %s5410_s0, %s3352_s20  ;;  %s3720_s19 = smov 48  }
  0x19   : > { %v445_v13 = vld [vmem:[%s3813_s16 + $0x70] sm:$0xff]  ;;  %v444_v14 = vld [vmem:[%s3813_s16 + $0x68] sm:$0xff]  ;;  %v443_v15 = vld [vmem:[%s3813_s16 + $0x60] sm:$0xff]  ;;  %s3721_s20 = smov 96  }
  0x1a   : > { %v447_v16 = vld [vmem:[%s3813_s16 + $0x80] sm:$0xff]  ;;  %v446_v17 = vld [vmem:[%s3813_s16 + $0x78] sm:$0xff]  ;;  %v449_v18 = vld [vmem:[%s3813_s16 + $0x90] sm:$0xff] }
  0x1b   : > { %v448_v19 = vld [vmem:[%s3813_s16 + $0x88] sm:$0xff]  ;;  %v450_v20 = vld [vmem:[%s3813_s16 + $0x98] sm:$0xff]  ;;  %v410_v22 = vld [vmem:[%s3844_s23 + $0x20] sm:$0xff] }
  0x1c   : > { %v463_v24 = vmul.f32 %v3849_v21, %v410_v22  ;;  %v411_v26 = vld [vmem:[%s3844_s23 + $0x28] sm:$0xff]  ;;  %v414_v39 = vld [vmem:[%s3844_s23 + $0x40] sm:$0xff]  ;;  %v409_v48 = vld [vmem:[%s3844_s23 + $0x18] sm:$0xff] }
  0x1d   : > { %v464_v29 = vmul.f32 %v3849_v21, %v411_v26  ;;  %v467_v45 = vmul.f32 %v3849_v21, %v414_v39  ;;  %v407_v49 = vld [vmem:[%s3844_s23 + $0x8] sm:$0xff]  ;;  %v417_v54 = vld [vmem:[%s3844_s23 + $0x58] sm:$0xff]  ;;  %v462_v55 = vmul.f32 %v3849_v21, %v409_v48  ;;  %v420_v62 = vld [vmem:[%s3844_s23 + $0x70] sm:$0xff] }
  0x1e   : > { %537 = vperm.xlu2 %3662, %v436_v4   ;;  %512 = vperm.xlu1 %3661, %v431_v5   ;;  %v489_v25 = vadd.f32 %v3855_v23, %v463_v24  ;;  %v460_v56 = vmul.f32 %v3849_v21, %v407_v49  ;;  %v470_v58 = vmul.f32 %v3849_v21, %v417_v54  ;;  %v408_v63 = vld [vmem:[%s3844_s23 + $0x10] sm:$0xff]  ;;  %v406_v3 = vld [vmem:[%s3844_s23] sm:$0xff] }
  0x1f   : > { %522 = vperm.xlu0 %3660, %v433_v6   ;;  %v490_v32 = vadd.f32 %v3855_v23, %v464_v29  ;;  %v493_v53 = vadd.f32 %v3855_v23, %v467_v45  ;;  %v488_v60 = vadd.f32 %v3855_v23, %v462_v55  ;;  %v422_v4 = vld [vmem:[%s3844_s23 + $0x80] sm:$0xff]  ;;  %v412_v5 = vld [vmem:[%s3844_s23 + $0x30] sm:$0xff] }
  0x20   : > { %v486_v61 = vadd.f32 %v3855_v23, %v460_v56  ;;  %v496_v1 = vadd.f32 %v3855_v23, %v470_v58  ;;  %v416_v26 = vld [vmem:[%s3844_s23 + $0x50] sm:$0xff] }
  0x21   : > { %v469_v39 = vmul.f32 %v3849_v21, %v416_v26 }
  0x26   : > { %552 = vperm.xlu2 %3662, %v439_v7   ;;  %547 = vperm.xlu1 %3661, %v438_v8   ;;  %v473_v8 = vmul.f32 %v3849_v21, %v420_v62 }
  0x27   : > { %542 = vperm.xlu0 %3660, %v437_v9  }
  0x2e   : > { %567 = vperm.xlu2 %3662, %v442_v10   ;;  %562 = vperm.xlu1 %3661, %v441_v11  }
  0x2f   : > { %557 = vperm.xlu0 %3660, %v440_v12   ;;  %v461_v12 = vmul.f32 %v3849_v21, %v408_v63  ;;  %v3958_v63 = vadd.f32 %v3855_v23, %v469_v39 }
  0x31   : > { %v487_v31 = vadd.f32 %v3855_v23, %v461_v12 }
  0x36   : > { %582 = vperm.xlu2 %3662, %v445_v13   ;;  %577 = vperm.xlu1 %3661, %v444_v14   ;;  %v413_v13 = vld [vmem:[%s3844_s23 + $0x38] sm:$0xff] }
  0x37   : > { %572 = vperm.xlu0 %3660, %v443_v15   ;;  %v459_v15 = vmul.f32 %v3849_v21, %v406_v3  ;;  %v466_v29 = vmul.f32 %v3849_v21, %v413_v13 }
  0x39   : > { %v492_v54 = vadd.f32 %v3855_v23, %v466_v29 }
  0x3e   : > { %592 = vperm.xlu2 %3662, %v447_v16   ;;  %v475_v16 = vmul.f32 %v3849_v21, %v422_v4 }
  0x3f   : > { %587 = vperm.xlu0 %3660, %v446_v17   ;;  %v465_v17 = vmul.f32 %v3849_v21, %v412_v5  ;;  %v418_v5 = vld [vmem:[%s3844_s23 + $0x60] sm:$0xff] }
  0x41   : > { %v491_v48 = vadd.f32 %v3855_v23, %v465_v17 }
  0x46   : > { %602 = vperm.xlu2 %3662, %v449_v18   ;;  %v424_v18 = vld [vmem:[%s3844_s23 + $0x90] sm:$0xff] }
  0x47   : > { %597 = vperm.xlu0 %3660, %v448_v19   ;;  %v415_v19 = vld [vmem:[%s3844_s23 + $0x48] sm:$0xff] }
  0x48   : > { %v468_v33 = vmul.f32 %v3849_v21, %v415_v19 }
  0x4a   : > { %v3952_v58 = vadd.f32 %v3855_v23, %v468_v33 }
  0x4f   : > { %607 = vperm.xlu0 %3660, %v450_v20  }
  0x70   : > { %v3860_v27 = vpop.permute.xlu2 %532 }
  0x71   : > { %v639_v28 = vmul.f32 %v3860_v27, %v489_v25  ;;  %v2067_v35 = vrot.slane %v3860_v27, 2 }
  0x73   : > { %v3864_v30 = vpack.c.bf16 %v639_v28, %v639_v28  ;;  %v499_v28 = vadd.f32 %v3855_v23, %v473_v8 }
  0x75   : > { %v735_v34 = vshrl.u32 %v3864_v30, 16  ;;  %v738_v14 = vshll.u32 %v3864_v30, 16 }
  0x77   : > { %v737_v40 = vrot.slane %v735_v34, 7 }
  0x78   : > { %v3870_v36 = vpop.permute.xlu2 %537 }
  0x79   : > { %v640_v37 = vmul.f32 %v3870_v36, %v490_v32  ;;  %v2069_v38 = vrot.slane %v3870_v36, 2  ;;  %v742_v46 = vrot.slane %v737_v40, 4  ;;  %v477_v32 = vmul.f32 %v3849_v21, %v424_v18 }
  0x7a   : > { %v740_v34 = vor.u32 %v738_v14, %v737_v40  ;;  %v471_v18 = vmul.f32 %v3849_v21, %v418_v5 }
  0x7b   : > { %v677_v41 = vpack.c.bf16 %v640_v37, %v640_v37  ;;  %v3878_v42 = vsel %vm1356_vm3, %v2067_v35, %v2069_v38  ;;  %v485_v37 = vadd.f32 %v3855_v23, %v459_v15 }
  0x7d   : > { %v744_v43 = vshrl.u32 %v677_v41, 16  ;;  %v747_v44 = vshll.u32 %v677_v41, 16 }
  0x7f   : > { %v3881_v47 = vrot.slane %v744_v43, 7 }
  0x80   : > { %v3890_v51 = vpop.permute.xlu2 %552 }
  0x81   : > { %v749_v52 = vor.u32 %v747_v44, %v3881_v47  ;;  %v643_v59 = vmul.f32 %v3890_v51, %v493_v53  ;;  %v751_v49 = vrot.slane %v3881_v47, 4  ;;  %v2075_v55 = vrot.slane %v3890_v51, 2 }
  0x83   : > { %v750_v57 = vsel %vm3886_vm5, %v742_v46, %v749_v52  ;;  %v680_v6 = vpack.c.bf16 %v643_v59, %v643_v59  ;;  %v3571_v59 = vld [vmem:[%s5412_s2 + $0x40] sm:$0xff] }
  0x84   : > { %958 = vst.msk [vmem:[#allocation2 + $0x14] sm:$0xf] %vm947_vm6, %v750_v57  ;;  %v3949_v57 = vadd.f32 %v3855_v23, %v477_v32  ;;  %1896 = vmatpush.bf16.msra.mxu1 %v3571_v59 }
  0x85   : > { %v771_v27 = vshrl.u32 %v680_v6, 16  ;;  %v774_v40 = vshll.u32 %v680_v6, 16  ;;  %v419_v6 = vld [vmem:[%s3844_s23 + $0x68] sm:$0xff] }
  0x86   : > { %v472_v19 = vmul.f32 %v3849_v21, %v419_v6 }
  0x87   : > { %v3944_v52 = vrot.slane %v771_v27, 7 }
  0x88   : > { %v3906_v0 = vpop.permute.xlu2 %567  ;;  %v3909_v2 = vpop.permute.xlu1 %527 }
  0x89   : > { %v518_v7 = vpop.permute.xlu0 %517  ;;  %v638_v9 = vmul.f32 %v3909_v2, %v488_v60  ;;  %v2065_v10 = vrot.slane %v3909_v2, 2  ;;  %v646_v20 = vmul.f32 %v3906_v0, %v496_v1  ;;  %v778_v12 = vrot.slane %v3944_v52, 4 }
  0x8a   : > { %v636_v11 = vmul.f32 %v518_v7, %v486_v61  ;;  %v3966_v7 = vor.u32 %v774_v40, %v3944_v52  ;;  %v2081_v13 = vrot.slane %v3906_v0, 2  ;;  %v950_v40 = vld [vmem:[#allocation2] sm:$0xf] }
  0x8b   : > { %v675_v22 = vpack.c.bf16 %v638_v9, %v638_v9  ;;  %v3927_v24 = vsel %vm1356_vm3, %v2065_v10, %v2067_v35  ;;  %v501_v35 = vadd.f32 %v3855_v23, %v475_v16  ;;  %v3938_v41 = vpack.c.bf16 %v646_v20, %v646_v20 }
  0x8c   : > { %v673_v25 = vpack.c.bf16 %v636_v11, %v636_v11 }
  0x8d   : > { %v726_v30 = vshrl.u32 %v675_v22, 16  ;;  %v798_v1 = vshrl.u32 %v3938_v41, 16  ;;  %v729_v2 = vshll.u32 %v675_v22, 16  ;;  %v801_v16 = vshll.u32 %v3938_v41, 16 }
  0x8e   : > { %v708_v44 = vshrl.u32 %v673_v25, 16  ;;  %v711_v14 = vshll.u32 %v673_v25, 16 }
  0x8f   : > { %v728_v43 = vrot.slane %v726_v30, 7  ;;  %v3978_v20 = vrot.slane %v798_v1, 7  ;;  %v3999_v1 = vadd.f32 %v3855_v23, %v471_v18 }
  0x90   : > { %v3940_v45 = vpop.permute.xlu2 %582  ;;  %v513_v46 = vpop.permute.xlu1 %512  ;;  %v710_v4 = vrot.slane %v708_v44, 7 }
  0x91   : > { %v523_v53 = vpop.permute.xlu0 %522  ;;  %v733_v56 = vrot.slane %v728_v43, 4  ;;  %v635_v62 = vmul.f32 %v513_v46, %v485_v37  ;;  %v649_v8 = vmul.f32 %v3940_v45, %v499_v28  ;;  %v731_v22 = vor.u32 %v729_v2, %v728_v43 }
  0x92   : > { %v637_v60 = vmul.f32 %v523_v53, %v487_v31  ;;  %v2064_v61 = vrot.slane %v523_v53, 2  ;;  %v713_v26 = vor.u32 %v711_v14, %v710_v4  ;;  %v715_v41 = vrot.slane %v710_v4, 4 }
  0x93   : > { %v741_v3 = vsel %vm3886_vm5, %v733_v56, %v740_v34  ;;  %v672_v15 = vpack.c.bf16 %v635_v62, %v635_v62  ;;  %v686_v29 = vpack.c.bf16 %v649_v8, %v649_v8  ;;  %v4010_v4 = vor.u32 %v801_v16, %v3978_v20 }
  0x94   : > { %957 = vst.msk [vmem:[#allocation2 + $0x10] sm:$0xf] %vm947_vm6, %v741_v3  ;;  %v674_v9 = vpack.c.bf16 %v637_v60, %v637_v60  ;;  %v3971_v11 = vsel %vm1356_vm3, %v2064_v61, %v2065_v10  ;;  %v421_v3 = vld [vmem:[%s3844_s23 + $0x78] sm:$0xff]  ;;  %v498_v8 = vadd.f32 %v3855_v23, %v472_v19  ;;  %v5420_v14 = vrot.slane %v3940_v45, 2 }
  0x95   : > { %v700_v27 = vshrl.u32 %v672_v15, 16  ;;  %v703_v25 = vshll.u32 %v672_v15, 16 }
  0x96   : > { %v717_v17 = vshrl.u32 %v674_v9, 16  ;;  %v720_v31 = vshll.u32 %v674_v9, 16  ;;  %v805_v9 = vrot.slane %v3978_v20, 4 }
  0x97   : > { %v702_v33 = vrot.slane %v700_v27, 7 }
  0x98   : > { %v3980_v10 = vpop.permute.xlu2 %592  ;;  %v548_v28 = vpop.permute.xlu1 %547  ;;  %v719_v30 = vrot.slane %v717_v17, 7 }
  0x99   : > { %v543_v32 = vpop.permute.xlu0 %542  ;;  %v651_v34 = vmul.f32 %v3980_v10, %v501_v35  ;;  %v642_v53 = vmul.f32 %v548_v28, %v492_v54  ;;  %v705_v56 = vor.u32 %v703_v25, %v702_v33  ;;  %v706_v59 = vrot.slane %v702_v33, 4 }
  0x9a   : > { %v641_v37 = vmul.f32 %v543_v32, %v491_v48  ;;  %v2071_v39 = vrot.slane %v543_v32, 2  ;;  %v722_v44 = vor.u32 %v720_v31, %v719_v30  ;;  %v724_v46 = vrot.slane %v719_v30, 4 }
  0x9b   : > { %v825_v48 = vshrl.u32 %v686_v29, 16  ;;  %v714_v54 = vsel %vm3886_vm5, %v706_v59, %v713_v26  ;;  %v951_v36 = vsel %vm3985_vm8, %v705_v56, %v950_v40  ;;  %v679_v5 = vpack.c.bf16 %v642_v53, %v642_v53  ;;  %v4039_v56 = vld [vmem:[#allocation2 + $0x10] sm:$0xff]  }
  0x9c   : > { %v678_v60 = vpack.c.bf16 %v641_v37, %v641_v37  ;;  %v3992_v35 = vsel %vm1356_vm3, %v2069_v38, %v2071_v39  ;;  %v723_v61 = vsel %vm3886_vm5, %v715_v41, %v722_v44  ;;  %v732_v62 = vsel %vm3886_vm5, %v724_v46, %v731_v22  ;;  %952 = vst [vmem:[#allocation2] sm:$0xf] %v951_v36 }
  0x9d   : > { %955 = vst.msk [vmem:[#allocation2 + $0x8] sm:$0xf] %vm947_vm6, %v723_v61  ;;  %v4006_v38 = vpack.c.bf16 %v651_v34, %v651_v34  ;;  %v2073_v6 = vrot.slane %v548_v28, 2  ;;  %v4016_v22 = vrot.slane %v825_v48, 7  ;;  %v828_v26 = vshll.u32 %v686_v29, 16 }
  0x9e   : > { %v753_v2 = vshrl.u32 %v678_v60, 16  ;;  %956 = vst.msk [vmem:[#allocation2 + $0xc] sm:$0xf] %vm947_vm6, %v732_v62  ;;  %v756_v17 = vshll.u32 %v678_v60, 16  ;;  %v762_v16 = vshrl.u32 %v679_v5, 16  ;;  %v474_v28 = vmul.f32 %v3849_v21, %v421_v3 }
  0x9f   : > { %954 = vst.msk [vmem:[#allocation2 + $0x4] sm:$0xf] %vm947_vm6, %v714_v54  ;;  %v843_v19 = vshrl.u32 %v4006_v38, 16  ;;  %v4022_v31 = vsel %vm1356_vm3, %v2071_v39, %v2073_v6  ;;  %v4027_v25 = vsel %vm1356_vm3, %v2073_v6, %v2075_v55  ;;  %v765_v29 = vshll.u32 %v679_v5, 16 }
  0xa0   : > { %v755_v15 = vrot.slane %v753_v2, 7  ;;  %v563_v18 = vpop.permute.xlu1 %562  ;;  %v764_v33 = vrot.slane %v762_v16, 7  ;;  %v4036_v46 = vor.u32 %v828_v26, %v4016_v22  ;;  %v846_v60 = vshll.u32 %v4006_v38, 16  ;;  %v4066_v62 = vpop.permute.xlu2 %602 }
  0xa1   : > { %v558_v27 = vpop.permute.xlu0 %557  ;;  %v645_v44 = vmul.f32 %v563_v18, %v3958_v63  ;;  %v2079_v39 = vrot.slane %v563_v18, 2  ;;  %v2091_v48 = vrot.slane %v3980_v10, 2  ;;  %v4063_v61 = vrot.slane %v843_v19, 7 }
  0xa2   : > { %v758_v30 = vor.u32 %v756_v17, %v755_v15  ;;  %v760_v32 = vrot.slane %v755_v15, 4  ;;  %v644_v34 = vmul.f32 %v558_v27, %v3952_v58  ;;  %v2077_v41 = vrot.slane %v558_v27, 2 }
  0xa3   : > { %v767_v43 = vor.u32 %v765_v29, %v764_v33  ;;  %v769_v40 = vrot.slane %v764_v33, 4  ;;  %v4052_v63 = vsel %vm1356_vm3, %v2079_v39, %v2081_v13  ;;  %v4069_v2 = vrot.slane %v4039_v56, 1 }
  0xa4   : > { %v759_v37 = vsel %vm3886_vm5, %v751_v49, %v758_v30  ;;  %v681_v53 = vpack.c.bf16 %v644_v34, %v644_v34  ;;  %v4044_v47 = vsel %vm1356_vm3, %v2075_v55, %v2077_v41  ;;  %v682_v49 = vpack.c.bf16 %v645_v44, %v645_v44 }
  0xa5   : > { %959 = vst.msk [vmem:[#allocation2 + $0x18] sm:$0xf] %vm947_vm6, %v759_v37  ;;  %v4047_v58 = vsel %vm1356_vm3, %v2077_v41, %v2079_v39  ;;  %v4054_v59 = vld [vmem:[#allocation2 + $0x8] sm:$0xff]   ;;  %v768_v51 = vsel %vm3886_vm5, %v760_v32, %v767_v43  ;;  %v777_v55 = vsel %vm3886_vm5, %v769_v40, %v3966_v7  ;;  %v653_v27 = vmul.f32 %v4066_v62, %v3949_v57  ;;  %v1016_v37 = vld [vmem:[#allocation2 + $0x10] sm:$0x8] }
  0xa6   : > { %960 = vst.msk [vmem:[#allocation2 + $0x1c] sm:$0xf] %vm947_vm6, %v768_v51  ;;  %v780_v54 = vshrl.u32 %v681_v53, 16  ;;  %v789_v36 = vshrl.u32 %v682_v49, 16  ;;  %v783_v3 = vshll.u32 %v681_v53, 16  ;;  %v792_v5 = vshll.u32 %v682_v49, 16 }
  0xa7   : > { %961 = vst.msk [vmem:[#allocation2 + $0x20] sm:$0xf] %vm947_vm6, %v777_v55  ;;  %v1188_v6 = vrot.slane %v4054_v59, 1  ;;  %v500_v32 = vadd.f32 %v3855_v23, %v474_v28  ;;  %v3605_v44 = vld [vmem:[#allocation2] sm:$0xf0]  ;;  %v1358_v28 = vrot.slane %v4039_v56, 2  ;;  %v4106_v53 = vor.u32 %v846_v60, %v4063_v61 }
  0xa8   : > { %v4071_v38 = vpop.permute.xlu1 %577  ;;  %v782_v17 = vrot.slane %v780_v54, 7  ;;  %v791_v18 = vrot.slane %v789_v36, 7  ;;  %v3606_v39 = vld [vmem:[#allocation2] sm:$0xe]  ;;  %vm667_vm8 = vsmask.f32 7950 }
  0xa9   : > { %v4075_v7 = vpop.permute.xlu0 %572  ;;  %v648_v15 = vmul.f32 %v4071_v38, %v498_v8  ;;  %v1191_v19 = vsel %vm1186_vm9, %v1188_v6, %v4069_v2  ;;  %v3607_v36 = vor.u32 %v3606_v39, %v3605_v44 }
  0xaa   : > { %v647_v26 = vmul.f32 %v4075_v7, %v3999_v1  ;;  %v5421_v16 = vrot.slane %v4075_v7, 2  ;;  %v785_v33 = vor.u32 %v783_v3, %v782_v17  ;;  %v787_v29 = vrot.slane %v782_v17, 4  ;;  %1210 = vrot.lane.b32.xlu0 %v1191_v19, %s3718_s17 }
  0xab   : > { %v685_v30 = vpack.c.bf16 %v648_v15, %v648_v15  ;;  %v794_v34 = vor.u32 %v792_v5, %v791_v18  ;;  %v796_v8 = vrot.slane %v791_v18, 4  ;;  %v1187_v18 = vrot.slane %v3607_v36, 1 }
  0xac   : > { %v684_v1 = vpack.c.bf16 %v647_v26, %v647_v26  ;;  %v4092_v57 = vsel %vm1356_vm3, %v2081_v13, %v5421_v16  ;;  %v786_v43 = vsel %vm3886_vm5, %v778_v12, %v785_v33  ;;  %v3602_v13 = vunpack.c.h.b16 %v4039_v56 }
  0xad   : > { %v816_v41 = vshrl.u32 %v685_v30, 16  ;;  %v795_v40 = vsel %vm3886_vm5, %v787_v29, %v794_v34  ;;  %v804_v0 = vsel %vm3886_vm5, %v796_v8, %v4010_v4  ;;  %962 = vst.msk [vmem:[#allocation2 + $0x24] sm:$0xf] %vm947_vm6, %v786_v43  ;;  %v819_v52 = vshll.u32 %v685_v30, 16  ;;  %v4109_v55 = vld [vmem:[#allocation2 + $0x18] sm:$0xff]  ;;  %v423_v8 = vld [vmem:[%s3844_s23 + $0x88] sm:$0xff] }
  0xae   : > { %v807_v49 = vshrl.u32 %v684_v1, 16  ;;  %v4111_v12 = vpack.c.bf16 %v653_v27, %v653_v27  ;;  %963 = vst.msk [vmem:[#allocation2 + $0x28] sm:$0xf] %vm947_vm6, %v795_v40  ;;  %v810_v54 = vshll.u32 %v684_v1, 16  ;;  %v1524_v4 = vunpack.c.l.b16 %v1016_v37  ;;  %v1005_v43 = vld [vmem:[#allocation2 + $0x8] sm:$0xe] }
  0xaf   : > { %v818_v51 = vrot.slane %v816_v41, 7  ;;  %964 = vst.msk [vmem:[#allocation2 + $0x2c] sm:$0xf] %vm947_vm6, %v804_v0  ;;  %v4116_v17 = vrot.slane %v4109_v55, 2  ;;  %v1192_v27 = vrot.slane %v4109_v55, 1  ;;  %v1189_v37 = vsel %vm1186_vm9, %v1187_v18, %v1188_v6 }
  0xb0   : > { %v809_v3 = vrot.slane %v807_v49, 7  ;;  %v832_v41 = vrot.slane %v4016_v22, 4  ;;  %v1528_v22 = vrot.slane %v4109_v55, 3  ;;  %v476_v40 = vmul.f32 %v3849_v21, %v423_v8  ;;  %v425_v49 = vld [vmem:[%s3844_s23 + $0x98] sm:$0xff] }
  0xb1   : > { %v821_v60 = vor.u32 %v819_v52, %v818_v51  ;;  %v823_v5 = vrot.slane %v818_v51, 4  ;;  %v588_v15 = vpop.permute.xlu0 %587  ;;  %v1361_v34 = vsel %vm1356_vm3, %v1358_v28, %v4116_v17  ;;  %v4150_v39 = vsel %vm1186_vm9, %v4069_v2, %v1192_v27 }
  0xb2   : > { %v650_v26 = vmul.f32 %v588_v15, %v500_v32  ;;  %v2089_v19 = vrot.slane %v588_v15, 2  ;;  %v812_v30 = vor.u32 %v810_v54, %v809_v3  ;;  %v814_v33 = vrot.slane %v809_v3, 4  ;;  %1208 = vrot.lane.b32.xlu0 %v1189_v37, %s3718_s17  ;;  %1380 = vrot.lane.b32.xlu2 %v1361_v34, %s3719_s18  ;;  %v4175_v34 = vld [vmem:[#allocation2] sm:$0xff]  }
  0xb3   : > { %v831_v29 = vsel %vm3886_vm5, %v823_v5, %v4036_v46  ;;  %1249 = vrot.lane.b32.xlu1 %v4150_v39, %s3720_s19  ;;  %v861_v51 = vshrl.u32 %v4111_v12, 16  ;;  %v502_v3 = vadd.f32 %v3855_v23, %v476_v40  ;;  %v478_v15 = vmul.f32 %v3849_v21, %v425_v49 }
  0xb4   : > { %967 = vst.msk [vmem:[#allocation2 + $0x38] sm:$0xf] %vm947_vm6, %v831_v29  ;;  %v687_v32 = vpack.c.bf16 %v650_v26, %v650_v26  ;;  %v4132_v1 = vsel %vm1356_vm3, %v5420_v14, %v2089_v19  ;;  %v4137_v46 = vsel %vm1356_vm3, %v2089_v19, %v2091_v48  ;;  %v813_v44 = vsel %vm3886_vm5, %v805_v9, %v812_v30  ;;  %v4159_v0 = vld [vmem:[#allocation2 + $0x20] sm:$0xff] }
  0xb5   : > { %v822_v6 = vsel %vm3886_vm5, %v814_v33, %v821_v60  ;;  %965 = vst.msk [vmem:[#allocation2 + $0x30] sm:$0xf] %vm947_vm6, %v813_v44  ;;  %v1525_v9 = vpack.c.b16 %v3602_v13, %v1524_v4  ;;  %v1362_v4 = vrot.slane %v4159_v0, 2  ;;  %v1194_v5 = vrot.slane %v4159_v0, 1 }
  0xb6   : > { %v834_v20 = vshrl.u32 %v687_v32, 16  ;;  %966 = vst.msk [vmem:[#allocation2 + $0x34] sm:$0xf] %vm947_vm6, %v822_v6  ;;  %v837_v52 = vshll.u32 %v687_v32, 16  ;;  %v3598_v18 = vunpack.c.h.b16 %v4054_v59  ;;  %v1234_v26 = vunpack.c.l.b16 %v1005_v43 }
  0xb7   : > { %v1527_v36 = vrot.slane %v1525_v9, 3  ;;  %v1363_v21 = vsel %vm1356_vm3, %v4116_v17, %v1362_v4  ;;  %v4186_v37 = vsel %vm1186_vm9, %v1192_v27, %v1194_v5  ;;  %v4188_v32 = vrot.slane %v861_v51, 7 }
  0xb8   : > { %v836_v54 = vrot.slane %v834_v20, 7  ;;  %v4207_v27 = vpack.c.b16 %v3598_v18, %v1234_v26  ;;  %v504_v10 = vadd.f32 %v3855_v23, %v478_v15  ;;  %v850_v40 = vrot.slane %v4063_v61, 4 }
  0xb9   : > { %v4166_v60 = vpop.permute.xlu0 %597  ;;  %v1529_v33 = vsel %vm1526_vm10, %v1527_v36, %v1528_v22  ;;  %v1075_v49 = vshrl.u32 %v4175_v34, 16  ;;  %v4226_v23 = vshrl.u32 %v4109_v55, 16 }
  0xba   : > { %v839_v19 = vor.u32 %v837_v52, %v836_v54  ;;  %v841_v30 = vrot.slane %v836_v54, 4  ;;  %v652_v29 = vmul.f32 %v4166_v60, %v502_v3  ;;  %3433 = vmatmul.msk.bf16.vlgmr.msra.gmra.mxu1 %vm1548_vm11, %v1529_v33  ;;  %v5419_v8 = vrot.slane %v4166_v60, 2  ;;  %1382 = vrot.lane.b32.xlu2 %v1363_v21, %s3719_s18 }
  0xbb   : > { %1419 = vrot.lane.b32.xlu0 %v1363_v21, %s3721_s20  ;;  %1251 = vrot.lane.b32.xlu1 %v4186_v37, %s3720_s19  ;;  %v1241_v3 = vrot.slane %v4207_v27, 1  ;;  %v1090_v21 = vshll.u32 %v4039_v56, 16 }
  0xbc   : > { %v840_v44 = vsel %vm3886_vm5, %v832_v41, %v839_v19  ;;  %v849_v6 = vsel %vm3886_vm5, %v841_v30, %v4106_v53  ;;  %v689_v43 = vpack.c.bf16 %v652_v29, %v652_v29  ;;  %v4201_v20 = vsel %vm1356_vm3, %v2091_v48, %v5419_v8  ;;  %v1010_v29 = vld [vmem:[#allocation2 + $0x8] sm:$0xc] }
  0xbd   : > { %968 = vst.msk [vmem:[#allocation2 + $0x3c] sm:$0xf] %vm947_vm6, %v840_v44  ;;  %v1077_v53 = vshll.u32 %v4175_v34, 16  ;;  %v864_v41 = vshll.u32 %v4111_v12, 16  ;;  %v1082_v48 = vshll.u32 %v4054_v59, 16  ;;  %v4223_v19 = vshll.u32 %v4109_v55, 16 }
  0xbe   : > { %969 = vst.msk [vmem:[#allocation2 + $0x40] sm:$0xf] %vm947_vm6, %v849_v6  ;;  %v852_v9 = vshrl.u32 %v689_v43, 16  ;;  %v855_v36 = vshll.u32 %v689_v43, 16  ;;  %v1094_v44 = vshrl.u32 %v4039_v56, 16 }
  0xbf   : > { %v1079_v51 = vrot.slane %v1077_v53, 1  ;;  %v866_v52 = vor.u32 %v864_v41, %v4188_v32  ;;  %v1084_v33 = vrot.slane %v1082_v48, 1  ;;  %v1285_v48 = vrot.slane %v4226_v23, 1 }
  0xc0   : > { %v854_v54 = vrot.slane %v852_v9, 7  ;;  %v4236_v9 = vld [vmem:[#allocation2 + $0x28] sm:$0xff] }
  0xc1   : > { %v4219_v12 = vpop.permute.xlu0 %607  ;;  %v1080_v26 = vor.u32 %v1079_v51, %v1075_v49  ;;  %v1354_v49 = vunpack.c.l.b16 %v1010_v29  ;;  %v4260_v29 = vshrl.u32 %v4159_v0, 16 }
  0xc2   : > { %v857_v61 = vor.u32 %v855_v36, %v854_v54  ;;  %v859_v15 = vrot.slane %v854_v54, 4  ;;  %v654_v30 = vmul.f32 %v4219_v12, %v504_v10  ;;  %v1242_v10 = vsel %vm1186_vm9, %v1241_v3, %v4069_v2 }
  0xc3   : > { %v1085_v41 = vsel %vm5423_vm12, %v1080_v26, %v1084_v33  ;;  %1212 = vrot.lane.b32.xlu0 %v4150_v39, %s3718_s17  ;;  %1247 = vrot.lane.b32.xlu1 %v1242_v10, %s3720_s19  ;;  %v1281_v2 = vrot.slane %v1094_v44, 1  ;;  %v1282_v54 = vrot.slane %v1090_v21, 2  ;;  %v1355_v39 = vpack.c.b16 %v3598_v18, %v1354_v49 }
  0xc4   : > { %v858_v6 = vsel %vm3886_vm5, %v850_v40, %v857_v61  ;;  %v867_v43 = vsel %vm3886_vm5, %v859_v15, %v866_v52  ;;  %v691_v53 = vpack.c.bf16 %v654_v30, %v654_v30  ;;  %1161 = vrot.lane.b32.xlu2 %v1085_v41, %s3722_s21  ;;  %v1286_v40 = vrot.slane %v4223_v19, 2 }
  0xc5   : > { %970 = vst.msk [vmem:[#allocation2 + $0x44] sm:$0xf] %vm947_vm6, %v858_v6  ;;  %v1530_v52 = vrot.slane %v4159_v0, 3  ;;  %v1364_v26 = vrot.slane %v4236_v9, 2  ;;  %v1357_v15 = vrot.slane %v1355_v39, 2  ;;  %v4257_v30 = vshll.u32 %v4159_v0, 16 }
  0xc6   : > { %971 = vst.msk [vmem:[#allocation2 + $0x48] sm:$0xf] %vm947_vm6, %v867_v43  ;;  %v870_v51 = vshrl.u32 %v691_v53, 16  ;;  %v873_v3 = vshll.u32 %v691_v53, 16  ;;  %v1287_v61 = vor.u32 %v1286_v40, %v1285_v48  ;;  %v868_v6 = vrot.slane %v4188_v32, 4  ;;  %v454_v0 = vld [vmem:[%s3813_s16 + $0xb8] sm:$0xff] }
  0xc7   : > { %v1531_v18 = vsel %vm1526_vm10, %v1528_v22, %v1530_v52  ;;  %v4268_v53 = vor.u32 %v1282_v54, %v1281_v2  ;;  %v4277_v32 = vsel %vm1356_vm3, %v1362_v4, %v1364_v26  ;;  %v1359_v10 = vsel %vm1356_vm3, %v1357_v15, %v1358_v28 }
  0xc8   : > { %v4253_v36 = vrot.slane %v870_v51, 7  ;;  %v1455_v48 = vrot.slane %v4260_v29, 2  ;;  %v1456_v40 = vrot.slane %v4257_v30, 3  ;;  %v1086_v4 = vshrl.u32 %v4054_v59, 16  ;;  %v1011_v51 = vld [vmem:[#allocation2 + $0x10] sm:$0xc] }
  0xc9   : > { %v1288_v22 = vsel %vm1272_vm13, %v4268_v53, %v1287_v61  ;;  %v1451_v28 = vrot.slane %v4226_v23, 2  ;;  %v1452_v49 = vrot.slane %v4223_v19, 3  ;;  %v1092_v39 = vrot.slane %v1090_v21, 1 }
  0xca   : > { %v875_v43 = vor.u32 %v873_v3, %v4253_v36  ;;  %3434 = vmatmul.msk.bf16.gmra.mxu1 %vm1548_vm11, %v1531_v18  ;;  %v1088_v2 = vor.u32 %v1086_v4, %v1084_v33  ;;  %v1457_v54 = vor.u32 %v1456_v40, %v1455_v48  ;;  %v1404_v3 = vunpack.c.l.b16 %v1011_v51 }
  0xcb   : > { %1421 = vrot.lane.b32.xlu0 %v4277_v32, %s3721_s20  ;;  %1333 = vrot.lane.b32.xlu1 %v1288_v22, %s3723_s22  ;;  %v4294_v15 = vor.u32 %v1452_v49, %v1451_v28  ;;  %v1289_v18 = vrot.slane %v4260_v29, 1  ;;  %v1290_v33 = vrot.slane %v4257_v30, 2  ;;  %v1532_v21 = vrot.slane %v4236_v9, 3 }
  0xcc   : > { %v876_v41 = vsel %vm3886_vm5, %v868_v6, %v875_v43  ;;  %1378 = vrot.lane.b32.xlu2 %v1359_v10, %s3719_s18  ;;  %v1093_v6 = vsel %vm5423_vm12, %v1088_v2, %v1092_v39  ;;  %v1100_v10 = vrot.slane %v4223_v19, 1  ;;  %v4315_v48 = vshrl.u32 %v4236_v9, 16 }
  0xcd   : > { %972 = vst.msk [vmem:[#allocation2 + $0x4c] sm:$0xf] %vm947_vm6, %v876_v41  ;;  %v1458_v43 = vsel %vm1442_vm14, %v4294_v15, %v1457_v54  ;;  %v1408_v41 = vpack.c.b16 %v3602_v13, %v1404_v3  ;;  %v4309_v22 = vor.u32 %v1290_v33, %v1289_v18  ;;  %v1533_v40 = vsel %vm1526_vm10, %v1530_v52, %v1532_v21  ;;  %v4336_v3 = vld [vmem:[#allocation2 + $0x30] sm:$0xff] }
  0xce   : > { %v1096_v28 = vor.u32 %v1094_v44, %v1092_v39  ;;  %v1459_v52 = vrot.slane %v4315_v48, 2  ;;  %v1108_v44 = vrot.slane %v4257_v30, 1  ;;  %v1277_v39 = vshll.u32 %v4207_v27, 16 }
  0xcf   : > { %v1411_v4 = vrot.slane %v1408_v41, 2  ;;  %v1292_v49 = vsel %vm1272_vm13, %v1287_v61, %v4309_v22  ;;  %v452_v61 = vld [vmem:[%s3813_s16 + $0xa8] sm:$0xff] }
  0xd0   : > { %v1101_v19 = vsel %vm5423_vm12, %v1096_v28, %v1100_v10  ;;  %v1279_v33 = vrot.slane %v1277_v39, 2 }
  0xd1   : > { %v1412_v13 = vsel %vm1356_vm3, %v1411_v4, %v4116_v17  ;;  %v1274_v17 = vshrl.u32 %v4207_v27, 16  ;;  %v1366_v4 = vrot.slane %v4336_v3, 2 }
  0xd3   : > { %1214 = vrot.lane.b32.xlu0 %v4186_v37, %s3718_s17  ;;  %1503 = vrot.lane.b32.xlu1 %v1458_v43, %s3724_s24  ;;  %v4312_v37 = vshll.u32 %v4236_v9, 16  ;;  %v1276_v30 = vrot.slane %v1274_v17, 1 }
  0xd4   : > { %1163 = vrot.lane.b32.xlu2 %v1093_v6, %s3722_s21  ;;  %v1104_v6 = vor.u32 %v4226_v23, %v1100_v10  ;;  %v4346_v27 = vld [vmem:[#allocation2 + $0x48] sm:$0xff] }
  0xd5   : > { %v1460_v51 = vrot.slane %v4312_v37, 3  ;;  %v4350_v23 = vshll.u32 %v4346_v27, 16  ;;  %v1280_v10 = vor.u32 %v1279_v33, %v1276_v30  ;;  %v1294_v33 = vrot.slane %v4312_v37, 2 }
  0xd6   : > { %v1109_v43 = vsel %vm5423_vm12, %v1104_v6, %v1108_v44  ;;  %v4372_v6 = vld [vmem:[#allocation2 + $0x38] sm:$0xff] }
  0xd7   : > { %v4332_v2 = vor.u32 %v1460_v51, %v1459_v52  ;;  %v1447_v52 = vshll.u32 %v1408_v41, 16  ;;  %v1367_v51 = vsel %vm1356_vm3, %v1364_v26, %v1366_v4 }
  0xd9   : > { %v1462_v18 = vsel %vm1442_vm14, %v1457_v54, %v4332_v2  ;;  %v451_v54 = vld [vmem:[%s3813_s16 + $0xa0] sm:$0xff] }
  0xda   : > { %3435 = vmatmul.msk.bf16.gmra.mxu1 %vm1548_vm11, %v1533_v40  ;;  %v1534_v40 = vrot.slane %v4336_v3, 3 }
  0xdb   : > { %1417 = vrot.lane.b32.xlu0 %v1412_v13, %s3721_s20  ;;  %1335 = vrot.lane.b32.xlu1 %v1292_v49, %s3723_s22  ;;  %v1148_v13 = vrot.slane %v4350_v23, 1  ;;  %v1444_v49 = vshrl.u32 %v1408_v41, 16  ;;  %v1449_v41 = vrot.slane %v1447_v52, 3 }
  0xdc   : > { %1165 = vrot.lane.b32.xlu2 %v1101_v19, %s3722_s21  ;;  %v1535_v28 = vsel %vm1526_vm10, %v1532_v21, %v1534_v40  ;;  %v4356_v19 = vshrl.u32 %v4346_v27, 16  ;;  %v1284_v21 = vsel %vm1272_vm13, %v1280_v10, %v4268_v53  ;;  %v4399_v10 = vshrl.u32 %v4336_v3, 16 }
  0xdd   : > { %v1446_v39 = vrot.slane %v1444_v49, 2 }
  0xde   : > { %v4365_v17 = vor.u32 %v4356_v19, %v1148_v13  ;;  %v1463_v52 = vrot.slane %v4399_v10, 2 }
  0xdf   : > { %v1450_v26 = vor.u32 %v1449_v41, %v1446_v39 }
  0xe1   : > { %v1454_v53 = vsel %vm1442_vm14, %v1450_v26, %v4294_v15  ;;  %v4422_v26 = vshrl.u32 %v4372_v6, 16 }
  0xe3   : > { %617 = vperm.xlu0 %3660, %v452_v61   ;;  %1505 = vrot.lane.b32.xlu1 %v1462_v18, %s3724_s24  ;;  %v1196_v61 = vrot.slane %v4236_v9, 1  ;;  %v1536_v18 = vrot.slane %v4372_v6, 3  ;;  %v1112_v9 = vor.u32 %v4260_v29, %v1108_v44  ;;  %v1368_v29 = vrot.slane %v4372_v6, 2 }
  0xe4   : > { %1167 = vrot.lane.b32.xlu2 %v1109_v43, %s3722_s21 }
  0xe5   : > { %v1197_v43 = vsel %vm1186_vm9, %v1194_v5, %v1196_v61  ;;  %v1537_v30 = vsel %vm1526_vm10, %v1534_v40, %v1536_v18  ;;  %v1116_v5 = vrot.slane %v4312_v37, 1  ;;  %v4396_v40 = vshll.u32 %v4336_v3, 16 }
  0xe6   : > { %v4407_v49 = vsel %vm1356_vm3, %v1366_v4, %v1368_v29  ;;  %v4419_v4 = vshll.u32 %v4372_v6, 16 }
  0xe7   : > { %v1117_v15 = vsel %vm5423_vm12, %v1112_v9, %v1116_v5  ;;  %v1124_v41 = vrot.slane %v4396_v40, 1 }
  0xea   : > { %3436 = vmatmul.msk.bf16.gmra.mxu1 %vm1548_vm11, %v1535_v28  ;;  %v4401_v28 = vld [vmem:[#allocation2 + $0x40] sm:$0xff] }
  0xeb   : > { %1423 = vrot.lane.b32.xlu0 %v1367_v51, %s3721_s20  ;;  %1331 = vrot.lane.b32.xlu1 %v1284_v21, %s3723_s22  ;;  %v1464_v21 = vrot.slane %v4396_v40, 3  ;;  %v1538_v39 = vrot.slane %v4401_v28, 3 }
  0xec   : > { %612 = vperm.xlu2 %3662, %v451_v54   ;;  %v453_v54 = vld [vmem:[%s3813_s16 + $0xb0] sm:$0xff] }
  0xf3   : > { %1216 = vrot.lane.b32.xlu0 %v1197_v43, %s3718_s17  ;;  %1501 = vrot.lane.b32.xlu1 %v1454_v53, %s3724_s24  ;;  %v1120_v53 = vor.u32 %v4315_v48, %v1116_v5 }
  0xf4   : > { %1384 = vrot.lane.b32.xlu2 %v4277_v32, %s3719_s18  ;;  %v1293_v32 = vrot.slane %v4315_v48, 1  ;;  %v1297_v48 = vrot.slane %v4399_v10, 1 }
  0xf5   : > { %v1125_v9 = vsel %vm5423_vm12, %v1120_v53, %v1124_v41 }
  0xf6   : > { %v1295_v44 = vor.u32 %v1294_v33, %v1293_v32  ;;  %v4444_v33 = vshll.u32 %v4401_v28, 16 }
  0xf8   : > { %v1296_v37 = vsel %vm1272_vm13, %v4309_v22, %v1295_v44  ;;  %v1465_v22 = vor.u32 %v1464_v21, %v1463_v52 }
  0xfa   : > { %3437 = vmatmul.msk.bf16.gmra.mxu1 %vm1548_vm11, %v1537_v30  ;;  %v1301_v30 = vrot.slane %v4422_v26, 1 }
  0xfb   : > { %627 = vperm.xlu0 %3660, %v454_v0   ;;  %1253 = vrot.lane.b32.xlu1 %v1197_v43, %s3720_s19  ;;  %v1539_v43 = vsel %vm1526_vm10, %v1536_v18, %v1538_v39  ;;  %v1302_v0 = vrot.slane %v4419_v4, 2  ;;  %v1298_v18 = vrot.slane %v4396_v40, 2  ;;  %v3567_v40 = vld [vmem:[%s5412_s2 + $0x20] sm:$0xff] }
  0xfc   : > { %1169 = vrot.lane.b32.xlu2 %v1117_v15, %s3722_s21  ;;  %v1466_v15 = vsel %vm1442_vm14, %v4332_v2, %v1465_v22  ;;  %v1198_v2 = vrot.slane %v4336_v3, 1 }
  0xfd   : > { %v4441_v32 = vor.u32 %v1302_v0, %v1301_v30  ;;  %v1467_v30 = vrot.slane %v4422_v26, 2  ;;  %v1468_v0 = vrot.slane %v4419_v4, 3 }
  0xfe   : > { %v1199_v53 = vsel %vm1186_vm9, %v1196_v61, %v1198_v2 }
 0x103   : > { %1425 = vrot.lane.b32.xlu0 %v4407_v49, %s3721_s20  ;;  %1337 = vrot.lane.b32.xlu1 %v1296_v37, %s3723_s22  ;;  %v1299_v37 = vor.u32 %v1298_v18, %v1297_v48  ;;  %v1200_v18 = vrot.slane %v4372_v6, 1 }
 0x104   : > { %622 = vperm.xlu2 %3662, %v453_v54   ;;  %v4447_v54 = vshrl.u32 %v4401_v28, 16 }
 0x105   : > { %v1304_v52 = vsel %vm1272_vm13, %v1299_v37, %v4441_v32  ;;  %v1201_v8 = vsel %vm1186_vm9, %v1198_v2, %v1200_v18  ;;  %v1300_v14 = vsel %vm1272_vm13, %v1295_v44, %v1299_v37 }
 0x106   : > { %v1471_v21 = vrot.slane %v4447_v54, 2 }
 0x10a   : > { %3438 = vmatmul.msk.bf16.gmra.mxu1 %vm1548_vm11, %v1539_v43  ;;  %v1472_v43 = vrot.slane %v4444_v33, 3 }
 0x10b   : > { %1171 = vrot.lane.b32.xlu0 %v1125_v9, %s3722_s21  ;;  %1507 = vrot.lane.b32.xlu1 %v1466_v15, %s3724_s24  ;;  %v5422_v9 = vrot.slane %v4346_v27, 3 }
 0x10c   : > { %1386 = vrot.lane.b32.xlu2 %v1367_v51, %s3719_s18  ;;  %v4439_v5 = vpop.permute.xlu2 %1380  ;;  %v455_v51 = vld [vmem:[%s3813_s16 + $0xc0] sm:$0x3f]  ;;  %v4463_v48 = vor.u32 %v1472_v43, %v1471_v21 }
 0x10d   : > { %v1541_v61 = vsel %vm1526_vm10, %v1538_v39, %v5422_v9  ;;  %v1202_v39 = vrot.slane %v4401_v28, 1 }
 0x113   : > { %1341 = vrot.lane.b32.xlu0 %v1304_v52, %s3723_s22  ;;  %1255 = vrot.lane.b32.xlu1 %v1199_v53, %s3720_s19  ;;  %v1469_v52 = vor.u32 %v1468_v0, %v1467_v30  ;;  %v1370_v30 = vrot.slane %v4401_v28, 2  ;;  %v1203_v0 = vsel %vm1186_vm9, %v1200_v18, %v1202_v39 }
 0x114   : > { %632 = vperm.xlu2 %3662, %v455_v51   ;;  %v4461_v15 = vpop.permute.xlu2 %1382 }
 0x115   : > { %v1474_v51 = vsel %vm1442_vm14, %v1469_v52, %v4463_v48  ;;  %v1371_v44 = vsel %vm1356_vm3, %v1368_v29, %v1370_v30  ;;  %v1470_v2 = vsel %vm1442_vm14, %v1465_v22, %v1469_v52 }
 0x11a   : > { %3439 = vmatmul.msk.bf16.gmra.mxu1 %vm1548_vm11, %v1541_v61 }
 0x11b   : > { %1511 = vrot.lane.b32.xlu0 %v1474_v51, %s3724_s24  ;;  %1339 = vrot.lane.b32.xlu1 %v1300_v14, %s3723_s22  ;;  %v5425_v51 = vrot.slane %v4346_v27, 2 }
 0x11c   : > { %1257 = vrot.lane.b32.xlu2 %v1201_v8, %s3720_s19  ;;  %v1211_v21 = vpop.permute.xlu0 %1210 }
 0x11d   : > { %v1373_v18 = vsel %vm1356_vm3, %v1370_v30, %v5425_v51  ;;  %v3570_v30 = vld [vmem:[%s5412_s2 + $0x38] sm:$0xff] }
 0x11e   : > { %v4477_v43 = vpop.permute.xlu2 %1161  ;;  %1826 = vmatpush.bf16.msra.mxu0 %v3570_v30  ;;  %v1309_v30 = vrot.slane %v4356_v19, 1 }
 0x123   : > { %1259 = vrot.lane.b32.xlu0 %v1203_v0, %s3720_s19  ;;  %1509 = vrot.lane.b32.xlu1 %v1470_v2, %s3724_s24 }
 0x124   : > { %1427 = vrot.lane.b32.xlu2 %v1371_v44, %s3721_s20  ;;  %v4491_v14 = vpop.permute.xlu0 %1208 }
 0x125   : > { %v1250_v61 = vpop.permute.xlu1 %1249 }
 0x126   : > { %v4493_v37 = vpop.permute.xlu2 %1378 }
 0x12b   : > { %1429 = vrot.lane.b32.xlu0 %v1373_v18, %s3721_s20  ;;  %1218 = vrot.lane.b32.xlu1 %v1199_v53, %s3718_s17 }
 0x12c   : > { %1220 = vrot.lane.b32.xlu2 %v1201_v8, %s3718_s17  ;;  %v1132_v8 = vrot.slane %v4419_v4, 1 }
 0x12d   : > { %v4502_v29 = vpop.permute.xlu0 %1419  ;;  %v1252_v52 = vpop.permute.xlu1 %1251 }
 0x12e   : > { %v1164_v22 = vpop.permute.xlu2 %1163 }
 0x12f   : > { %v1552_v2 = vsel %vm1548_vm11, %v4054_v59, %v1164_v22  ;;  %v3569_v59 = vld [vmem:[%s5412_s2 + $0x30] sm:$0xff]  ;;  %v3568_v22 = vld [vmem:[%s5412_s2 + $0x28] sm:$0xff] }
 0x130   : > { %v1576_v16 = vsel %vm1572_vm0, %v1552_v2, %v1211_v21  ;;  %1827 = vmatpush.bf16.msra.mxu0 %v3569_v59  ;;  %v1128_v2 = vor.u32 %v4399_v10, %v1124_v41  ;;  %v1306_v59 = vrot.slane %v4444_v33, 2 }
 0x131   : > { %v1599_v9 = vsel %vm1595_vm15, %v1576_v16, %v1250_v61 }
 0x133   : > { %1222 = vrot.lane.b32.xlu0 %v1203_v0, %s3718_s17  ;;  %1388 = vrot.lane.b32.xlu1 %v4407_v49, %s3719_s18  ;;  %v1140_v0 = vrot.slane %v4444_v33, 1  ;;  %v1136_v49 = vor.u32 %v4422_v26, %v1132_v8  ;;  %v1133_v26 = vsel %vm5423_vm12, %v1128_v2, %v1132_v8  ;;  %v4555_v33 = vld [vmem:[%s5414_s4] ss:$0 sm:$0xff] }
 0x134   : > { %1390 = vrot.lane.b32.xlu2 %v1371_v44, %s3719_s18  ;;  %1828 = vmatpush.bf16.msra.mxu0 %v3568_v22 }
 0x135   : > { %v1213_v53 = vpop.permute.xlu0 %1212  ;;  %v4519_v21 = vpop.permute.xlu1 %1247  ;;  %v1144_v2 = vor.u32 %v4447_v54, %v1140_v0 }
 0x136   : > { %v1166_v16 = vpop.permute.xlu2 %1165 }
 0x137   : > { %v1554_v61 = vsel %vm1548_vm11, %v4039_v56, %v1166_v16  ;;  %v1141_v56 = vsel %vm5423_vm12, %v1136_v49, %v1140_v0  ;;  %v426_v16 = vld [vmem:[%s3844_s23 + $0xa0] sm:$0xff]  ;;  %v1475_v0 = vrot.slane %v4356_v19, 2 }
 0x138   : > { %v1578_v44 = vsel %vm1572_vm0, %v1554_v61, %v1213_v53  ;;  %v1310_v53 = vrot.slane %v4350_v23, 2  ;;  %v479_v61 = vmul.f32 %v4555_v33, %v426_v16  ;;  %1829 = vmatpush.bf16.msra.mxu0 %v3567_v40 }
 0x139   : > { %v4527_v4 = vsel %vm1595_vm15, %v1578_v44, %v1252_v52  ;;  %v1305_v52 = vrot.slane %v4447_v54, 1 }
 0x13a   : > { %v4550_v8 = vor.u32 %v1310_v53, %v1309_v30  ;;  %v1149_v30 = vsel %vm5423_vm12, %v1144_v2, %v1148_v13  ;;  %v1476_v13 = vrot.slane %v4350_v23, 3  ;;  %vm668_vm12 = vmand %vm666_vm7, %vm667_vm8  ;;  %vm977_vm7 = vsmask.f32 3328 }
 0x13b   : > { %1392 = vrot.lane.b32.xlu0 %v1373_v18, %s3719_s18  ;;  %1173 = vrot.lane.b32.xlu1 %v1133_v26, %s3722_s21  ;;  %v1307_v49 = vor.u32 %v1306_v59, %v1305_v52  ;;  %v3565_v26 = vld [vmem:[%s5412_s2 + $0x10] sm:$0xff]  ;;  %vm4742_vm8 = vmand %vm947_vm6, %vm977_vm7 }
 0x13c   : > { %1175 = vrot.lane.b32.xlu2 %v1141_v56, %s3722_s21  ;;  %v3566_v56 = vld [vmem:[%s5412_s2 + $0x18] sm:$0xff]  ;;  %v4596_v40 = vor.u32 %v1476_v13, %v1475_v0 }
 0x13d   : > { %v4548_v10 = vpop.permute.xlu0 %1421  ;;  %v1334_v18 = vpop.permute.xlu1 %1333  ;;  %v1312_v53 = vsel %vm1272_vm13, %v1307_v49, %v4550_v8  ;;  %v1308_v54 = vsel %vm1272_vm13, %v4441_v32, %v1307_v49  ;;  %1830 = vmatpush.bf16.msra.mxu0 %v3566_v56  ;;  %v3563_v56 = vld [vmem:[%s5412_s2] sm:$0xff] }
 0x13e   : > { %v1168_v41 = vpop.permute.xlu2 %1167  ;;  %v1622_v44 = vsel %vm1618_vm1, %v1599_v9, %v1334_v18  ;;  %v4573_v9 = vld [vmem:[%s5414_s4 + $0x1] ss:$0 sm:$0xff] }
 0x13f   : > { %v1645_v22 = vsel %vm1641_vm2, %v1622_v44, %v4439_v5  ;;  %v505_v5 = vadd.f32 %v4573_v9, %v479_v61  ;;  %v1556_v52 = vsel %vm1548_vm11, %v4109_v55, %v1168_v41  ;;  %v3564_v61 = vld [vmem:[%s5412_s2 + $0x8] sm:$0xff]  ;;  %v1478_v55 = vsel %vm1442_vm14, %v4463_v48, %v4596_v40 }
 0x140   : > { %v427_v41 = vld [vmem:[%s3844_s23 + $0xa8] sm:$0xff]  ;;  %v4617_v13 = vsel %vm1664_vm4, %v1645_v22, %v4502_v29 }
 0x141   : > { %1831 = vmatpush.bf16.msra.mxu0 %v3565_v26  ;;  %v480_v0 = vmul.f32 %v4555_v33, %v427_v41 }
 0x143   : > { %1177 = vrot.lane.b32.xlu0 %v1149_v30, %s3722_s21  ;;  %1343 = vrot.lane.b32.xlu1 %v1308_v54, %s3723_s22 }
 0x144   : > { %1345 = vrot.lane.b32.xlu2 %v1312_v53, %s3723_s22 }
 0x145   : > { %v1215_v32 = vpop.permute.xlu0 %1214  ;;  %v4590_v16 = vpop.permute.xlu1 %1503  ;;  %1832 = vmatpush.bf16.msra.mxu0 %v3564_v61 }
 0x146   : > { %v4588_v59 = vpop.permute.xlu2 %612  ;;  %v4593_v19 = vsel %vm1572_vm0, %v1556_v52, %v1215_v32  ;;  %v4622_v52 = vrot.slane %v4346_v27, 1 }
 0x147   : > { %v655_v23 = vmul.f32 %v4588_v59, %v505_v5  ;;  %v877_v5 = vrot.slane %v4253_v36, 4 }
 0x148   : > { %v4634_v29 = vsel %vm1186_vm9, %v1202_v39, %v4622_v52 }
 0x149   : > { %v692_v18 = vpack.c.bf16 %v655_v23, %v655_v23  ;;  %1833 = vmatpush.bf16.msra.mxu0 %v3563_v56  ;;  %v506_v23 = vadd.f32 %v4573_v9, %v480_v0  ;;  %v1550_v0 = vsel %vm1548_vm11, %v4175_v34, %v4477_v43 }
 0x14b   : > { %v879_v44 = vshrl.u32 %v692_v18, 16  ;;  %v882_v2 = vshll.u32 %v692_v18, 16  ;;  %1513 = vrot.lane.b32.xlu1 %v1478_v55, %s3724_s24 }
 0x14d   : > { %v881_v49 = vrot.slane %v879_v44, 7  ;;  %v4609_v30 = vpop.permute.xlu0 %1417  ;;  %v1336_v48 = vpop.permute.xlu1 %1335 }
 0x14e   : > { %v4611_v53 = vpop.permute.xlu2 %1384  ;;  %v1624_v26 = vsel %vm1618_vm1, %v4527_v4, %v1336_v48  ;;  %v428_v4 = vld [vmem:[%s3844_s23 + $0xb0] sm:$0xff] }
 0x14f   : > { %v884_v54 = vor.u32 %v882_v2, %v881_v49  ;;  %v1647_v36 = vsel %vm1641_vm2, %v1624_v26, %v4461_v15  ;;  %v5424_v15 = vrot.slane %v4588_v59, 2  ;;  %v481_v41 = vmul.f32 %v4555_v33, %v428_v4 }
 0x150   : > { %v4666_v43 = vsel %vm1664_vm4, %v1647_v36, %v4548_v10 }
 0x151   : > { %v885_v32 = vsel %vm3886_vm5, %v877_v5, %v884_v54  ;;  %v507_v5 = vadd.f32 %v4573_v9, %v481_v41  ;;  %v669_v54 = vld [vmem:[#allocation2 + $0x60] sm:$0x8] }
 0x152   : > { %973 = vst.msk [vmem:[#allocation2 + $0x50] sm:$0xf] %vm947_vm6, %v885_v32  ;;  %v670_v48 = vsel %vm668_vm12, 0, %v669_v54  ;;  %vm1687_vm12 = vcmask 916480  }
 0x153   : > { %1261 = vrot.lane.b32.xlu1 %v4634_v29, %s3720_s19  ;;  %671 = vst [vmem:[#allocation2 + $0x60] sm:$0x8] %v670_v48  ;;  %v429_v48 = vld [vmem:[%s3844_s23 + $0xb8] sm:$0xff] }
 0x155   : > { %v618_v22 = vpop.permute.xlu0 %617  ;;  %v4642_v61 = vpop.permute.xlu1 %1505 }
 0x156   : > { %v4639_v18 = vpop.permute.xlu2 %1169  ;;  %v656_v44 = vmul.f32 %v618_v22, %v506_v23  ;;  %v2101_v55 = vrot.slane %v618_v22, 2  ;;  %v1574_v23 = vsel %vm1572_vm0, %v1550_v0, %v4491_v14 }
 0x157   : > { %v1597_v34 = vsel %vm1595_vm15, %v1574_v23, %v4519_v21  ;;  %v430_v21 = vld [vmem:[%s3844_s23 + $0xc0] sm:$0x3f]  ;;  %v482_v23 = vmul.f32 %v4555_v33, %v429_v48 }
 0x158   : > { %v693_v2 = vpack.c.bf16 %v656_v44, %v656_v44  ;;  %v4648_v39 = vsel %vm1356_vm3, %v5424_v15, %v2101_v55  ;;  %v886_v44 = vrot.slane %v881_v49, 4 }
 0x159   : > { %5433 = vst [vmem:[#allocation4_spill] sm:$0xff] %v4648_v39 }
 0x15a   : > { %v888_v56 = vshrl.u32 %v693_v2, 16  ;;  %v891_v32 = vshll.u32 %v693_v2, 16 }
 0x15c   : > { %v890_v26 = vrot.slane %v888_v56, 7 }
 0x15d   : > { %v4656_v4 = vpop.permute.xlu0 %1423  ;;  %v1332_v15 = vpop.permute.xlu1 %1331 }
 0x15e   : > { %v4658_v22 = vpop.permute.xlu2 %622  ;;  %v893_v41 = vor.u32 %v891_v32, %v890_v26  ;;  %v1620_v2 = vsel %vm1618_vm1, %v1597_v34, %v1332_v15 }
 0x15f   : > { %5434 = vst [vmem:[#allocation5_spill] sm:$0xff] %v4658_v22  ;;  %v657_v54 = vmul.f32 %v4658_v22, %v507_v5  ;;  %v5426_v51 = vrot.slane %v4658_v22, 2  ;;  %v1643_v10 = vsel %vm1641_vm2, %v1620_v2, %v4493_v37 }
 0x160   : > { %v894_v14 = vsel %vm3886_vm5, %v886_v44, %v893_v41  ;;  %v4689_v44 = vpop.f32.mrf.mxu1  ;;  %v895_v41 = vrot.slane %v890_v26, 4  ;;  %v1666_v37 = vsel %vm1664_vm4, %v1643_v10, %v4609_v30  ;;  %v5436_v10 = vrot.slane %v4346_v27, 3 }
 0x161   : > { %v694_v56 = vpack.c.bf16 %v657_v54, %v657_v54  ;;  %v4674_v49 = vsel %vm1356_vm3, %v2101_v55, %v5426_v51  ;;  %974 = vst.msk [vmem:[#allocation2 + $0x54] sm:$0xf] %vm947_vm6, %v894_v14  ;;  %v483_v55 = vmul.f32 %v4555_v33, %v430_v21  ;;  %v508_v33 = vadd.f32 %v4573_v9, %v482_v23 }
 0x162   : > { %5435 = vst [vmem:[#allocation6_spill] sm:$0xff] %v4674_v49  ;;  %v5437_v23 = vrot.slane %v4346_v27, 2 }
 0x163   : > { %v897_v5 = vshrl.u32 %v694_v56, 16  ;;  %v900_v0 = vshll.u32 %v694_v56, 16  ;;  %v509_v26 = vadd.f32 %v4573_v9, %v483_v55 }
 0x165   : > { %v4681_v36 = vrot.slane %v897_v5, 7  ;;  %v4683_v32 = vpop.permute.xlu0 %1216  ;;  %v1502_v34 = vpop.permute.xlu1 %1501 }
 0x166   : > { %v4685_v15 = vpop.permute.xlu2 %1386  ;;  %v1689_v14 = vsel %vm1687_vm12, %v1666_v37, %v1502_v34 }
 0x167   : > { %v902_v54 = vor.u32 %v900_v0, %v4681_v36  ;;  %1834 = vmatmul.bf16.vlgmr.msra.gmra.mxu0 %v1689_v14 }
 0x168   : > { %v4697_v56 = vld [vmem:[#allocation2 + $0x50] sm:$0xff]  ;;  %v4723_v27 = vpop.f32.mrf.mxu1 }
 0x169   : > { %v903_v2 = vsel %vm3886_vm5, %v895_v41, %v902_v54  ;;  %v5428_v5 = vrot.slane %v4697_v56, 3  ;;  %v4704_v48 = vrot.slane %v4697_v56, 2  ;;  %v1314_v30 = vshrl.u32 %v4697_v56, 16 }
 0x16a   : > { %975 = vst.msk [vmem:[#allocation2 + $0x58] sm:$0xf] %vm947_vm6, %v903_v2  ;;  %v1317_v21 = vshll.u32 %v4697_v56, 16 }
 0x16b   : > { %v1543_v0 = vsel %vm1526_vm10, %v5436_v10, %v5428_v5  ;;  %v1375_v9 = vsel %vm1356_vm3, %v5437_v23, %v4704_v48  ;;  %v1479_v55 = vrot.slane %v1314_v30, 2  ;;  %v1316_v37 = vrot.slane %v1314_v30, 1  ;;  %v1003_v10 = vld [vmem:[#allocation2 + $0x50] sm:$0x3] }
 0x16c   : > { %v1480_v41 = vrot.slane %v1317_v21, 3  ;;  %3440 = vmatmul.msk.bf16.gmra.mxu1 %vm1548_vm11, %v1543_v0  ;;  %1431 = vrot.lane.b32.xlu1 %v1375_v9, %s3721_s20  ;;  %v1319_v14 = vrot.slane %v1317_v21, 2 }
 0x16d   : > { %v628_v54 = vpop.permute.xlu0 %627  ;;  %v1254_v2 = vpop.permute.xlu1 %1253 }
 0x16e   : > { %v633_v34 = vpop.permute.xlu2 %632  ;;  %v658_v51 = vmul.f32 %v628_v54, %v508_v33  ;;  %v4719_v49 = vor.u32 %v1480_v41, %v1479_v55  ;;  %v4721_v5 = vor.u32 %v1319_v14, %v1316_v37  ;;  %v1243_v55 = vrot.slane %v4697_v56, 1 }
 0x16f   : > { %v659_v22 = vmul.f32 %v633_v34, %v509_v26  ;;  %v1071_v26 = vunpack.c.l.b16 %v1003_v10 }
 0x170   : > { %v695_v23 = vpack.c.bf16 %v658_v51, %v658_v51  ;;  %v1482_v0 = vsel %vm1442_vm14, %v4596_v40, %v4719_v49  ;;  %v1321_v33 = vsel %vm1272_vm13, %v4550_v8, %v4721_v5  ;;  %v904_v40 = vrot.slane %v4681_v36, 4 }
 0x171   : > { %v696_v39 = vpack.c.bf16 %v659_v22, %v659_v22  ;;  %1515 = vrot.lane.b32.xlu2 %v1482_v0, %s3724_s24  ;;  %1347 = vrot.lane.b32.xlu0 %v1321_v33, %s3723_s22  ;;  %v1009_v34 = vld [vmem:[#allocation2 + $0x58] sm:$0x7]  ;;  %v4737_v37 = vpack.c.b16 %v1071_v26, %v1071_v26  ;;  %v1603_v8 = vsel %vm1595_vm15, %v4593_v19, %v1254_v2 }
 0x172   : > { %v906_v30 = vshrl.u32 %v695_v23, 16  ;;  %v909_v22 = vshll.u32 %v695_v23, 16  ;;  %v979_v23 = vld [vmem:[#allocation2 + $0x60] sm:$0xf]  ;;  %v1270_v26 = vunpack.c.l.b16 %v1009_v34 }
 0x173   : > { %v915_v21 = vshrl.u32 %v696_v39, 16  ;;  %v918_v54 = vshll.u32 %v696_v39, 16  ;;  %v1154_v50 = vshll.u32 %v4737_v37, 16 }
 0x174   : > { %v908_v51 = vrot.slane %v906_v30, 7  ;;  %1224 = vrot.lane.b32.xlu1 %v4634_v29, %s3718_s17  ;;  %v1692_v29 = vsel %vm1687_vm12, %v4617_v13, %v4590_v16  ;;  %v4767_v13 = vpop.f32.mrf.mxu1 }
 0x175   : > { %v917_v41 = vrot.slane %v915_v21, 7  ;;  %v1338_v33 = vpop.permute.xlu1 %1337  ;;  %v1244_v21 = vsel %vm1186_vm9, %v4622_v52, %v1243_v55 }
 0x176   : > { %v911_v14 = vor.u32 %v909_v22, %v908_v51  ;;  %v913_v10 = vrot.slane %v908_v51, 4  ;;  %v1626_v36 = vsel %vm1618_vm1, %v1603_v8, %v1338_v33  ;;  %v4772_v51 = vrot.slane %v1154_v50, 1 }
 0x177   : > { %v920_v39 = vor.u32 %v918_v54, %v917_v41  ;;  %v4756_v30 = vsel %vm1641_vm2, %v1626_v36, %v4611_v53  ;;  %1839 = vmatmul.bf16.gmra.mxu0 %v1692_v29  ;;  %v4769_v53 = vpack.c.b16 %v1270_v26, %v1270_v26 }
 0x178   : > { %v912_v19 = vsel %vm3886_vm5, %v904_v40, %v911_v14  ;;  %v1008_v40 = vld [vmem:[#allocation2 + $0x58] sm:$0x3] }
 0x179   : > { %v921_v2 = vsel %vm3886_vm5, %v913_v10, %v920_v39  ;;  %976 = vst.msk [vmem:[#allocation2 + $0x5c] sm:$0xf] %vm947_vm6, %v912_v19  ;;  %1263 = vrot.lane.b32.xlu2 %v1244_v21, %s3720_s19  ;;  %v1323_v41 = vshrl.u32 %v4769_v53, 16  ;;  %v1326_v54 = vshll.u32 %v4769_v53, 16  ;;  %vm5440_vm5 = vsmask.f32 7424 }
 0x17a   : > { %v980_v16 = vsel %vm4742_vm8, %v921_v2, %v979_v23  ;;  %v1157_v8 = vsel %vm5440_vm5, %v4365_v17, %v4772_v51  ;;  %v1237_v36 = vunpack.c.l.b16 %v1008_v40  ;;  %v5441_v19 = vrot.slane %v4697_v56, 3 }
 0x17b   : > { %981 = vst [vmem:[#allocation2 + $0x60] sm:$0xf] %v980_v16  ;;  %v1325_v39 = vrot.slane %v1323_v41, 1  ;;  %v1328_v33 = vrot.slane %v1326_v54, 2 }
 0x17c   : > { %1394 = vrot.lane.b32.xlu1 %v1375_v9, %s3719_s18  ;;  %v4787_v26 = vpop.f32.mrf.mxu1 }
 0x17d   : > { %v4774_v22 = vpop.permute.xlu1 %1507  ;;  %v1329_v40 = vor.u32 %v1328_v33, %v1325_v39 }
 0x180   : > { %v4778_v34 = vld [vmem:[#allocation2 + $0x58] sm:$0xff] }
 0x181   : > { %v1544_v10 = vrot.slane %v4778_v34, 3  ;;  %v1413_v9 = vrot.slane %v4778_v34, 2  ;;  %v1484_v0 = vshrl.u32 %v4778_v34, 16  ;;  %v1487_v23 = vshll.u32 %v4778_v34, 16 }
 0x182   : > { %v1015_v14 = vld [vmem:[#allocation2 + $0x60] sm:$0xf]  ;;  %v1695_v34 = vsel %vm1687_vm12, %v4666_v43, %v4642_v61 }
 0x183   : > { %v1440_v29 = vunpack.c.l.b16 %v1015_v14  ;;  %v1545_v2 = vsel %vm1526_vm10, %v5441_v19, %v1544_v10  ;;  %v1414_v17 = vsel %vm1356_vm3, %v4704_v48, %v1413_v9  ;;  %v1486_v21 = vrot.slane %v1484_v0, 2 }
 0x184   : > { %v1489_v16 = vrot.slane %v1487_v23, 3  ;;  %1179 = vrot.lane.b32.xlu1 %v1157_v8, %s3722_s21  ;;  %3441 = vmatmul.msk.bf16.gmra.mxu1 %vm1548_vm11, %v1545_v2  ;;  %v1240_v0 = vpack.c.b16 %v1237_v36, %v1237_v36  ;;  %v1206_v8 = vrot.slane %v4737_v37, 1  ;;  %v1330_v2 = vsel %vm1272_vm13, %v4721_v5, %v1329_v40 }
 0x185   : > { %v1441_v50 = vpack.c.b16 %v1440_v29, %v1440_v29  ;;  %v1256_v41 = vpop.permute.xlu1 %1255  ;;  %1433 = vrot.lane.b32.xlu2 %v1414_v17, %s3721_s20  ;;  %v1014_v29 = vld [vmem:[#allocation2 + $0x60] sm:$0x7] }
 0x186   : > { %v1490_v54 = vor.u32 %v1489_v16, %v1486_v21  ;;  %v1245_v17 = vrot.slane %v1240_v0, 1  ;;  %v1407_v61 = vunpack.c.l.b16 %v1014_v29  ;;  %v1207_v43 = vsel %vm1186_vm9, %v4622_v52, %v1206_v8  ;;  %v1426_v0 = vpop.permute.xlu0 %1425 }
 0x187   : > { %1844 = vmatmul.bf16.gmra.mxu0 %v1695_v34  ;;  %v1493_v23 = vshrl.u32 %v1441_v50, 16  ;;  %v1496_v19 = vshll.u32 %v1441_v50, 16  ;;  %v1546_v36 = vrot.slane %v1441_v50, 3 }
 0x188   : > { %v1491_v14 = vsel %vm1442_vm14, %v4719_v49, %v1490_v54  ;;  %v4809_v49 = vpop.f32.mrf.mxu1  ;;  %v1246_v33 = vsel %vm1186_vm9, %v1243_v55, %v1245_v17  ;;  %v1410_v34 = vpack.c.b16 %v1407_v61, %v1407_v61  ;;  %v1672_v55 = vsel %vm1664_vm4, %v4756_v30, %v4656_v4 }
 0x189   : > { %1517 = vrot.lane.b32.xlu0 %v1491_v14, %s3724_s24  ;;  %v1495_v21 = vrot.slane %v1493_v23, 2  ;;  %v1498_v16 = vrot.slane %v1496_v19, 3  ;;  %v1376_v14 = vrot.slane %v4769_v53, 2  ;;  %v1547_v52 = vsel %vm1526_vm10, %v1544_v10, %v1546_v36 }
 0x18a   : > { %v1415_v19 = vrot.slane %v1410_v34, 2  ;;  %v1698_v53 = vsel %vm1687_vm12, %v1672_v55, %v4774_v22  ;;  %v1258_v22 = vpop.permute.xlu2 %1257 }
 0x18b   : > { %v1499_v5 = vor.u32 %v1498_v16, %v1495_v21  ;;  %v1377_v29 = vsel %vm1356_vm3, %v4704_v48, %v1376_v14  ;;  %v1158_v48 = vshrl.u32 %v4737_v37, 16 }
 0x18c   : > { %1349 = vrot.lane.b32.xlu1 %v1330_v2, %s3723_s22  ;;  %v1416_v50 = vsel %vm1356_vm3, %v1413_v9, %v1415_v19  ;;  %v3674_v2 = vld [vmem:[#allocation2 + $0x20] sm:$0xff] }
 0x18d   : > { %v1340_v39 = vpop.permute.xlu1 %1339  ;;  %1226 = vrot.lane.b32.xlu2 %v1207_v43, %s3718_s17  ;;  %v1500_v23 = vsel %vm1442_vm14, %v1490_v54, %v1499_v5  ;;  %v1160_v54 = vor.u32 %v1158_v48, %v4772_v51  ;;  %v1558_v21 = vsel %vm1548_vm11, %v3674_v2, %v4639_v18  ;;  %v3675_v43 = vld [vmem:[#allocation2 + $0x28] sm:$0xff]  ;;  %vm2147_vm14 = vcmask 253952  }
 0x18e   : > { %v1172_v16 = vpop.permute.xlu0 %1171  ;;  %v1582_v4 = vsel %vm1572_vm0, %v1558_v21, %v4683_v32 }
 0x18f   : > { %v1605_v9 = vsel %vm1595_vm15, %v1582_v4, %v1256_v41 }
 0x190   : > { %v4829_v10 = vpop.f32.mrf.mxu1  ;;  %v1628_v37 = vsel %vm1618_vm1, %v1605_v9, %v1340_v39 }
 0x191   : > { %1265 = vrot.lane.b32.xlu0 %v1246_v33, %s3720_s19  ;;  %v1651_v18 = vsel %vm1641_vm2, %v1628_v37, %v4685_v15 }
 0x192   : > { %v1428_v39 = vpop.permute.xlu2 %1427 }
 0x194   : > { %3442 = vmatmul.msk.bf16.gmra.mxu1 %vm1548_vm11, %v1547_v52  ;;  %1519 = vrot.lane.b32.xlu1 %v1500_v23, %s3724_s24 }
 0x195   : > { %v1510_v56 = vpop.permute.xlu1 %1509  ;;  %1396 = vrot.lane.b32.xlu2 %v1377_v29, %s3719_s18 }
 0x196   : > { %v1342_v61 = vpop.permute.xlu0 %1341 }
 0x197   : > { %1849 = vmatmul.bf16.gmra.mxu0 %v1698_v53 }
 0x198   : > { %v4844_v51 = vpop.f32.mrf.mxu1 }
 0x199   : > { %1435 = vrot.lane.b32.xlu0 %v1416_v50, %s3721_s20 }
 0x19a   : > { %v1221_v23 = vpop.permute.xlu2 %1220 }
 0x19c   : > { %1267 = vrot.lane.b32.xlu1 %v1245_v17, %s3720_s19  ;;  %v1674_v17 = vsel %vm1664_vm4, %v1651_v18, %v1426_v0 }
 0x19d   : > { %v1219_v30 = vpop.permute.xlu1 %1218  ;;  %1181 = vrot.lane.b32.xlu2 %v1160_v54, %s3722_s21  ;;  %v1701_v41 = vsel %vm1687_vm12, %v1674_v17, %v1510_v56  ;;  %s3355_s21 = sshll.u32 %s5466_s28, 3 }
 0x19e   : > { %v1512_v0 = vpop.permute.xlu0 %1511 }
 0x1a0   : > { %v4856_v33 = vpop.f32.mrf.mxu1 }
 0x1a1   : > { %1228 = vrot.lane.b32.xlu0 %v1206_v8, %s3718_s17  ;;  %v1560_v8 = vsel %vm1548_vm11, %v3675_v43, %v1172_v16 }
 0x1a2   : > { %v1584_v15 = vsel %vm1572_vm0, %v1560_v8, %v1219_v30  ;;  %v1391_v50 = vpop.permute.xlu2 %1390 }
 0x1a4   : > { %3443 = vmatmul.msk.bf16.gmra.mxu1 %vm1548_vm11, %v1546_v36  ;;  %1437 = vrot.lane.b32.xlu1 %v1415_v19, %s3721_s20  ;;  %v1607_v36 = vsel %vm1595_vm15, %v1584_v15, %v1258_v22 }
 0x1a5   : > { %v1389_v32 = vpop.permute.xlu1 %1388  ;;  %1351 = vrot.lane.b32.xlu2 %v1329_v40, %s3723_s22  ;;  %v1630_v40 = vsel %vm1618_vm1, %v1607_v36, %v1342_v61 }
 0x1a6   : > { %v1653_v52 = vsel %vm1641_vm2, %v1630_v40, %v1389_v32  ;;  %v1260_v53 = vpop.permute.xlu0 %1259 }
 0x1a7   : > { %1854 = vmatmul.bf16.gmra.mxu0 %v1701_v41  ;;  %v1676_v19 = vsel %vm1664_vm4, %v1653_v52, %v1428_v39 }
 0x1a8   : > { %v4863_v29 = vpop.f32.mrf.mxu1 }
 0x1a9   : > { %1398 = vrot.lane.b32.xlu0 %v1376_v14, %s3719_s18  ;;  %v1704_v14 = vsel %vm1687_vm12, %v1676_v19, %v1512_v0 }
 0x1aa   : > { %v1176_v22 = vpop.permute.xlu2 %1175 }
 0x1ab   : > { %v1564_v61 = vsel %vm1548_vm11, %v4372_v6, %v1176_v22  ;;  %v4893_v6 = vld [vmem:[%s5414_s4 + $0x2] ss:$0 sm:$0xff] }
 0x1ad   : > { %1521 = vrot.lane.b32.xlu2 %v1499_v5, %s3724_s24  ;;  %v1174_v34 = vpop.permute.xlu1 %1173 }
 0x1ae   : > { %v1562_v56 = vsel %vm1548_vm11, %v4336_v3, %v1174_v34  ;;  %v1430_v4 = vpop.permute.xlu0 %1429 }
 0x1af   : > { %v1586_v5 = vsel %vm1572_vm0, %v1562_v56, %v1221_v23  ;;  %v4899_v56 = vld [vmem:[%s5414_s4 + $0x3] ss:$0 sm:$0xff] }
 0x1b0   : > { %v1609_v48 = vsel %vm1595_vm15, %v1586_v5, %v1260_v53  ;;  %v4870_v54 = vpop.f32.mrf.mxu1 }
 0x1b2   : > { %v1346_v37 = vpop.permute.xlu2 %1345 }
 0x1b5   : > { %v1344_v55 = vpop.permute.xlu1 %1343 }
 0x1b6   : > { %v1632_v2 = vsel %vm1618_vm1, %v1609_v48, %v1344_v55  ;;  %v1223_v32 = vpop.permute.xlu0 %1222 }
 0x1b7   : > { %1859 = vmatmul.bf16.gmra.mxu0 %v1704_v14  ;;  %v1655_v21 = vsel %vm1641_vm2, %v1632_v2, %v1391_v50  ;;  %v1588_v41 = vsel %vm1572_vm0, %v1564_v61, %v1223_v32  ;;  %v4907_v50 = vld [vmem:[%s5414_s4 + $0x4] ss:$0 sm:$0xff] }
 0x1b8   : > { %v1678_v30 = vsel %vm1664_vm4, %v1655_v21, %v1430_v4  ;;  %v4876_v9 = vpop.f32.mrf.mxu1 }
 0x1bd   : > { %v1514_v16 = vpop.permute.xlu1 %1513 }
 0x1be   : > { %v1707_v3 = vsel %vm1687_vm12, %v1678_v30, %v1514_v16  ;;  %v1393_v36 = vpop.permute.xlu0 %1392 }
 0x1c0   : > { %v4878_v18 = vpop.f32.mrf.mxu1 }
 0x1c5   : > { %v1262_v17 = vpop.permute.xlu1 %1261 }
 0x1c6   : > { %v1611_v43 = vsel %vm1595_vm15, %v1588_v41, %v1262_v17  ;;  %v1178_v2 = vpop.permute.xlu0 %1177 }
 0x1c7   : > { %1864 = vmatmul.bf16.gmra.mxu0 %v1707_v3  ;;  %v1634_v39 = vsel %vm1618_vm1, %v1611_v43, %v1346_v37  ;;  %v1566_v37 = vsel %vm1548_vm11, %v4401_v28, %v1178_v2 }
 0x1c8   : > { %v4885_v15 = vpop.f32.mrf.mxu1  ;;  %v1657_v34 = vsel %vm1641_vm2, %v1634_v39, %v1393_v36 }
 0x1cb   : > { %v1516_v8 = vpop.permute.xlu2 %1515 }
 0x1d0   : > { %v4901_v53 = vpop.f32.mrf.mxu1 }
 0x1d3   : > { %v1264_v23 = vpop.permute.xlu2 %1263 }
 0x1de   : > { %v1432_v40 = vpop.permute.xlu1 %1431 }
 0x1df   : > { %v1680_v0 = vsel %vm1664_vm4, %v1657_v34, %v1432_v40  ;;  %v1434_v21 = vpop.permute.xlu2 %1433 }
 0x1e0   : > { %v1710_v52 = vsel %vm1687_vm12, %v1680_v0, %v1516_v8 }
 0x1e1   : > { %1869 = vmatmul.bf16.gmra.mxu0 %v1710_v52 }
 0x1e3   : > { %v1348_v43 = vpop.permute.xlu0 %1347 }
 0x1e4   : > { %v1835_v19 = vpop.f32.mrf.mxu0 }
 0x1e5   : > { %v1899_v14 = vadd.f32 %v4689_v44, %v1835_v19 }
 0x1e6   : > { %v1225_v55 = vpop.permute.xlu1 %1224 }
 0x1e7   : > { %v1956_v5 = vmul.f32 %v4893_v6, %v1899_v14  ;;  %v1590_v61 = vsel %vm1572_vm0, %v1566_v37, %v1225_v55 }
 0x1e8   : > { %v1613_v8 = vsel %vm1595_vm15, %v1590_v61, %v1264_v23 }
 0x1e9   : > { %v1978_v48 = vadd.f32 %v4899_v56, %v1956_v5  ;;  %v4915_v32 = vpop.f32.mrf.mxu1  ;;  %v1636_v34 = vsel %vm1618_vm1, %v1613_v8, %v1348_v43 }
 0x1eb   : > { %vm1999_vm6 = vcmp.ge.f32.partialorder %v1978_v48, 0.0  ;;  %v2021_v44 = vmul.f32 %v4907_v50, %v1978_v48 }
 0x1ec   : > { %v1837_v16 = vpop.f32.mrf.mxu0 }
 0x1ed   : > { %v2042_v4 = vsel %vm1999_vm6, %v1978_v48, %v2021_v44  ;;  %v1901_v30 = vadd.f32 %v4723_v27, %v1837_v16  ;;  %v1227_v27 = vpop.permute.xlu2 %1226 }
 0x1ee   : > { %v2126_v22 = vmul.f32 %v3971_v11, %v2042_v4  ;;  %v1395_v3 = vpop.permute.xlu1 %1394 }
 0x1ef   : > { %v1957_v17 = vmul.f32 %v4893_v6, %v1901_v30  ;;  %v1659_v52 = vsel %vm1641_vm2, %v1636_v34, %v1395_v3  ;;  %v3676_v3 = vld [vmem:[#allocation2 + $0x48] sm:$0xff] }
 0x1f0   : > { %2153 = vst.msk [vmem:[#allocation3 + $0x1] sm:$0xff] %vm1572_vm0, %v2126_v22  ;;  %v1682_v5 = vsel %vm1664_vm4, %v1659_v52, %v1434_v21  ;;  %v1002_v52 = vld [vmem:[#allocation2 + $0x50] sm:$0x1] }
 0x1f1   : > { %v1979_v41 = vadd.f32 %v4899_v56, %v1957_v17  ;;  %v4929_v23 = vpop.f32.mrf.mxu1 }
 0x1f3   : > { %vm2000_vm9 = vcmp.ge.f32.partialorder %v1979_v41, 0.0  ;;  %v2022_v11 = vmul.f32 %v4907_v50, %v1979_v41 }
 0x1f4   : > { %v1840_v39 = vpop.f32.mrf.mxu0 }
 0x1f5   : > { %v2043_v36 = vsel %vm2000_vm9, %v1979_v41, %v2022_v11  ;;  %v1904_v28 = vadd.f32 %v4767_v13, %v1840_v39  ;;  %v1397_v16 = vpop.permute.xlu2 %1396  ;;  %v3725_v39 = vmov 0.0  }
 0x1f6   : > { %v2127_v40 = vmul.f32 %v3927_v24, %v2043_v36  ;;  %v1180_v0 = vpop.permute.xlu1 %1179  ;;  %2148 = vst.msk [vmem:[#allocation3] sm:$0x1] %vm2147_vm14, %v3725_v39 }
 0x1f7   : > { %v1958_v19 = vmul.f32 %v4893_v6, %v1904_v28  ;;  %v1568_v21 = vsel %vm1548_vm11, %v3676_v3, %v1180_v0  ;;  %2149 = vst.msk [vmem:[#allocation3 + $0xa3] sm:$0xff] %vm1572_vm0, %v3725_v39 }
 0x1f8   : > { %2154 = vst.msk [vmem:[#allocation3 + $0x9] sm:$0xff] %vm1572_vm0, %v2127_v40 }
 0x1f9   : > { %v1980_v14 = vadd.f32 %v4899_v56, %v1958_v19  ;;  %2150 = vst.msk [vmem:[#allocation3 + $0xab] sm:$0xff] %vm1572_vm0, %v3725_v39 }
 0x1fb   : > { %v1518_v55 = vpop.permute.xlu0 %1517  ;;  %vm2001_vm10 = vcmp.ge.f32.partialorder %v1980_v14, 0.0  ;;  %v2023_v13 = vmul.f32 %v4907_v50, %v1980_v14 }
 0x1fc   : > { %v1713_v24 = vsel %vm1687_vm12, %v1682_v5, %v1518_v55  ;;  %v1842_v48 = vpop.f32.mrf.mxu0 }
 0x1fd   : > { %1874 = vmatmul.bf16.gmra.mxu0 %v1713_v24  ;;  %v2044_v2 = vsel %vm2001_vm10, %v1980_v14, %v2023_v13  ;;  %v1906_v44 = vadd.f32 %v4787_v26, %v1842_v48  ;;  %v1592_v26 = vsel %vm1572_vm0, %v1568_v21, %v1227_v27  ;;  %v1182_v34 = vpop.permute.xlu2 %1181 }
 0x1fe   : > { %v2128_v4 = vmul.f32 %v3878_v42, %v2044_v2  ;;  %v1350_v30 = vpop.permute.xlu1 %1349  ;;  %v1058_v2 = vunpack.c.l.b16 %v1002_v52 }
 0x1ff   : > { %v1959_v22 = vmul.f32 %v4893_v6, %v1906_v44  ;;  %v2229_v5 = vld [vmem:[#allocation3 + $0x2] ss:$2 sm:$0xff]  ;;  %v2202_v13 = vld [vmem:[#allocation3 + $0x1] ss:$2 sm:$0xff] }
 0x200   : > { %2155 = vst.msk [vmem:[#allocation3 + $0x11] sm:$0xff] %vm1572_vm0, %v2128_v4  ;;  %v2219_v3 = vpack.c.bf16 %v2202_v13, %v2202_v13 }
 0x201   : > { %v1981_v37 = vadd.f32 %v4899_v56, %v1959_v22  ;;  %v4941_v17 = vpop.f32.mrf.mxu1  ;;  %v2246_v22 = vpack.c.bf16 %v2229_v5, %v2229_v5 }
 0x203   : > { %v1266_v61 = vpop.permute.xlu0 %1265  ;;  %vm2002_vm13 = vcmp.ge.f32.partialorder %v1981_v37, 0.0  ;;  %v2024_v41 = vmul.f32 %v4907_v50, %v1981_v37 }
 0x204   : > { %v1845_v43 = vpop.f32.mrf.mxu0  ;;  %v1615_v42 = vsel %vm1595_vm15, %v1592_v26, %v1266_v61  ;;  %v1069_v26 = vpack.c.b16 %v1058_v2, %v1058_v2 }
 0x205   : > { %v2045_v8 = vsel %vm2002_vm13, %v1981_v37, %v2024_v41  ;;  %v1909_v11 = vadd.f32 %v4809_v49, %v1845_v43  ;;  %v1638_v27 = vsel %vm1618_vm1, %v1615_v42, %v1350_v30 }
 0x206   : > { %v2129_v36 = vmul.f32 %v3992_v35, %v2045_v8  ;;  %v1520_v40 = vpop.permute.xlu1 %1519  ;;  %v1661_v19 = vsel %vm1641_vm2, %v1638_v27, %v1397_v16 }
 0x207   : > { %v1960_v28 = vmul.f32 %v4893_v6, %v1909_v11 }
 0x208   : > { %2156 = vst.msk [vmem:[#allocation3 + $0x19] sm:$0xff] %vm1572_vm0, %v2129_v36  ;;  %v2434_v36 = vunpack.c.l.b16 %v2246_v22 }
 0x209   : > { %v1982_v49 = vadd.f32 %v4899_v56, %v1960_v28  ;;  %v4958_v0 = vpop.f32.mrf.mxu1  ;;  %v2401_v28 = vunpack.c.l.b16 %v2219_v3 }
 0x20b   : > { %v1436_v35 = vpop.permute.xlu0 %1435  ;;  %vm2003_vm7 = vcmp.ge.f32.partialorder %v1982_v49, 0.0  ;;  %v2025_v14 = vmul.f32 %v4907_v50, %v1982_v49 }
 0x20c   : > { %v1684_v55 = vsel %vm1664_vm4, %v1661_v19, %v1436_v35  ;;  %v1847_v24 = vpop.f32.mrf.mxu0 }
 0x20d   : > { %v1716_v48 = vsel %vm1687_vm12, %v1684_v55, %v1520_v40  ;;  %v2046_v44 = vsel %vm2003_vm7, %v1982_v49, %v2025_v14  ;;  %v1911_v4 = vadd.f32 %v4829_v10, %v1847_v24  ;;  %v1352_v10 = vpop.permute.xlu2 %1351  ;;  %v1571_v40 = vsel %vm1548_vm11, %v1069_v26, %v1182_v34 }
 0x20e   : > { %1879 = vmatmul.bf16.gmra.mxu0 %v1716_v48  ;;  %v2130_v30 = vmul.f32 %v4022_v31, %v2046_v44  ;;  %v1268_v42 = vpop.permute.xlu1 %1267 }
 0x20f   : > { %v1961_v16 = vmul.f32 %v4893_v6, %v1911_v4  ;;  %v2231_v21 = vld [vmem:[#allocation3 + $0x12] ss:$2 sm:$0xff]  ;;  %v2204_v37 = vld [vmem:[#allocation3 + $0x11] ss:$2 sm:$0xff] }
 0x210   : > { %2157 = vst.msk [vmem:[#allocation3 + $0x21] sm:$0xff] %vm1572_vm0, %v2130_v30  ;;  %v2247_v61 = vpack.c.bf16 %v2231_v21, %v2231_v21  ;;  %v2220_v41 = vpack.c.bf16 %v2204_v37, %v2204_v37 }
 0x211   : > { %v1983_v43 = vadd.f32 %v4899_v56, %v1961_v16  ;;  %v4969_v8 = vpop.f32.mrf.mxu1 }
 0x212   : > { %v2435_v31 = vunpack.c.l.b16 %v2247_v61  ;;  %v2402_v27 = vunpack.c.l.b16 %v2220_v41 }
 0x213   : > { %v1229_v11 = vpop.permute.xlu0 %1228  ;;  %vm2004_vm8 = vcmp.ge.f32.partialorder %v1983_v43, 0.0  ;;  %v2026_v49 = vmul.f32 %v4907_v50, %v1983_v43 }
 0x214   : > { %v1850_v52 = vpop.f32.mrf.mxu0  ;;  %v1594_v35 = vsel %vm1572_vm0, %v1571_v40, %v1229_v11  ;;  %v2443_v19 = vpack.c.b16 %v2435_v31, %v2434_v36  ;;  %v2410_v14 = vpack.c.b16 %v2402_v27, %v2401_v28 }
 0x215   : > { %v2047_v55 = vsel %vm2004_vm8, %v1983_v43, %v2026_v49  ;;  %v1914_v5 = vadd.f32 %v4844_v51, %v1850_v52  ;;  %v1617_v34 = vsel %vm1595_vm15, %v1594_v35, %v1268_v42  ;;  %v1522_v22 = vpop.permute.xlu2 %1521 }
 0x216   : > { %v2131_v13 = vmul.f32 %v4027_v25, %v2047_v55  ;;  %2448 = vrot.lane.b32.xlu1 %v2443_v19, %s3723_s22  ;;  %2415 = vrot.lane.b32.xlu0 %v2410_v14, %s3718_s17  ;;  %v1640_v4 = vsel %vm1618_vm1, %v1617_v34, %v1352_v10  ;;  %v1438_v51 = vpop.permute.xlu1 %1437 }
 0x217   : > { %v1962_v24 = vmul.f32 %v4893_v6, %v1914_v5  ;;  %v2286_v28 = vld [vmem:[#allocation3 + $0x14] ss:$2 sm:$0xff] }
 0x218   : > { %2158 = vst.msk [vmem:[#allocation3 + $0x29] sm:$0xff] %vm1572_vm0, %v2131_v13  ;;  %v2303_v35 = vpack.c.bf16 %v2286_v28, %v2286_v28 }
 0x219   : > { %v1984_v48 = vadd.f32 %v4899_v56, %v1962_v24  ;;  %v4982_v2 = vpop.f32.mrf.mxu1 }
 0x21a   : > { %v2507_v24 = vunpack.c.l.b16 %v2303_v35 }
 0x21b   : > { %v1399_v44 = vpop.permute.xlu0 %1398  ;;  %vm2005_vm5 = vcmp.ge.f32.partialorder %v1984_v48, 0.0  ;;  %v2027_v25 = vmul.f32 %v4907_v50, %v1984_v48 }
 0x21c   : > { %v1663_v30 = vsel %vm1641_vm2, %v1640_v4, %v1399_v44  ;;  %v1852_v3 = vpop.f32.mrf.mxu0 }
 0x21d   : > { %v1686_v16 = vsel %vm1664_vm4, %v1663_v30, %v1438_v51  ;;  %v2048_v21 = vsel %vm2005_vm5, %v1984_v48, %v2027_v25  ;;  %v1916_v37 = vadd.f32 %v4856_v33, %v1852_v3 }
 0x21e   : > { %v1719_v61 = vsel %vm1687_vm12, %v1686_v16, %v1522_v22  ;;  %v2132_v41 = vmul.f32 %v4044_v47, %v2048_v21 }
 0x21f   : > { %1884 = vmatmul.bf16.gmra.mxu0 %v1719_v61  ;;  %v1963_v26 = vmul.f32 %v4893_v6, %v1916_v37  ;;  %v2233_v43 = vld [vmem:[#allocation3 + $0x22] ss:$2 sm:$0xff] }
 0x220   : > { %2159 = vst.msk [vmem:[#allocation3 + $0x31] sm:$0xff] %vm1572_vm0, %v2132_v41  ;;  %v2248_v42 = vpack.c.bf16 %v2233_v43, %v2233_v43 }
 0x221   : > { %v1985_v10 = vadd.f32 %v4899_v56, %v1963_v26  ;;  %v4994_v11 = vpop.f32.mrf.mxu1 }
 0x222   : > { %v4996_v36 = vunpack.c.l.b16 %v2248_v42 }
 0x223   : > { %vm2006_vm15 = vcmp.ge.f32.partialorder %v1985_v10, 0.0  ;;  %v2028_v33 = vmul.f32 %v4907_v50, %v1985_v10 }
 0x224   : > { %v1855_v27 = vpop.f32.mrf.mxu0  ;;  %v2460_v47 = vpack.c.b16 %v4996_v36, %v2435_v31 }
 0x225   : > { %v2049_v40 = vsel %vm2006_vm15, %v1985_v10, %v2028_v33  ;;  %v1919_v49 = vadd.f32 %v4863_v29, %v1855_v27  ;;  %v2206_v29 = vld [vmem:[#allocation3 + $0x21] ss:$2 sm:$0xff] }
 0x226   : > { %v2133_v52 = vmul.f32 %v4047_v58, %v2049_v40  ;;  %2465 = vrot.lane.b32.xlu2 %v2460_v47, %s3721_s20  ;;  %v2221_v51 = vpack.c.bf16 %v2206_v29, %v2206_v29 }
 0x227   : > { %v1964_v19 = vmul.f32 %v4893_v6, %v1919_v49  ;;  %v2288_v14 = vld [vmem:[#allocation3 + $0x24] ss:$2 sm:$0xff]  ;;  %v2316_v41 = vld [vmem:[#allocation3 + $0x25] ss:$2 sm:$0xff]  ;;  %v2085_v49 = vrot.slane %v4071_v38, 2 }
 0x228   : > { %2160 = vst.msk [vmem:[#allocation3 + $0x39] sm:$0xff] %vm1572_vm0, %v2133_v52  ;;  %v2304_v55 = vpack.c.bf16 %v2288_v14, %v2288_v14  ;;  %v2403_v21 = vunpack.c.l.b16 %v2221_v51  ;;  %v2333_v10 = vpack.c.bf16 %v2316_v41, %v2316_v41 }
 0x229   : > { %v1986_v5 = vadd.f32 %v4899_v56, %v1964_v19  ;;  %v1950_v13 = vpop.f32.mrf.mxu1 }
 0x22a   : > { %v2508_v34 = vunpack.c.l.b16 %v2304_v55  ;;  %v2557_v19 = vunpack.c.l.b16 %v2333_v10 }
 0x22b   : > { %vm2007_vm2 = vcmp.ge.f32.partialorder %v1986_v5, 0.0  ;;  %v2029_v31 = vmul.f32 %v4907_v50, %v1986_v5 }
 0x22c   : > { %v1857_v48 = vpop.f32.mrf.mxu0  ;;  %v2516_v58 = vpack.c.b16 %v2508_v34, %v2507_v24 }
 0x22d   : > { %v2050_v44 = vsel %vm2007_vm2, %v1986_v5, %v2029_v31  ;;  %v1921_v4 = vadd.f32 %v4870_v54, %v1857_v48  ;;  %v5442_v31 = vrot.slane %v4075_v7, 2 }
 0x22e   : > { %v2134_v25 = vmul.f32 %v4052_v63, %v2050_v44  ;;  %2521 = vrot.lane.b32.xlu0 %v2516_v58, %s3718_s17 }
 0x22f   : > { %v1965_v30 = vmul.f32 %v4893_v6, %v1921_v4  ;;  %v2208_v22 = vld [vmem:[#allocation3 + $0x31] ss:$2 sm:$0xff]  ;;  %v2235_v35 = vld [vmem:[#allocation3 + $0x32] ss:$2 sm:$0xff]  ;;  %v2086_v29 = vsel %vm1356_vm3, %v5442_v31, %v2085_v49 }
 0x230   : > { %2161 = vst.msk [vmem:[#allocation3 + $0x41] sm:$0xff] %vm1572_vm0, %v2134_v25  ;;  %v2222_v3 = vpack.c.bf16 %v2208_v22, %v2208_v22  ;;  %v2249_v24 = vpack.c.bf16 %v2235_v35, %v2235_v35 }
 0x231   : > { %v1987_v16 = vadd.f32 %v4899_v56, %v1965_v30 }
 0x232   : > { %v2404_v37 = vunpack.c.l.b16 %v2222_v3 }
 0x233   : > { %vm2008_vm12 = vcmp.ge.f32.partialorder %v1987_v16, 0.0  ;;  %v2030_v61 = vmul.f32 %v4907_v50, %v1987_v16 }
 0x234   : > { %v1860_v54 = vpop.f32.mrf.mxu0  ;;  %v2411_v26 = vpack.c.b16 %v2404_v37, %v2403_v21 }
 0x235   : > { %v2051_v63 = vsel %vm2008_vm12, %v1987_v16, %v2030_v61  ;;  %v1924_v43 = vadd.f32 %v4876_v9, %v1860_v54  ;;  %v5443_v16 = vrot.slane %v3940_v45, 2 }
 0x236   : > { %v2135_v42 = vmul.f32 %v4092_v57, %v2051_v63  ;;  %2417 = vrot.lane.b32.xlu0 %v2411_v26, %s3718_s17 }
 0x237   : > { %v1966_v33 = vmul.f32 %v4893_v6, %v1924_v43  ;;  %v2318_v28 = vld [vmem:[#allocation3 + $0x35] ss:$2 sm:$0xff]  ;;  %v2290_v27 = vld [vmem:[#allocation3 + $0x34] ss:$2 sm:$0xff]  ;;  %v2088_v21 = vsel %vm1356_vm3, %v2085_v49, %v5443_v16 }
 0x238   : > { %2162 = vst.msk [vmem:[#allocation3 + $0x49] sm:$0xff] %vm1572_vm0, %v2135_v42  ;;  %v2334_v47 = vpack.c.bf16 %v2318_v28, %v2318_v28  ;;  %v2305_v40 = vpack.c.bf16 %v2290_v27, %v2290_v27 }
 0x239   : > { %v1988_v52 = vadd.f32 %v4899_v56, %v1966_v33 }
 0x23a   : > { %v2558_v9 = vunpack.c.l.b16 %v2334_v47  ;;  %v2509_v14 = vunpack.c.l.b16 %v2305_v40 }
 0x23b   : > { %vm2009_vm6 = vcmp.ge.f32.partialorder %v1988_v52, 0.0  ;;  %v2031_v57 = vmul.f32 %v4907_v50, %v1988_v52 }
 0x23c   : > { %v1862_v55 = vpop.f32.mrf.mxu0  ;;  %v2566_v5 = vpack.c.b16 %v2558_v9, %v2557_v19  ;;  %v2533_v13 = vpack.c.b16 %v2509_v14, %v2508_v34  ;;  %v2437_v34 = vunpack.c.l.b16 %v2249_v24 }
 0x23d   : > { %v2052_v48 = vsel %vm2009_vm6, %v1988_v52, %v2031_v57  ;;  %v1926_v38 = vadd.f32 %v4878_v18, %v1862_v55  ;;  %v3578_v55 = vld [vmem:[%s5413_s3 + $0x30] sm:$0xff] }
 0x23e   : > { %v2136_v58 = vmul.f32 %v2086_v29, %v2052_v48  ;;  %2571 = vrot.lane.b32.xlu2 %v2566_v5, %s3721_s20  ;;  %2538 = vrot.lane.b32.xlu1 %v2533_v13, %s3723_s22  ;;  %v2444_v3 = vpack.c.b16 %v2437_v34, %v4996_v36 }
 0x23f   : > { %v1967_v44 = vmul.f32 %v4893_v6, %v1926_v38  ;;  %v2237_v4 = vld [vmem:[#allocation3 + $0x42] ss:$2 sm:$0xff]  ;;  %v2210_v42 = vld [vmem:[#allocation3 + $0x41] ss:$2 sm:$0xff] }
 0x240   : > { %2163 = vst.msk [vmem:[#allocation3 + $0x51] sm:$0xff] %vm1572_vm0, %v2136_v58  ;;  %v2250_v25 = vpack.c.bf16 %v2237_v4, %v2237_v4  ;;  %v2223_v47 = vpack.c.bf16 %v2210_v42, %v2210_v42  ;;  %v3577_v58 = vld [vmem:[%s5413_s3 + $0x28] sm:$0xff] }
 0x241   : > { %v1989_v51 = vadd.f32 %v4899_v56, %v1967_v44 }
 0x242   : > { %v5031_v7 = vunpack.c.l.b16 %v2250_v25  ;;  %v2405_v19 = vunpack.c.l.b16 %v2223_v47  ;;  %v5444_v47 = vrot.slane %v4166_v60, 2 }
 0x243   : > { %vm2010_vm9 = vcmp.ge.f32.partialorder %v1989_v51, 0.0  ;;  %v2032_v30 = vmul.f32 %v4907_v50, %v1989_v51 }
 0x244   : > { %v1865_v18 = vpop.f32.mrf.mxu0  ;;  %v2461_v22 = vpack.c.b16 %v5031_v7, %v2437_v34 }
 0x245   : > { %v2053_v37 = vsel %vm2010_vm9, %v1989_v51, %v2032_v30  ;;  %v1929_v61 = vadd.f32 %v4885_v15, %v1865_v18  ;;  %v3576_v18 = vld [vmem:[%s5413_s3 + $0x20] sm:$0xff]  ;;  %vm2173_vm9 = vcmask 254976  }
 0x246   : > { %v2137_v41 = vmul.f32 %v2088_v21, %v2053_v37  ;;  %2467 = vrot.lane.b32.xlu2 %v2461_v22, %s3721_s20  ;;  %2450 = vrot.lane.b32.xlu1 %v2444_v3, %s3723_s22 }
 0x247   : > { %v1968_v54 = vmul.f32 %v4893_v6, %v1929_v61  ;;  %v2292_v26 = vld [vmem:[#allocation3 + $0x44] ss:$2 sm:$0xff] }
 0x248   : > { %2164 = vst.msk [vmem:[#allocation3 + $0x59] sm:$0xff] %vm1572_vm0, %v2137_v41  ;;  %v2306_v63 = vpack.c.bf16 %v2292_v26, %v2292_v26 }
 0x249   : > { %v1990_v36 = vadd.f32 %v4899_v56, %v1968_v54 }
 0x24a   : > { %v2510_v43 = vunpack.c.l.b16 %v2306_v63 }
 0x24b   : > { %vm2011_vm10 = vcmp.ge.f32.partialorder %v1990_v36, 0.0  ;;  %v2033_v45 = vmul.f32 %v4907_v50, %v1990_v36 }
 0x24c   : > { %v1867_v10 = vpop.f32.mrf.mxu0  ;;  %v2517_v15 = vpack.c.b16 %v2510_v43, %v2509_v14  ;;  %v3579_v14 = vld [vmem:[%s5413_s3 + $0x38] sm:$0xff] }
 0x24d   : > { %v2054_v33 = vsel %vm2011_vm10, %v1990_v36, %v2033_v45  ;;  %v1931_v28 = vadd.f32 %v4901_v53, %v1867_v10  ;;  %v2320_v53 = vld [vmem:[#allocation3 + $0x45] ss:$2 sm:$0xff]  ;;  %2843 = vmatpush.bf16.msra.mxu2 %v3579_v14  ;;  %vm2151_vm10 = vcmask 258048  }
 0x24e   : > { %v2138_v27 = vmul.f32 %v4132_v1, %v2054_v33  ;;  %2523 = vrot.lane.b32.xlu0 %v2517_v15, %s3718_s17  ;;  %v2335_v24 = vpack.c.bf16 %v2320_v53, %v2320_v53  ;;  %2152 = vst.msk [vmem:[#allocation3 + $0xb3] sm:$0x1f] %vm2151_vm10, %v3725_v39 }
 0x24f   : > { %v1969_v40 = vmul.f32 %v4893_v6, %v1931_v28  ;;  %v2212_v49 = vld [vmem:[#allocation3 + $0x51] ss:$2 sm:$0xff]  ;;  %v2239_v44 = vld [vmem:[#allocation3 + $0x52] ss:$2 sm:$0xff]  ;;  %v2095_v28 = vrot.slane %v4066_v62, 2 }
 0x250   : > { %2165 = vst.msk [vmem:[#allocation3 + $0x61] sm:$0xff] %vm1572_vm0, %v2138_v27  ;;  %v2224_v52 = vpack.c.bf16 %v2212_v49, %v2212_v49  ;;  %v2559_v4 = vunpack.c.l.b16 %v2335_v24  ;;  %v2251_v30 = vpack.c.bf16 %v2239_v44, %v2239_v44  ;;  %v3572_v49 = vld [vmem:[%s5413_s3] sm:$0xff]  ;;  %v3587_v44 = vld [vmem:[%s5413_s3 + $0x78] sm:$0xff] }
 0x251   : > { %v1991_v35 = vadd.f32 %v4899_v56, %v1969_v40  ;;  %2844 = vmatpush.bf16.msra.mxu2 %v3578_v55  ;;  %2874 = vmatpush.bf16.msra.mxu3 %v3587_v44 }
 0x252   : > { %v2406_v9 = vunpack.c.l.b16 %v2224_v52  ;;  %v2439_v21 = vunpack.c.l.b16 %v2251_v30 }
 0x253   : > { %vm2012_vm13 = vcmp.ge.f32.partialorder %v1991_v35, 0.0  ;;  %v2034_v1 = vmul.f32 %v4907_v50, %v1991_v35 }
 0x254   : > { %v2412_v57 = vpack.c.b16 %v2406_v9, %v2405_v19  ;;  %v2445_v26 = vpack.c.b16 %v2439_v21, %v5031_v7  ;;  %v3574_v7 = vld [vmem:[%s5413_s3 + $0x10] sm:$0xff] }
 0x255   : > { %v2055_v5 = vsel %vm2012_vm13, %v1991_v35, %v2034_v1  ;;  %2845 = vmatpush.bf16.msra.mxu2 %v3577_v58  ;;  %v2175_v58 = vld [vmem:[#allocation3] ss:$2 sm:$0xff]  ;;  %vm3095_vm13 = vcmask 257024  }
 0x256   : > { %v2139_v13 = vmul.f32 %v4137_v46, %v2055_v5  ;;  %2419 = vrot.lane.b32.xlu0 %v2412_v57, %s3718_s17 }
 0x257   : > { %v2322_v31 = vld [vmem:[#allocation3 + $0x55] ss:$2 sm:$0xff]  ;;  %v2294_v29 = vld [vmem:[#allocation3 + $0x54] ss:$2 sm:$0xff] }
 0x258   : > { %2166 = vst.msk [vmem:[#allocation3 + $0x69] sm:$0xff] %vm1572_vm0, %v2139_v13  ;;  %v2336_v48 = vpack.c.bf16 %v2322_v31, %v2322_v31  ;;  %v2307_v38 = vpack.c.bf16 %v2294_v29, %v2294_v29  ;;  %v2177_v31 = vld [vmem:[#allocation3 + $0x10] ss:$2 sm:$0xff]  ;;  %v2097_v29 = vrot.slane %v4219_v12, 2 }
 0x259   : > { %2846 = vmatpush.bf16.msra.mxu2 %v3576_v18 }
 0x25a   : > { %v2560_v25 = vunpack.c.l.b16 %v2336_v48  ;;  %v2511_v34 = vunpack.c.l.b16 %v2307_v38 }
 0x25c   : > { %v2567_v51 = vpack.c.b16 %v2560_v25, %v2559_v4  ;;  %v2534_v46 = vpack.c.b16 %v2511_v34, %v2510_v43  ;;  %v2193_v4 = vpack.c.bf16 %v2177_v31, %v2177_v31  ;;  %v3586_v25 = vld [vmem:[%s5413_s3 + $0x70] sm:$0xff]  ;;  %v5446_v31 = vld [vmem:[#allocation4_spill] sm:$0xff] }
 0x25d   : > { %2875 = vmatpush.bf16.msra.mxu3 %v3586_v25 }
 0x25e   : > { %2573 = vrot.lane.b32.xlu2 %v2567_v51, %s3721_s20  ;;  %2540 = vrot.lane.b32.xlu1 %v2534_v46, %s3723_s22  ;;  %v1870_v22 = vpop.f32.mrf.mxu0  ;;  %v2098_v51 = vsel %vm1356_vm3, %v2095_v28, %v2097_v29 }
 0x25f   : > { %v1934_v3 = vadd.f32 %v4915_v32, %v1870_v22  ;;  %v2241_v16 = vld [vmem:[#allocation3 + $0x62] ss:$2 sm:$0xff]  ;;  %v3575_v32 = vld [vmem:[%s5413_s3 + $0x18] sm:$0xff]  ;;  %v2214_v9 = vld [vmem:[#allocation3 + $0x61] ss:$2 sm:$0xff]  ;;  %v2379_v22 = vunpack.c.l.b16 %v2193_v4 }
 0x260   : > { %v2252_v37 = vpack.c.bf16 %v2241_v16, %v2241_v16  ;;  %2847 = vmatpush.bf16.msra.mxu2 %v3575_v32  ;;  %v2225_v60 = vpack.c.bf16 %v2214_v9, %v2214_v9  ;;  %v3585_v16 = vld [vmem:[%s5413_s3 + $0x68] sm:$0xff] }
 0x261   : > { %v1970_v61 = vmul.f32 %v4893_v6, %v1934_v3  ;;  %2876 = vmatpush.bf16.msra.mxu3 %v3585_v16 }
 0x262   : > { %v5072_v41 = vunpack.c.l.b16 %v2252_v37  ;;  %v2407_v13 = vunpack.c.l.b16 %v2225_v60 }
 0x263   : > { %v1992_v54 = vadd.f32 %v4899_v56, %v1970_v61 }
 0x264   : > { %v2462_v63 = vpack.c.b16 %v5072_v41, %v2439_v21  ;;  %2848 = vmatpush.bf16.msra.mxu2 %v3574_v7 }
 0x265   : > { %vm2013_vm7 = vcmp.ge.f32.partialorder %v1992_v54, 0.0  ;;  %v2035_v36 = vmul.f32 %v4907_v50, %v1992_v54 }
 0x266   : > { %2452 = vrot.lane.b32.xlu1 %v2445_v26, %s3723_s22  ;;  %2469 = vrot.lane.b32.xlu2 %v2462_v63, %s3721_s20  ;;  %v1872_v43 = vpop.f32.mrf.mxu0 }
 0x267   : > { %v2056_v45 = vsel %vm2013_vm7, %v1992_v54, %v2035_v36  ;;  %v1936_v42 = vadd.f32 %v4929_v23, %v1872_v43  ;;  %v3573_v23 = vld [vmem:[%s5413_s3 + $0x8] sm:$0xff]  ;;  %v3584_v36 = vld [vmem:[%s5413_s3 + $0x60] sm:$0xff]  ;;  %v5445_v43 = vrot.slane %v4588_v59, 2  ;;  %v3583_v59 = vld [vmem:[%s5413_s3 + $0x58] sm:$0xff]  ;;  %vm3104_vm7 = vcmask 1043456  }
 0x268   : > { %v2140_v10 = vmul.f32 %v4201_v20, %v2056_v45  ;;  %v2096_v20 = vsel %vm1356_vm3, %v5444_v47, %v2095_v28  ;;  %2849 = vmatpush.bf16.msra.mxu2 %v3573_v23  ;;  %2877 = vmatpush.bf16.msra.mxu3 %v3584_v36 }
 0x269   : > { %v1971_v15 = vmul.f32 %v4893_v6, %v1936_v42  ;;  %v2100_v45 = vsel %vm1356_vm3, %v2097_v29, %v5445_v43 }
 0x26a   : > { %2167 = vst.msk [vmem:[#allocation3 + $0x71] sm:$0xff] %vm1572_vm0, %v2140_v10 }
 0x26b   : > { %v1993_v33 = vadd.f32 %v4899_v56, %v1971_v15 }
 0x26c   : > { %2850 = vmatpush.bf16.msra.mxu2 %v3572_v49  ;;  %2878 = vmatpush.bf16.msra.mxu3 %v3583_v59 }
 0x26d   : > { %vm2014_vm8 = vcmp.ge.f32.partialorder %v1993_v33, 0.0  ;;  %v2036_v27 = vmul.f32 %v4907_v50, %v1993_v33 }
 0x26f   : > { %v2057_v40 = vsel %vm2014_vm8, %v1993_v33, %v2036_v27  ;;  %vm3122_vm8 = vcmask 261126  }
 0x270   : > { %v2141_v52 = vmul.f32 %v2096_v20, %v2057_v40 }
 0x271   : > { %v2296_v35 = vld [vmem:[#allocation3 + $0x64] ss:$2 sm:$0xff]  ;;  %v2324_v63 = vld [vmem:[#allocation3 + $0x65] ss:$2 sm:$0xff] }
 0x272   : > { %2168 = vst.msk [vmem:[#allocation3 + $0x79] sm:$0xff] %vm1572_vm0, %v2141_v52  ;;  %v2308_v62 = vpack.c.bf16 %v2296_v35, %v2296_v35  ;;  %v2337_v23 = vpack.c.bf16 %v2324_v63, %v2324_v63  ;;  %v2261_v63 = vld [vmem:[#allocation3 + $0x23] ss:$2 sm:$0xff] }
 0x274   : > { %v5103_v19 = vunpack.c.l.b16 %v2308_v62  ;;  %v2561_v62 = vunpack.c.l.b16 %v2337_v23  ;;  %v2179_v23 = vld [vmem:[#allocation3 + $0x20] ss:$2 sm:$0xff] }
 0x276   : > { %v2518_v14 = vpack.c.b16 %v5103_v19, %v2511_v34  ;;  %v2192_v34 = vpack.c.bf16 %v2175_v58, %v2175_v58 }
 0x278   : > { %2525 = vrot.lane.b32.xlu0 %v2518_v14, %s3718_s17  ;;  %v2378_v21 = vunpack.c.l.b16 %v2192_v34 }
 0x279   : > { %v2216_v53 = vld [vmem:[#allocation3 + $0x71] ss:$2 sm:$0xff]  ;;  %v2243_v35 = vld [vmem:[#allocation3 + $0x72] ss:$2 sm:$0xff] }
 0x27a   : > { %v1875_v1 = vpop.f32.mrf.mxu0  ;;  %v2226_v55 = vpack.c.bf16 %v2216_v53, %v2216_v53  ;;  %v2387_v61 = vpack.c.b16 %v2379_v22, %v2378_v21  ;;  %v2253_v60 = vpack.c.bf16 %v2243_v35, %v2243_v35 }
 0x27b   : > { %v1939_v57 = vadd.f32 %v4941_v17, %v1875_v1  ;;  %v3582_v1 = vld [vmem:[%s5413_s3 + $0x50] sm:$0xff] }
 0x27c   : > { %v2408_v24 = vunpack.c.l.b16 %v2226_v55  ;;  %2879 = vmatpush.bf16.msra.mxu3 %v3582_v1  ;;  %v2441_v44 = vunpack.c.l.b16 %v2253_v60 }
 0x27d   : > { %v1972_v5 = vmul.f32 %v4893_v6, %v1939_v57 }
 0x27e   : > { %v2413_v38 = vpack.c.b16 %v2408_v24, %v2407_v13 }
 0x27f   : > { %v1994_v48 = vadd.f32 %v4899_v56, %v1972_v5 }
 0x280   : > { %2421 = vrot.lane.b32.xlu0 %v2413_v38, %s3718_s17  ;;  %v2466_v42 = vpop.permute.xlu2 %2465  ;;  %v3581_v38 = vld [vmem:[%s5413_s3 + $0x48] sm:$0xff] }
 0x281   : > { %vm2015_vm5 = vcmp.ge.f32.partialorder %v1994_v48, 0.0  ;;  %v2037_v17 = vmul.f32 %v4907_v50, %v1994_v48  ;;  %2880 = vmatpush.bf16.msra.mxu3 %v3581_v38 }
 0x282   : > { %v1877_v12 = vpop.f32.mrf.mxu0 }
 0x283   : > { %v2058_v46 = vsel %vm2015_vm5, %v1994_v48, %v2037_v17  ;;  %v1941_v30 = vadd.f32 %v4958_v0, %v1877_v12  ;;  %v3580_v17 = vld [vmem:[%s5413_s3 + $0x40] sm:$0xff]  ;;  %v2446_v12 = vpack.c.b16 %v2441_v44, %v5072_v41 }
 0x284   : > { %v2142_v18 = vmul.f32 %v2098_v51, %v2058_v46 }
 0x285   : > { %v1973_v3 = vmul.f32 %v4893_v6, %v1941_v30  ;;  %v5447_v30 = vld [vmem:[#allocation6_spill] sm:$0xff]  ;;  %2881 = vmatpush.bf16.msra.mxu3 %v3580_v17 }
 0x286   : > { %2169 = vst.msk [vmem:[#allocation3 + $0x81] sm:$0xff] %vm1572_vm0, %v2142_v18 }
 0x287   : > { %v1995_v37 = vadd.f32 %v4899_v56, %v1973_v3 }
 0x288   : > { %v2449_v26 = vpop.permute.xlu1 %2448  ;;  %v2416_v0 = vpop.permute.xlu0 %2415 }
 0x289   : > { %vm2016_vm15 = vcmp.ge.f32.partialorder %v1995_v37, 0.0  ;;  %v2038_v54 = vmul.f32 %v4907_v50, %v1995_v37  ;;  %v2606_v32 = vsel %vm1572_vm0, %v2387_v61, %v2416_v0 }
 0x28a   : > { %v2620_v15 = vsel %vm1618_vm1, %v2606_v32, %v2449_v26 }
 0x28b   : > { %v2059_v7 = vsel %vm2016_vm15, %v1995_v37, %v2038_v54  ;;  %v1880_v10 = vpop.f32.mrf.mxu0  ;;  %v2630_v27 = vsel %vm1664_vm4, %v2620_v15, %v2466_v42  ;;  %v2277_v42 = vpack.c.bf16 %v2261_v63, %v2261_v63  ;;  %v2185_v63 = vld [vmem:[#allocation3 + $0x50] ss:$2 sm:$0xff]  ;;  %vm3124_vm15 = vcmask 259072  }
 0x28c   : > { %v2143_v33 = vmul.f32 %v2100_v45, %v2059_v7  ;;  %v1944_v28 = vadd.f32 %v4969_v8, %v1880_v10  ;;  %2851 = vmatmul.bf16.vlgmr.msra.gmra.mxu2 %v2630_v27 }
 0x28d   : > { %v2326_v47 = vld [vmem:[#allocation3 + $0x75] ss:$2 sm:$0xff]  ;;  %v2298_v20 = vld [vmem:[#allocation3 + $0x74] ss:$2 sm:$0xff]  ;;  %v2485_v10 = vunpack.c.l.b16 %v2277_v42 }
 0x28e   : > { %2170 = vst.msk [vmem:[#allocation3 + $0x89] sm:$0xff] %vm1572_vm0, %v2143_v33  ;;  %v1974_v40 = vmul.f32 %v4893_v6, %v1944_v28  ;;  %v2338_v49 = vpack.c.bf16 %v2326_v47, %v2326_v47  ;;  %v2309_v52 = vpack.c.bf16 %v2298_v20, %v2298_v20  ;;  %v2181_v28 = vld [vmem:[#allocation3 + $0x30] ss:$2 sm:$0xff] }
 0x28f   : > { %v2195_v59 = vpack.c.bf16 %v2181_v28, %v2181_v28 }
 0x290   : > { %v1996_v8 = vadd.f32 %v4899_v56, %v1974_v40  ;;  %v2562_v9 = vunpack.c.l.b16 %v2338_v49  ;;  %v2513_v14 = vunpack.c.l.b16 %v2309_v52 }
 0x292   : > { %vm2017_vm2 = vcmp.ge.f32.partialorder %v1996_v8, 0.0  ;;  %v2039_v53 = vmul.f32 %v4907_v50, %v1996_v8  ;;  %v2568_v57 = vpack.c.b16 %v2562_v9, %v2561_v62  ;;  %v2535_v55 = vpack.c.b16 %v2513_v14, %v5103_v19 }
 0x293   : > { %v1882_v5 = vpop.f32.mrf.mxu0  ;;  %v2194_v9 = vpack.c.bf16 %v2179_v23, %v2179_v23 }
 0x294   : > { %v2060_v13 = vsel %vm2017_vm2, %v1996_v8, %v2039_v53  ;;  %v1946_v24 = vadd.f32 %v4982_v2, %v1882_v5  ;;  %2575 = vrot.lane.b32.xlu2 %v2568_v57, %s3721_s20  ;;  %2542 = vrot.lane.b32.xlu1 %v2535_v55, %s3723_s22  ;;  %v2381_v5 = vunpack.c.l.b16 %v2195_v59  ;;  %vm3133_vm2 = vcmask 1041408  }
 0x295   : > { %v2144_v29 = vmul.f32 %v5446_v31, %v2060_v13  ;;  %v2245_v48 = vld [vmem:[#allocation3 + $0x82] ss:$2 sm:$0xff]  ;;  %v2218_v41 = vld [vmem:[#allocation3 + $0x81] ss:$2 sm:$0xff]  ;;  %v2380_v38 = vunpack.c.l.b16 %v2194_v9 }
 0x296   : > { %v1975_v58 = vmul.f32 %v4893_v6, %v1946_v24  ;;  %v2254_v19 = vpack.c.bf16 %v2245_v48, %v2245_v48  ;;  %v2227_v0 = vpack.c.bf16 %v2218_v41, %v2218_v41 }
 0x297   : > { %2171 = vst.msk [vmem:[#allocation3 + $0x91] sm:$0xff] %vm1572_vm0, %v2144_v29 }
 0x298   : > { %v1997_v2 = vadd.f32 %v4899_v56, %v1975_v58  ;;  %v5159_v4 = vunpack.c.l.b16 %v2254_v19  ;;  %v2409_v7 = vunpack.c.l.b16 %v2227_v0  ;;  %v2572_v52 = vpop.permute.xlu2 %2571  ;;  %v2313_v19 = vld [vmem:[#allocation3 + $0xa4] ss:$2 sm:$0xff] }
 0x29a   : > { %vm2018_vm12 = vcmp.ge.f32.partialorder %v1997_v2, 0.0  ;;  %v2040_v25 = vmul.f32 %v4907_v50, %v1997_v2  ;;  %v2463_v34 = vpack.c.b16 %v5159_v4, %v2441_v44  ;;  %v2414_v15 = vpack.c.b16 %v2409_v7, %v2409_v7 }
 0x29b   : > { %v2388_v44 = vpack.c.b16 %v2381_v5, %v2380_v38 }
 0x29c   : > { %v2061_v51 = vsel %vm2018_vm12, %v1997_v2, %v2040_v25  ;;  %2454 = vrot.lane.b32.xlu1 %v2446_v12, %s3723_s22  ;;  %2471 = vrot.lane.b32.xlu2 %v2463_v34, %s3721_s20  ;;  %v1885_v46 = vpop.f32.mrf.mxu0 }
 0x29d   : > { %v2145_v18 = vmul.f32 %v5447_v30, %v2061_v51  ;;  %v1949_v22 = vadd.f32 %v4994_v11, %v1885_v46  ;;  %v5448_v11 = vld [vmem:[#allocation5_spill] sm:$0xff]  ;;  %v2314_v51 = vpack.c.bf16 %v2313_v19, %v2313_v19 }
 0x29e   : > { %v2300_v3 = vld [vmem:[#allocation3 + $0x84] ss:$2 sm:$0xff]  ;;  %v5449_v43 = vrot.slane %v5448_v11, 2 }
 0x29f   : > { %2172 = vst.msk [vmem:[#allocation3 + $0x99] sm:$0xff] %vm1572_vm0, %v2145_v18  ;;  %v1976_v16 = vmul.f32 %v4893_v6, %v1949_v22  ;;  %v2310_v21 = vpack.c.bf16 %v2300_v3, %v2300_v3  ;;  %v2259_v6 = vld [vmem:[#allocation3 + $0x13] ss:$2 sm:$0xff]  ;;  %v2447_v18 = vpack.c.b16 %v5159_v4, %v5159_v4  ;;  %v2532_v22 = vunpack.c.l.b16 %v2314_v51  ;;  %v3589_v11 = vld [vmem:[%s5413_s3 + $0x88] sm:$0xff] }
 0x2a0   : > { %v2522_v33 = vpop.permute.xlu0 %2521  ;;  %v2468_v12 = vpop.permute.xlu2 %2467  ;;  %2911 = vmatpush.bf16.msrb.mxu2 %v3589_v11 }
 0x2a1   : > { %v1998_v37 = vadd.f32 %v4899_v56, %v1976_v16  ;;  %v2514_v61 = vunpack.c.l.b16 %v2310_v21  ;;  %v2276_v56 = vpack.c.bf16 %v2259_v6, %v2259_v6  ;;  %v2537_v3 = vpack.c.b16 %v2532_v22, %v2532_v22  ;;  %v2265_v16 = vld [vmem:[#allocation3 + $0x43] ss:$2 sm:$0xff]  ;;  %v2271_v22 = vld [vmem:[#allocation3 + $0x73] ss:$2 sm:$0xff] }
 0x2a2   : > { %v2332_v21 = vld [vmem:[#allocation3 + $0xa5] ss:$2 sm:$0xff] }
 0x2a3   : > { %vm2019_vm6 = vcmp.ge.f32.partialorder %v1998_v37, 0.0  ;;  %v2041_v54 = vmul.f32 %v4907_v50, %v1998_v37  ;;  %v2519_v26 = vpack.c.b16 %v2514_v61, %v2513_v14  ;;  %v2328_v50 = vld [vmem:[#allocation3 + $0x85] ss:$2 sm:$0xff]  ;;  %v2484_v27 = vunpack.c.l.b16 %v2276_v56 }
 0x2a4   : > { %v1887_v36 = vpop.f32.mrf.mxu0  ;;  %v2339_v47 = vpack.c.bf16 %v2328_v50, %v2328_v50  ;;  %v2341_v41 = vpack.c.bf16 %v2332_v21, %v2332_v21 }
 0x2a5   : > { %v2062_v32 = vsel %vm2019_vm6, %v1998_v37, %v2041_v54  ;;  %2527 = vrot.lane.b32.xlu0 %v2519_v26, %s3718_s17  ;;  %v2493_v20 = vpack.c.b16 %v2485_v10, %v2484_v27  ;;  %v2263_v37 = vld [vmem:[#allocation3 + $0x33] ss:$2 sm:$0xff] }
 0x2a6   : > { %v2146_v45 = vmul.f32 %v5449_v43, %v2062_v32  ;;  %v2256_v60 = vld [vmem:[#allocation3 + $0x92] ss:$2 sm:$0xff]  ;;  %v2563_v53 = vunpack.c.l.b16 %v2339_v47  ;;  %v2565_v54 = vunpack.c.l.b16 %v2341_v41  ;;  %v2278_v26 = vpack.c.bf16 %v2263_v37, %v2263_v37 }
 0x2a7   : > { %v2646_v62 = vsel %vm1572_vm0, %v2493_v20, %v2522_v33  ;;  %v2257_v48 = vpack.c.bf16 %v2256_v60, %v2256_v60  ;;  %v2183_v32 = vld [vmem:[#allocation3 + $0x40] ss:$2 sm:$0xff] }
 0x2a8   : > { %2174 = vst.msk [vmem:[#allocation3 + $0xa1] sm:$0x3] %vm2173_vm9, %v2146_v45  ;;  %v2418_v58 = vpop.permute.xlu0 %2417  ;;  %v2570_v0 = vpack.c.b16 %v2565_v54, %v2565_v54  ;;  %v2486_v36 = vunpack.c.l.b16 %v2278_v26  ;;  %v2197_v45 = vpack.c.bf16 %v2185_v63, %v2185_v63  ;;  %v2196_v7 = vpack.c.bf16 %v2183_v32, %v2183_v32  ;;  %v3590_v27 = vld [vmem:[%s5415_s5] sm:$0xff] }
 0x2a9   : > { %v2459_v2 = vunpack.c.l.b16 %v2257_v48  ;;  %v2609_v17 = vsel %vm1572_vm0, %v2388_v44, %v2418_v58  ;;  %3009 = vmatpush.bf16.msrb.mxu3 %v3590_v27  ;;  %v2191_v37 = vld [vmem:[#allocation3 + $0x80] ss:$2 sm:$0xff] }
 0x2aa   : > { %v2382_v33 = vunpack.c.l.b16 %v2196_v7  ;;  %v2345_v27 = vld [vmem:[#allocation3 + $0x36] ss:$2 sm:$0xff] }
 0x2ab   : > { %v2464_v30 = vpack.c.b16 %v2459_v2, %v2459_v2 }
 0x2ad   : > { %2423 = vrot.lane.b32.xlu0 %v2414_v15, %s3718_s17  ;;  %v2383_v15 = vunpack.c.l.b16 %v2197_v45 }
 0x2af   : > { %v2330_v40 = vld [vmem:[#allocation3 + $0x95] ss:$2 sm:$0xff]  ;;  %v2302_v49 = vld [vmem:[#allocation3 + $0x94] ss:$2 sm:$0xff]  ;;  %v2389_v23 = vpack.c.b16 %v2383_v15, %v2382_v33 }
 0x2b0   : > { %v2340_v35 = vpack.c.bf16 %v2330_v40, %v2330_v40  ;;  %v2311_v8 = vpack.c.bf16 %v2302_v49, %v2302_v49  ;;  %v2539_v14 = vpop.permute.xlu1 %2538 }
 0x2b1   : > { %v2660_v1 = vsel %vm1618_vm1, %v2646_v62, %v2539_v14 }
 0x2b2   : > { %v2564_v57 = vunpack.c.l.b16 %v2340_v35  ;;  %v2515_v55 = vunpack.c.l.b16 %v2311_v8  ;;  %v2670_v13 = vsel %vm1664_vm4, %v2660_v1, %v2572_v52  ;;  %v3588_v52 = vld [vmem:[%s5413_s3 + $0x80] sm:$0xff] }
 0x2b3   : > { %2882 = vmatmul.bf16.vlgmr.msra.gmra.mxu3 %v2670_v13  ;;  %v2269_v35 = vld [vmem:[#allocation3 + $0x63] ss:$2 sm:$0xff]  ;;  %2912 = vmatpush.bf16.msrb.mxu2 %v3588_v52  ;;  %v2267_v8 = vld [vmem:[#allocation3 + $0x53] ss:$2 sm:$0xff]  ;;  %v2189_v1 = vld [vmem:[#allocation3 + $0x70] ss:$2 sm:$0xff] }
 0x2b4   : > { %v2569_v24 = vpack.c.b16 %v2564_v57, %v2563_v53  ;;  %v2536_v31 = vpack.c.b16 %v2515_v55, %v2514_v61  ;;  %v2520_v29 = vpack.c.b16 %v2515_v55, %v2515_v55  ;;  %v2279_v61 = vpack.c.bf16 %v2265_v16, %v2265_v16  ;;  %v2187_v57 = vld [vmem:[#allocation3 + $0x60] ss:$2 sm:$0xff] }
 0x2b5   : > { %v2281_v62 = vpack.c.bf16 %v2269_v35, %v2269_v35  ;;  %v2280_v9 = vpack.c.bf16 %v2267_v8, %v2267_v8  ;;  %v2199_v5 = vpack.c.bf16 %v2189_v1, %v2189_v1  ;;  %v2282_v16 = vpack.c.bf16 %v2271_v22, %v2271_v22 }
 0x2b6   : > { %2577 = vrot.lane.b32.xlu2 %v2569_v24, %s3721_s20  ;;  %2544 = vrot.lane.b32.xlu1 %v2536_v31, %s3723_s22  ;;  %v2487_v4 = vunpack.c.l.b16 %v2279_v61  ;;  %v2198_v31 = vpack.c.bf16 %v2187_v57, %v2187_v57  ;;  %v2361_v35 = vpack.c.bf16 %v2345_v27, %v2345_v27  ;;  %v3522_v57 = vld [vmem:[%s3844_s23 + $0x34] ss:$2 sm:$0xff] }
 0x2b7   : > { %2529 = vrot.lane.b32.xlu0 %v2520_v29, %s3718_s17  ;;  %v2489_v14 = vunpack.c.l.b16 %v2281_v62  ;;  %v2488_v53 = vunpack.c.l.b16 %v2280_v9  ;;  %v2385_v38 = vunpack.c.l.b16 %v2199_v5  ;;  %v2490_v61 = vunpack.c.l.b16 %v2282_v16 }
 0x2b8   : > { %v2451_v25 = vpop.permute.xlu1 %2450  ;;  %v2494_v43 = vpack.c.b16 %v2487_v4, %v2486_v36  ;;  %v2574_v6 = vpop.permute.xlu2 %2573  ;;  %v2384_v44 = vunpack.c.l.b16 %v2198_v31  ;;  %v2591_v9 = vunpack.c.l.b16 %v2361_v35 }
 0x2b9   : > { %v2622_v34 = vsel %vm1618_vm1, %v2609_v17, %v2451_v25  ;;  %v2495_v55 = vpack.c.b16 %v2489_v14, %v2488_v53  ;;  %v3521_v53 = vld [vmem:[%s3844_s23 + $0x24] ss:$2 sm:$0xff] }
 0x2ba   : > { %v2633_v46 = vsel %vm1664_vm4, %v2622_v34, %v2468_v12  ;;  %v2390_v2 = vpack.c.b16 %v2385_v38, %v2384_v44  ;;  %v2974_v5 = vpack.c.bf16 %v3522_v57, %v3521_v53  ;;  %v3524_v44 = vld [vmem:[%s3844_s23 + $0x54] ss:$2 sm:$0xff]  ;;  %v5274_v57 = vld [vmem:[%s5414_s4 + $0x6] ss:$0 sm:$0xff] }
 0x2bb   : > { %2855 = vmatmul.bf16.gmra.mxu2 %v2633_v46 }
 0x2be   : > { %2473 = vrot.lane.b32.xlu2 %v2464_v30, %s3721_s20  ;;  %2456 = vrot.lane.b32.xlu1 %v2447_v18, %s3723_s22  ;;  %v2273_v18 = vld [vmem:[#allocation3 + $0x83] ss:$2 sm:$0xff] }
 0x2c0   : > { %v2524_v39 = vpop.permute.xlu0 %2523  ;;  %v2470_v59 = vpop.permute.xlu2 %2469 }
 0x2c1   : > { %v2649_v42 = vsel %vm1572_vm0, %v2494_v43, %v2524_v39  ;;  %v2275_v43 = vld [vmem:[#allocation3 + $0x93] ss:$2 sm:$0xff] }
 0x2c6   : > { %2546 = vrot.lane.b32.xlu1 %v2537_v3, %s3723_s22  ;;  %2579 = vrot.lane.b32.xlu2 %v2570_v0, %s3721_s20  ;;  %v2283_v3 = vpack.c.bf16 %v2273_v18, %v2273_v18  ;;  %v2200_v0 = vpack.c.bf16 %v2191_v37, %v2191_v37  ;;  %v3526_v37 = vld [vmem:[%s3844_s23 + $0x74] ss:$2 sm:$0xff] }
 0x2c8   : > { %v2420_v28 = vpop.permute.xlu0 %2419  ;;  %v2491_v41 = vunpack.c.l.b16 %v2283_v3  ;;  %v2386_v36 = vunpack.c.l.b16 %v2200_v0 }
 0x2c9   : > { %v2612_v47 = vsel %vm1572_vm0, %v2389_v23, %v2420_v28 }
 0x2ca   : > { %v2496_v26 = vpack.c.b16 %v2491_v41, %v2490_v61  ;;  %v2391_v45 = vpack.c.b16 %v2386_v36, %v2386_v36  ;;  %v3525_v41 = vld [vmem:[%s3844_s23 + $0x64] ss:$2 sm:$0xff] }
 0x2cb   : > { %v2357_v61 = vld [vmem:[#allocation3 + $0x96] ss:$2 sm:$0xff] }
 0x2cc   : > { %v2367_v0 = vpack.c.bf16 %v2357_v61, %v2357_v61 }
 0x2d0   : > { %v2541_v56 = vpop.permute.xlu1 %2540 }
 0x2d1   : > { %v2662_v10 = vsel %vm1618_vm1, %v2649_v42, %v2541_v56 }
 0x2d2   : > { %v2673_v50 = vsel %vm1664_vm4, %v2662_v10, %v2574_v6  ;;  %v2284_v6 = vpack.c.bf16 %v2275_v43, %v2275_v43  ;;  %v2359_v43 = vld [vmem:[#allocation3 + $0xa6] ss:$2 sm:$0xff] }
 0x2d3   : > { %2886 = vmatmul.bf16.gmra.mxu3 %v2673_v50 }
 0x2d4   : > { %v2492_v15 = vunpack.c.l.b16 %v2284_v6  ;;  %v2368_v6 = vpack.c.bf16 %v2359_v43, %v2359_v43 }
 0x2d6   : > { %v2497_v28 = vpack.c.b16 %v2492_v15, %v2492_v15 }
 0x2d8   : > { %v2453_v20 = vpop.permute.xlu1 %2452 }
 0x2d9   : > { %v2624_v40 = vsel %vm1618_vm1, %v2612_v47, %v2453_v20 }
 0x2da   : > { %v2636_v49 = vsel %vm1664_vm4, %v2624_v40, %v2470_v59 }
 0x2db   : > { %2860 = vmatmul.bf16.gmra.mxu2 %v2636_v49  ;;  %v2343_v49 = vld [vmem:[#allocation3 + $0x26] ss:$2 sm:$0xff] }
 0x2dc   : > { %v2360_v62 = vpack.c.bf16 %v2343_v49, %v2343_v49 }
 0x2ea   : > { %v2526_v60 = vpop.permute.xlu0 %2525 }
 0x2eb   : > { %v2652_v24 = vsel %vm1572_vm0, %v2495_v55, %v2526_v60  ;;  %v2590_v60 = vunpack.c.l.b16 %v2360_v62  ;;  %v2349_v55 = vld [vmem:[#allocation3 + $0x56] ss:$2 sm:$0xff] }
 0x2ed   : > { %v2599_v1 = vpack.c.b16 %v2591_v9, %v2590_v60 }
 0x2ee   : > { %v2576_v13 = vpop.permute.xlu2 %2575 }
 0x2f2   : > { %v2422_v19 = vpop.permute.xlu0 %2421 }
 0x2f3   : > { %v2615_v17 = vsel %vm1572_vm0, %v2390_v2, %v2422_v19  ;;  %v2353_v2 = vld [vmem:[#allocation3 + $0x76] ss:$2 sm:$0xff] }
 0x2f6   : > { %v2472_v12 = vpop.permute.xlu2 %2471 }
 0x306   : > { %v2543_v29 = vpop.permute.xlu1 %2542 }
 0x307   : > { %v2664_v48 = vsel %vm1618_vm1, %v2652_v24, %v2543_v29  ;;  %v2363_v24 = vpack.c.bf16 %v2349_v55, %v2349_v55 }
 0x308   : > { %v2676_v58 = vsel %vm1664_vm4, %v2664_v48, %v2576_v13  ;;  %v2347_v13 = vld [vmem:[#allocation3 + $0x46] ss:$2 sm:$0xff] }
 0x309   : > { %2891 = vmatmul.bf16.gmra.mxu3 %v2676_v58  ;;  %v2362_v31 = vpack.c.bf16 %v2347_v13, %v2347_v13  ;;  %v2593_v29 = vunpack.c.l.b16 %v2363_v24  ;;  %v3523_v58 = vld [vmem:[%s3844_s23 + $0x44] ss:$2 sm:$0xff] }
 0x30a   : > { %v5295_v24 = vld [vmem:[%s5414_s4 + $0x8] ss:$0 sm:$0xff] }
 0x30b   : > { %v2592_v48 = vunpack.c.l.b16 %v2362_v31 }
 0x30d   : > { %v2600_v38 = vpack.c.b16 %v2593_v29, %v2592_v48 }
 0x30e   : > { %v2455_v25 = vpop.permute.xlu1 %2454 }
 0x30f   : > { %v2626_v34 = vsel %vm1618_vm1, %v2615_v17, %v2455_v25  ;;  %v2852_v51 = vpop.f32.mrf.mxu2  ;;  %v2975_v25 = vpack.c.bf16 %v3524_v44, %v3523_v58 }
 0x310   : > { %v2639_v46 = vsel %vm1664_vm4, %v2626_v34, %v2472_v12  ;;  %v2578_v54 = vpop.permute.xlu2 %2577  ;;  %v2351_v34 = vld [vmem:[#allocation3 + $0x66] ss:$2 sm:$0xff] }
 0x311   : > { %2865 = vmatmul.bf16.gmra.mxu2 %v2639_v46  ;;  %v2364_v46 = vpack.c.bf16 %v2351_v34, %v2351_v34 }
 0x313   : > { %v2594_v3 = vunpack.c.l.b16 %v2364_v46 }
 0x317   : > { %v2854_v30 = vpop.f32.mrf.mxu2  ;;  %v2528_v21 = vpop.permute.xlu0 %2527 }
 0x318   : > { %v2655_v4 = vsel %vm1572_vm0, %v2496_v26, %v2528_v21  ;;  %v2474_v42 = vpop.permute.xlu2 %2473  ;;  %v2355_v26 = vld [vmem:[#allocation3 + $0x86] ss:$2 sm:$0xff] }
 0x31f   : > { %v2424_v11 = vpop.permute.xlu0 %2423 }
 0x320   : > { %v2618_v7 = vsel %vm1572_vm0, %v2391_v45, %v2424_v11  ;;  %v2580_v47 = vpop.permute.xlu2 %2579  ;;  %v3528_v11 = vld [vmem:[%s3844_s23 + $0x94] ss:$2 sm:$0xff] }
 0x328   : > { %v2545_v39 = vpop.permute.xlu1 %2544 }
 0x329   : > { %v2666_v63 = vsel %vm1618_vm1, %v2655_v4, %v2545_v39  ;;  %v2530_v33 = vpop.permute.xlu0 %2529  ;;  %v2366_v4 = vpack.c.bf16 %v2355_v26, %v2355_v26  ;;  %v2597_v39 = vunpack.c.l.b16 %v2367_v0 }
 0x32a   : > { %v2679_v32 = vsel %vm1664_vm4, %v2666_v63, %v2578_v54  ;;  %v2658_v20 = vsel %vm1572_vm0, %v2497_v28, %v2530_v33  ;;  %v2976_v54 = vpack.c.bf16 %v3526_v37, %v3525_v41 }
 0x32b   : > { %2896 = vmatmul.bf16.gmra.mxu3 %v2679_v32  ;;  %v2596_v63 = vunpack.c.l.b16 %v2366_v4  ;;  %v3527_v32 = vld [vmem:[%s3844_s23 + $0x84] ss:$2 sm:$0xff] }
 0x32c   : > { %v2977_v45 = vpack.c.bf16 %v3528_v11, %v3527_v32 }
 0x32d   : > { %v2602_v36 = vpack.c.b16 %v2597_v39, %v2596_v63 }
 0x330   : > { %v2457_v56 = vpop.permute.xlu1 %2456 }
 0x331   : > { %v2628_v10 = vsel %vm1618_vm1, %v2618_v7, %v2457_v56  ;;  %v3529_v56 = vld [vmem:[%s3844_s23 + $0xa4] ss:$2 sm:$0xff]  ;;  %s5260_s23 = sshll.u32 %s3699_s27, 2 }
 0x332   : > { %v2642_v50 = vsel %vm1664_vm4, %v2628_v10, %v2474_v42  ;;  %v2598_v42 = vunpack.c.l.b16 %v2368_v6  ;;  %v2978_v10 = vpack.c.bf16 %v3529_v56, %v3529_v56  ;;  %p381_p7 = scmp.lt.s32.totalorder %s5260_s23, 7  ;;  %p3052_p8 = scmp.lt.s32.totalorder %s5260_s23, 8 }
 0x333   : > { %2870 = vmatmul.bf16.gmra.mxu2 %v2642_v50  ;;  %s3100_s17 = sadd.s32 2, %s5260_s23  ;;  %s3129_s25 = sadd.s32 3, %s5260_s23 }
 0x334   : > { %v2603_v7 = vpack.c.b16 %v2598_v42, %v2598_v42  ;;  %s382_s19 = scalar_select %p381_p7, %s5260_s23, 7 }
 0x335   : > { %p5352_p10 = scmp.lt.s32.totalorder %s3100_s17, 8  ;;  %p5378_p11 = scmp.lt.s32.totalorder %s3129_s25, 8 }
 0x336   : > { %v2883_v23 = vpop.f32.mrf.mxu3  ;;  %s384_s24 = sadd.s32 %s3355_s21, %s382_s19 }
 0x337   : > { %v5224_v59 = vadd.f32 %v2883_v23, %v2852_v51  ;;  %v2365_v51 = vpack.c.bf16 %v2353_v2, %v2353_v2  ;;  %s3356_s14 = sshll.u32 %s384_s24, 3 }
 0x338   : > { %v2547_v40 = vpop.permute.xlu1 %2546  ;;  %s5280_s20 = scalar_lea.vmem %s5416_s6, %s3356_s14  ;;  %s5301_s13 = scalar_lea.vmem %s5417_s7, %s3356_s14 }
 0x339   : > { %v2668_v52 = vsel %vm1618_vm1, %v2658_v20, %v2547_v40  ;;  %v2595_v30 = vunpack.c.l.b16 %v2365_v51  ;;  %s3060_s21 = scalar_select %p3052_p8, 1, 0  ;;  %vm3066_vm1 = vcmask 261122  }
 0x33a   : > { %v2682_v8 = vsel %vm1664_vm4, %v2668_v52, %v2580_v47  ;;  %s3072_s14 = sadd.s32 1, %s5260_s23  ;;  %vm3093_vm4 = vcmask 261124  }
 0x33b   : > { %2901 = vmatmul.bf16.gmra.mxu3 %v2682_v8  ;;  %v2601_v21 = vpack.c.b16 %v2595_v30, %v2594_v3  ;;  %p5325_p9 = scmp.lt.s32.totalorder %s3072_s14, 8 }
 0x33c   : > { %s3116_s22 = scalar_select %p5352_p10, 1, 0 }
 0x33d   : > { %s3087_s15 = scalar_select %p5325_p9, 1, 0 }
 0x33e   : > { %v2885_v14 = vpop.f32.mrf.mxu3  ;;  %v2856_v19 = vpop.f32.mrf.mxu2  ;;  %s3145_s23 = scalar_select %p5378_p11, 1, 0 }
 0x33f   : > { %v5268_v14 = vld [vmem:[%s5414_s4 + $0x5] ss:$0 sm:$0xff] }
 0x343   : > { %3516 = vmatmul.msk.bf16.vlgmr.msrb.gmra.mxu2 %vm1572_vm0, %v2599_v1 }
 0x346   : > { %v2858_v18 = vpop.f32.mrf.mxu2 }
 0x34b   : > { %3534 = vmatmul.msk.bf16.vlgmr.msrb.gmra.mxu3 %vm1548_vm11, %v2974_v5 }
 0x353   : > { %3517 = vmatmul.msk.bf16.gmra.mxu2 %vm1572_vm0, %v2600_v38 }
 0x356   : > { %v2887_v17 = vpop.f32.mrf.mxu3 }
 0x357   : > { %v5235_v12 = vadd.f32 %v2887_v17, %v2856_v19  ;;  %v3061_v17 = vstv %s3060_s21 }
 0x35b   : > { %3535 = vmatmul.msk.bf16.gmra.mxu3 %vm1548_vm11, %v2975_v25 }
 0x35e   : > { %v2889_v22 = vpop.f32.mrf.mxu3  ;;  %v2861_v15 = vpop.f32.mrf.mxu2 }
 0x35f   : > { %v5238_v16 = vadd.f32 %v2889_v22, %v2858_v18 }
 0x363   : > { %3518 = vmatmul.msk.bf16.gmra.mxu2 %vm1572_vm0, %v2601_v21 }
 0x366   : > { %v2863_v28 = vpop.f32.mrf.mxu2 }
 0x36b   : > { %3536 = vmatmul.msk.bf16.gmra.mxu3 %vm1548_vm11, %v2976_v54 }
 0x373   : > { %3519 = vmatmul.msk.bf16.gmra.mxu2 %vm1572_vm0, %v2602_v36 }
 0x37b   : > { %3537 = vmatmul.msk.bf16.gmra.mxu3 %vm1548_vm11, %v2977_v45 }
 0x383   : > { %3520 = vmatmul.msk.bf16.gmra.mxu2 %vm1572_vm0, %v2603_v7 }
 0x38b   : > { %3538 = vmatmul.msk.bf16.gmra.mxu3 %vm1548_vm11, %v2978_v10  ;;  %vm5306_vm11 = vcmp.eq.s32.totalorder %v3061_v17, 1 }
 0x38c   : > { %v2892_v50 = vpop.f32.mrf.mxu3 }
 0x38d   : > { %v5251_v33 = vadd.f32 %v2892_v50, %v2861_v15 }
 0x394   : > { %v2894_v27 = vpop.f32.mrf.mxu3  ;;  %v2866_v47 = vpop.f32.mrf.mxu2 }
 0x395   : > { %v5253_v23 = vadd.f32 %v2894_v27, %v2863_v28  ;;  %v3088_v28 = vstv %s3087_s15 }
 0x39c   : > { %v2868_v20 = vpop.f32.mrf.mxu2 }
 0x3ae   : > { %v2897_v40 = vpop.f32.mrf.mxu3 }
 0x3af   : > { %v5255_v49 = vadd.f32 %v2897_v40, %v2866_v47 }
 0x3b6   : > { %v2871_v52 = vpop.f32.mrf.mxu2  ;;  %v2899_v35 = vpop.f32.mrf.mxu3 }
 0x3b7   : > { %v5257_v8 = vadd.f32 %v2899_v35, %v2868_v20 }
 0x3be   : > { %v2872_v62 = vpop.f32.mrf.mxu2  ;;  %v2902_v9 = vpop.f32.mrf.mxu3 }
 0x3c6   : > { %v2903_v60 = vpop.f32.mrf.mxu3  ;;  %v2914_v1 = vpop.f32.mrf.mxu2 }
 0x3c7   : > { %v2915_v53 = vadd.f32 %v2914_v1, %v5224_v59  ;;  %v5287_v59 = vld [vmem:[%s5414_s4 + $0x7] ss:$0 sm:$0xff] }
 0x3c9   : > { %v2939_v55 = vmul.f32 %v5268_v14, %v2915_v53 }
 0x3cb   : > { %v2947_v5 = vadd.f32 %v5274_v57, %v2939_v55 }
 0x3cd   : > { %3049 = vst.msk [vmem:[%s5280_s20] sm:$0xff] %vm1572_vm0, %v2947_v5  ;;  %v3053_v13 = vsel %vm1572_vm0, %v2947_v5, 0.0 }
 0x3ce   : > { %v3054_v31 = vrot.slane %v3053_v13, 4  ;;  %v2916_v29 = vpop.f32.mrf.mxu2  ;;  %v3011_v48 = vpop.f32.mrf.mxu3 }
 0x3cf   : > { %v3034_v38 = vmul.f32 %v5287_v59, %v3011_v48 }
 0x3d0   : > { %v3055_v58 = vadd.f32 %v3054_v31, %v3053_v13 }
 0x3d1   : > { %v3042_v44 = vadd.f32 %v5295_v24, %v3034_v38 }
 0x3d2   : > { %v3056_v19 = vrot.slane %v3055_v58, 2 }
 0x3d3   : > { %3050 = vst.msk [vmem:[%s5301_s13] sm:$0xff] %vm1572_vm0, %v3042_v44 }
 0x3d4   : > { %v3057_v2 = vadd.f32 %v3056_v19, %v3055_v58 }
 0x3d6   : > { %v3058_v25 = vrot.slane %v3057_v2, 1  ;;  %v2918_v34 = vpop.f32.mrf.mxu2  ;;  %v3013_v51 = vpop.f32.mrf.mxu3 }
 0x3d7   : > { %v2919_v30 = vadd.f32 %v2918_v34, %v5235_v12  ;;  %v3117_v34 = vstv %s3116_s22 }
 0x3d8   : > { %v3059_v18 = vadd.f32 %v3058_v25, %v3057_v2  ;;  %vm3118_vm5 = vcmp.eq.s32.totalorder %v3117_v34, 1 }
 0x3d9   : > { %v2940_v22 = vmul.f32 %v5268_v14, %v2919_v30 }
 0x3da   : > { %v3063_v3 = vsel %vm5306_vm11, %v3059_v18, 0.0 }
 0x3db   : > { %v2948_v21 = vadd.f32 %v5274_v57, %v2940_v22 }
 0x3dd   : > { %3540 = vst.msk [vmem:[%s5280_s20 + $0x6] sm:$0xfc] %vm3066_vm1, %v2948_v21  ;;  %v3076_v4 = vrot.slane %v2948_v21, 2 }
 0x3de   : > { %v2920_v41 = vpop.f32.mrf.mxu2  ;;  %v3015_v37 = vpop.f32.mrf.mxu3 }
 0x3df   : > { %v2921_v61 = vadd.f32 %v2920_v41, %v5238_v16  ;;  %v3035_v54 = vmul.f32 %v5287_v59, %v3015_v37 }
 0x3e1   : > { %v2941_v26 = vmul.f32 %v5268_v14, %v2921_v61  ;;  %v3043_v12 = vadd.f32 %v5295_v24, %v3035_v54 }
 0x3e3   : > { %v2949_v0 = vadd.f32 %v5274_v57, %v2941_v26  ;;  %3542 = vst.msk [vmem:[%s5301_s13 + $0x6] sm:$0xfc] %vm3066_vm1, %v3043_v12 }
 0x3e5   : > { %3541 = vst.msk [vmem:[%s5280_s20 + $0xe] sm:$0x3] %vm2173_vm9, %v2949_v0  ;;  %v3077_v39 = vrot.slane %v2949_v0, 2 }
 0x3e6   : > { %v2923_v63 = vpop.f32.mrf.mxu2  ;;  %v3017_v36 = vpop.f32.mrf.mxu3 }
 0x3e7   : > { %v3078_v16 = vsel %vm1356_vm3, %v3076_v4, %v3077_v39  ;;  %v2924_v32 = vadd.f32 %v2923_v63, %v5251_v33  ;;  %v3036_v11 = vmul.f32 %v5287_v59, %v3017_v36  ;;  %vm3089_vm3 = vcmp.eq.s32.totalorder %v3088_v28, 1 }
 0x3e8   : > { %v3080_v43 = vsel %vm1572_vm0, %v3078_v16, 0.0 }
 0x3e9   : > { %v3081_v45 = vrot.slane %v3080_v43, 4  ;;  %v2942_v6 = vmul.f32 %v5268_v14, %v2924_v32  ;;  %v3044_v42 = vadd.f32 %v5295_v24, %v3036_v11  ;;  %v3146_v11 = vstv %s3145_s23 }
 0x3ea   : > { %vm3147_vm12 = vcmp.eq.s32.totalorder %v3146_v11, 1 }
 0x3eb   : > { %v3082_v7 = vadd.f32 %v3081_v45, %v3080_v43  ;;  %v2950_v56 = vadd.f32 %v5274_v57, %v2942_v6  ;;  %3543 = vst.msk [vmem:[%s5301_s13 + $0xe] sm:$0x3] %vm2173_vm9, %v3044_v42 }
 0x3ed   : > { %v3083_v10 = vrot.slane %v3082_v7, 2  ;;  %3544 = vst.msk [vmem:[%s5280_s20 + $0xc] sm:$0xf0] %vm3093_vm4, %v2950_v56  ;;  %v3105_v60 = vrot.slane %v2950_v56, 4 }
 0x3ee   : > { %v2925_v15 = vpop.f32.mrf.mxu2  ;;  %v3020_v50 = vpop.f32.mrf.mxu3 }
 0x3ef   : > { %v3084_v33 = vadd.f32 %v3083_v10, %v3082_v7  ;;  %v2926_v27 = vadd.f32 %v2925_v15, %v5253_v23  ;;  %v3037_v47 = vmul.f32 %v5287_v59, %v3020_v50 }
 0x3f1   : > { %v3085_v20 = vrot.slane %v3084_v33, 1  ;;  %v2943_v40 = vmul.f32 %v5268_v14, %v2926_v27  ;;  %v3045_v52 = vadd.f32 %v5295_v24, %v3037_v47 }
 0x3f3   : > { %v3086_v35 = vadd.f32 %v3085_v20, %v3084_v33  ;;  %v2951_v62 = vadd.f32 %v5274_v57, %v2943_v40  ;;  %3546 = vst.msk [vmem:[%s5301_s13 + $0xc] sm:$0xf0] %vm3093_vm4, %v3045_v52 }
 0x3f5   : > { %v3090_v9 = vsel %vm3089_vm3, %v3086_v35, 0.0  ;;  %3545 = vst.msk [vmem:[%s5280_s20 + $0x14] sm:$0xf] %vm3095_vm13, %v2951_v62  ;;  %v3106_v23 = vrot.slane %v2951_v62, 4 }
 0x3f6   : > { %v3091_v1 = vadd.f32 %v3090_v9, %v3063_v3  ;;  %v2928_v53 = vpop.f32.mrf.mxu2  ;;  %v3022_v55 = vpop.f32.mrf.mxu3 }
 0x3f7   : > { %v3107_v5 = vsel %vm3104_vm7, %v3105_v60, %v3106_v23  ;;  %v2929_v13 = vadd.f32 %v2928_v53, %v5255_v49  ;;  %v3038_v31 = vmul.f32 %v5287_v59, %v3022_v55 }
 0x3f8   : > { %v3109_v29 = vsel %vm1572_vm0, %v3107_v5, 0.0 }
 0x3f9   : > { %v3110_v48 = vrot.slane %v3109_v29, 4  ;;  %v2944_v38 = vmul.f32 %v5268_v14, %v2929_v13  ;;  %v3046_v58 = vadd.f32 %v5295_v24, %v3038_v31 }
 0x3fb   : > { %v3111_v44 = vadd.f32 %v3110_v48, %v3109_v29  ;;  %v2952_v19 = vadd.f32 %v5274_v57, %v2944_v38  ;;  %3547 = vst.msk [vmem:[%s5301_s13 + $0x14] sm:$0xf] %vm3095_vm13, %v3046_v58 }
 0x3fd   : > { %v3112_v2 = vrot.slane %v3111_v44, 2  ;;  %3548 = vst.msk [vmem:[%s5280_s20 + $0x12] sm:$0xc0] %vm3122_vm8, %v2952_v19  ;;  %v3134_v37 = vrot.slane %v2952_v19, 6 }
 0x3fe   : > { %v2930_v49 = vpop.f32.mrf.mxu2  ;;  %v3025_v17 = vpop.f32.mrf.mxu3 }
 0x3ff   : > { %v3113_v25 = vadd.f32 %v3112_v2, %v3111_v44  ;;  %v2931_v51 = vadd.f32 %v2930_v49, %v5257_v8  ;;  %v3039_v46 = vmul.f32 %v5287_v59, %v3025_v17 }
 0x401   : > { %v3114_v30 = vrot.slane %v3113_v25, 1  ;;  %v2945_v18 = vmul.f32 %v5268_v14, %v2931_v51  ;;  %v3047_v22 = vadd.f32 %v5295_v24, %v3039_v46 }
 0x403   : > { %v3115_v3 = vadd.f32 %v3114_v30, %v3113_v25  ;;  %v2953_v21 = vadd.f32 %v5274_v57, %v2945_v18  ;;  %3550 = vst.msk [vmem:[%s5301_s13 + $0x12] sm:$0xc0] %vm3122_vm8, %v3047_v22 }
 0x405   : > { %v3119_v41 = vsel %vm3118_vm5, %v3115_v3, 0.0  ;;  %3549 = vst.msk [vmem:[%s5280_s20 + $0x1a] sm:$0x3f] %vm3124_vm15, %v2953_v21  ;;  %v3135_v8 = vrot.slane %v2953_v21, 6  ;;  %s3360_s20 = sshll.u32 %s5466_s28, 1 }
 0x406   : > { %v3120_v61 = vadd.f32 %v3119_v41, %v3091_v1  ;;  %v3027_v14 = vpop.f32.mrf.mxu3  ;;  %v2933_v54 = vpop.f32.mrf.mxu2  ;;  %s403_s19 = sadd.s32 %s3360_s20, %s3807_s12 }
 0x407   : > { %v3136_v57 = vsel %vm3133_vm2, %v3134_v37, %v3135_v8  ;;  %v3040_v26 = vmul.f32 %v5287_v59, %v3027_v14  ;;  %s404_s26 = scalar_lea.vmem %s5418_s8, %s403_s19 }
 0x408   : > { %v3138_v12 = vsel %vm1572_vm0, %v3136_v57, 0.0 }
 0x409   : > { %v3139_v0 = vrot.slane %v3138_v12, 4  ;;  %v3048_v4 = vadd.f32 %v5295_v24, %v3040_v26 }
 0x40b   : > { %v3140_v39 = vadd.f32 %v3139_v0, %v3138_v12  ;;  %3551 = vst.msk [vmem:[%s5301_s13 + $0x1a] sm:$0x3f] %vm3124_vm15, %v3048_v4 }
 0x40d   : > { %v3141_v63 = vrot.slane %v3140_v39, 2 }
 0x40e   : > { %v3030_v36 = vpop.f32.mrf.mxu3  ;;  %v2934_v16 = vpop.f32.mrf.mxu2 }
 0x40f   : > { %v3142_v32 = vadd.f32 %v3141_v63, %v3140_v39 }
 0x411   : > { %v3143_v43 = vrot.slane %v3142_v32, 1 }
 0x413   : > { %v3144_v59 = vadd.f32 %v3143_v43, %v3142_v32 }
 0x415   : > { %v3148_v24 = vsel %vm3147_vm12, %v3144_v59, 0.0 }
 0x416   : > { %v3149_v45 = vadd.f32 %v3148_v24, %v3120_v61  ;;  %v3031_v6 = vpop.f32.mrf.mxu3 }
 0x418   : > { %3150 = vst.msk [vmem:[%s404_s26] sm:$0x1] %vm2147_vm14, %v3149_v45 }
 0x419 PF: > { %s19_s9 = sadd.s32 1, %s3715_s9   ;;  %s5455_s27 = smov %s3707_s29 }
 0x41a   : > { %p16_p12 = scmp.ge.s32.totalorder %s19_s9, 6   ;;  %s5456_s28 = smov %s3711_s30 }
 0x41b   : > { %s5457_s29 = smov %s5460_s10  ;;  %s5458_s30 = smov %s5464_s11 }
 0x41c   :  { %18 = sbr.rel (!%p16_p12) target bundleno = 3 (0x3), region = 180 }

</bundles_post_ra>
